<compile_context>
chip_gen: v7x
topology: tpu7x:2x2x1
jax: 0.10.0
libtpu: 0.0.40
codegen_flags: <defaults>
</compile_context>

<pallas_src>
import functools
import math

import jax
import jax.numpy as jnp
from jax.experimental import pallas as pl
from jax.experimental.pallas import tpu as pltpu


# --------------------------------------------------------------------------
# Generation-aware VMEM budget (v5e/v6e: 128 MiB physical, v7x: 64 MiB).
# --------------------------------------------------------------------------
def _vmem_limit_bytes():
    cap = None
    try:
        cap = pltpu.get_tpu_info().vmem_capacity_bytes
    except Exception:
        cap = None
    if not cap:
        cap = 64 * 1024 * 1024          # conservative (v7x-sized) fallback
    return max(32 * 1024 * 1024, int(cap) * 3 // 4)


_VMEM_LIMIT = _vmem_limit_bytes()
_SMALL_VMEM = _VMEM_LIMIT < 80 * 1024 * 1024      # v7x-class budget


def _tile(dim, target, align=1):
    """Largest t <= target with t | dim, preferring multiples of `align`."""
    target = max(1, min(dim, target))
    t = (target // align) * align
    while t >= align:
        if dim % t == 0:
            return t
        t -= align
    t = target
    while dim % t:
        t -= 1
    return t


def _tile_rows(M, target):
    """Row tile; keep >= 2 parallel row blocks when possible (v7x: 2 TCs)."""
    tm = _tile(M, target, align=8)
    if M // tm < 2 and M >= 16:
        tm = _tile(M, max(8, M // 2), align=8)
    return tm


# --------------------------------------------------------------------------
# Fused  RMSNorm -> QKV GEMM -> RoPE (+ q scale)   (single kernel, tk == D)
#   x:(M, D)  wqkv_t:(D, (H+2*KVH)*hd)  cos/sin:(M, hd)   out:(M, (H+2*KVH)*hd)
# Column layout of the output: [Q heads | K heads | V heads], hd-wide blocks.
# --------------------------------------------------------------------------
def _qkv_rope_kernel(x_ref, ln_ref, w_ref, cos_ref, sin_ref, o_ref, *,
                     eps, hd, n_q_heads, n_kv_heads, heads_per_tile, scale):
    n = pl.program_id(1)

    # RMSNorm prologue (full hidden row is resident).
    x = x_ref[...].astype(jnp.float32)
    inv = jax.lax.rsqrt(jnp.mean(x * x, axis=-1, keepdims=True) + eps)
    xn = (x * inv * ln_ref[...].astype(jnp.float32)).astype(x_ref.dtype)

    # QKV projection (MXU consumes native dtype, f32 accumulation).
    y = jnp.dot(xn, w_ref[...], preferred_element_type=jnp.float32)

    # RoPE epilogue per hd-wide head block; V blocks pass through,
    # Q blocks additionally absorb the 1/sqrt(hd) attention scale.
    cos = cos_ref[...]                       # (tm, hd)  = [c, c]
    sin = sin_ref[...]                       # (tm, hd)  = [-s, s]
    n_rope_heads = n_q_heads + n_kv_heads
    outs = []
    for hb in range(heads_per_tile):
        hc = n * heads_per_tile + hb         # global head-column index (traced)
        y_h = y[:, hb * hd:(hb + 1) * hd]
        roped = y_h * cos + pltpu.roll(y_h, hd // 2, axis=1) * sin
        res = jnp.where(hc < n_rope_heads, roped, y_h)
        res = jnp.where(hc < n_q_heads, res * scale, res)
        outs.append(res)
    o_ref[...] = jnp.concatenate(outs, axis=-1).astype(o_ref.dtype) \
        if len(outs) > 1 else outs[0].astype(o_ref.dtype)


def qkv_rope_proj(x, ln_w, wqkv_t, rope_cos, rope_sin, *, n_q_heads,
                  n_kv_heads, head_dim, eps, tm_target=256, tn_target=512):
    M, D = x.shape
    n_head_cols = n_q_heads + 2 * n_kv_heads
    Nqkv = n_head_cols * head_dim
    assert wqkv_t.shape == (D, Nqkv)
    tm = _tile_rows(M, tm_target)
    hpt = max(1, min(n_head_cols, tn_target // head_dim))
    while n_head_cols % hpt:
        hpt -= 1
    tn = hpt * head_dim

    S = rope_cos.shape[0]
    assert M % S == 0
    cos_m = jnp.tile(rope_cos.astype(jnp.float32), (M // S, 1))   # (M, hd)
    sin_m = jnp.tile(rope_sin.astype(jnp.float32), (M // S, 1))   # (M, hd)

    kernel = functools.partial(
        _qkv_rope_kernel, eps=eps, hd=head_dim, n_q_heads=n_q_heads,
        n_kv_heads=n_kv_heads, heads_per_tile=hpt,
        scale=1.0 / math.sqrt(head_dim))

    return pl.pallas_call(
        kernel,
        out_shape=jax.ShapeDtypeStruct((M, Nqkv), x.dtype),
        grid=(M // tm, Nqkv // tn),
        in_specs=[
            pl.BlockSpec((tm, D), lambda m, n: (m, 0)),
            pl.BlockSpec((1, D), lambda m, n: (0, 0)),
            pl.BlockSpec((D, tn), lambda m, n: (0, n)),
            pl.BlockSpec((tm, head_dim), lambda m, n: (m, 0)),
            pl.BlockSpec((tm, head_dim), lambda m, n: (m, 0)),
        ],
        out_specs=pl.BlockSpec((tm, tn), lambda m, n: (m, n)),
        compiler_params=pltpu.CompilerParams(
            dimension_semantics=("parallel", "parallel"),
            vmem_limit_bytes=_VMEM_LIMIT),
    )(x, ln_w.reshape(1, D), wqkv_t, cos_m, sin_m)


# --------------------------------------------------------------------------
# Flash attention on the fused QKV slab.
#   grid = (B, KVH, pairs) where `pairs` enumerates only causal (qi, ki) tiles
#   (lower-triangular schedule via scalar prefetch).  One K/V tile services
#   all `groups = H/KVH` query heads of its group (GQA reuse).
# --------------------------------------------------------------------------
def _flash_kernel(qi_ref, ki_ref, q_ref, k_ref, v_ref, o_ref,
                  m_sc, l_sc, acc_sc, *, t, hd, groups, exact_recip):
    p = pl.program_id(2)
    qi = qi_ref[p]
    ki = ki_ref[p]

    @pl.when(ki == 0)
    def _():
        m_sc[...] = jnp.full_like(m_sc, -1e30)
        l_sc[...] = jnp.zeros_like(l_sc)
        acc_sc[...] = jnp.zeros_like(acc_sc)

    k = k_ref[0]                                   # (t, hd)
    v = v_ref[0]                                   # (t, hd)
    qa = q_ref[0]                                  # (t, groups*hd), scale folded

    q_pos = qi * t + jax.lax.broadcasted_iota(jnp.int32, (t, t), 0)
    k_pos = ki * t + jax.lax.broadcasted_iota(jnp.int32, (t, t), 1)
    causal = q_pos >= k_pos

    for g in range(groups):
        q = qa[:, g * hd:(g + 1) * hd]
        s = jax.lax.dot_general(q, k, (((1,), (1,)), ((), ())),
                                preferred_element_type=jnp.float32)
        s = jnp.where(causal, s, -1e30)
        m_prev = m_sc[g]
        m_new = jnp.maximum(m_prev, jnp.max(s, axis=-1, keepdims=True))
        alpha = jnp.exp(m_prev - m_new)
        prob = jnp.exp(s - m_new)
        l_sc[g] = alpha * l_sc[g] + jnp.sum(prob, axis=-1, keepdims=True)
        acc_sc[g] = alpha * acc_sc[g] + jnp.dot(
            prob.astype(v.dtype), v, preferred_element_type=jnp.float32)
        m_sc[g] = m_new

    @pl.when(ki == qi)        # last KV tile for this query tile (triangular)
    def _():
        outs = []
        for g in range(groups):
            inv = pl.reciprocal(l_sc[g], approx=not exact_recip)
            outs.append(acc_sc[g] * inv)
        o_ref[0] = (jnp.concatenate(outs, axis=-1)
                    if len(outs) > 1 else outs[0]).astype(o_ref.dtype)


def flash_attention(qkv, *, n_heads, n_kv_heads, head_dim, kv_tile_target=512):
    B, S, _ = qkv.shape
    groups = n_heads // n_kv_heads
    t = _tile(S, kv_tile_target, align=8)
    nqt = S // t

    qi_l, ki_l = [], []
    for qi in range(nqt):
        for ki in range(qi + 1):
            qi_l.append(qi)
            ki_l.append(ki)
    qi_arr = jnp.asarray(qi_l, dtype=jnp.int32)
    ki_arr = jnp.asarray(ki_l, dtype=jnp.int32)
    n_pairs = len(qi_l)

    gd = groups * head_dim
    kernel = functools.partial(
        _flash_kernel, t=t, hd=head_dim, groups=groups,
        exact_recip=(qkv.dtype == jnp.float32))

    grid_spec = pltpu.PrefetchScalarGridSpec(
        num_scalar_prefetch=2,
        grid=(B, n_kv_heads, n_pairs),
        in_specs=[
            pl.BlockSpec((1, t, gd),
                         lambda b, kvh, p, qi, ki: (b, qi[p], kvh)),
            pl.BlockSpec((1, t, head_dim),
                         lambda b, kvh, p, qi, ki: (b, ki[p], n_heads + kvh)),
            pl.BlockSpec((1, t, head_dim),
                         lambda b, kvh, p, qi, ki:
                         (b, ki[p], n_heads + n_kv_heads + kvh)),
        ],
        out_specs=pl.BlockSpec((1, t, gd),
                               lambda b, kvh, p, qi, ki: (b, qi[p], kvh)),
        scratch_shapes=[
            pltpu.VMEM((groups, t, 1), jnp.float32),          # running max
            pltpu.VMEM((groups, t, 1), jnp.float32),          # running sum
            pltpu.VMEM((groups, t, head_dim), jnp.float32),   # running output
        ],
    )
    return pl.pallas_call(
        kernel,
        grid_spec=grid_spec,
        out_shape=jax.ShapeDtypeStruct((B, S, n_heads * head_dim), qkv.dtype),
        compiler_params=pltpu.CompilerParams(
            dimension_semantics=("parallel", "parallel", "arbitrary"),
            vmem_limit_bytes=_VMEM_LIMIT),
    )(qi_arr, ki_arr, qkv, qkv, qkv)


# --------------------------------------------------------------------------
# o_proj:  out = x @ w_t + residual   (K-tiled, f32 VMEM accumulator)
# --------------------------------------------------------------------------
def _matmul_residual_kernel(x_ref, w_ref, r_ref, o_ref, acc_ref):
    @pl.when(pl.program_id(2) == 0)
    def _():
        acc_ref[...] = jnp.zeros_like(acc_ref)

    acc_ref[...] += jnp.dot(x_ref[...], w_ref[...],
                            preferred_element_type=jnp.float32)

    @pl.when(pl.program_id(2) == pl.num_programs(2) - 1)
    def _():
        o_ref[...] = (acc_ref[...] +
                      r_ref[...].astype(jnp.float32)).astype(o_ref.dtype)


def matmul_residual(x, w_t, residual, *, tm_target=512, tn_target=512,
                    tk_target=1024):
    M, K = x.shape
    K2, N = w_t.shape
    assert K == K2 and residual.shape == (M, N)
    tm = _tile_rows(M, tm_target)
    tn = _tile(N, tn_target, align=128)
    tk = _tile(K, tk_target, align=128)
    return pl.pallas_call(
        _matmul_residual_kernel,
        out_shape=jax.ShapeDtypeStruct((M, N), x.dtype),
        grid=(M // tm, N // tn, K // tk),
        in_specs=[
            pl.BlockSpec((tm, tk), lambda m, n, k: (m, k)),
            pl.BlockSpec((tk, tn), lambda m, n, k: (k, n)),
            pl.BlockSpec((tm, tn), lambda m, n, k: (m, n)),
        ],
        out_specs=pl.BlockSpec((tm, tn), lambda m, n, k: (m, n)),
        scratch_shapes=[pltpu.VMEM((tm, tn), jnp.float32)],
        compiler_params=pltpu.CompilerParams(
            dimension_semantics=("parallel", "parallel", "arbitrary"),
            vmem_limit_bytes=_VMEM_LIMIT),
    )(x, w_t, residual)


# --------------------------------------------------------------------------
# Fused  RMSNorm -> SwiGLU MLP -> down-proj -> +residual   (single kernel)
# The normalized row tile is computed once (i == 0) into a VMEM scratch and
# reused across intermediate-dim tiles; the raw x tile doubles as residual.
# --------------------------------------------------------------------------
def _mlp_kernel(x_ref, ln_ref, wg_ref, wu_ref, wd_ref, o_ref,
                xn_ref, acc_ref, *, eps):
    i = pl.program_id(1)

    @pl.when(i == 0)
    def _():
        acc_ref[...] = jnp.zeros_like(acc_ref)
        x = x_ref[...].astype(jnp.float32)
        inv = jax.lax.rsqrt(jnp.mean(x * x, axis=-1, keepdims=True) + eps)
        xn_ref[...] = (x * inv *
                       ln_ref[...].astype(jnp.float32)).astype(xn_ref.dtype)

    xn = xn_ref[...]
    g = jnp.dot(xn, wg_ref[...], preferred_element_type=jnp.float32)
    u = jnp.dot(xn, wu_ref[...], preferred_element_type=jnp.float32)
    h = (g * jax.nn.sigmoid(g)) * u                   # SiLU(gate) * up, f32
    acc_ref[...] += jnp.dot(h.astype(wd_ref.dtype), wd_ref[...],
                            preferred_element_type=jnp.float32)

    @pl.when(i == pl.num_programs(1) - 1)
    def _():
        o_ref[...] = (acc_ref[...] +
                      x_ref[...].astype(jnp.float32)).astype(o_ref.dtype)


def mlp_block(x, ln_w, wg_t, wu_t, wd_t, *, eps, tm_target=256,
              ti_target=None):
    M, D = x.shape
    I = wg_t.shape[1]
    if ti_target is None:
        ti_target = 256 if _SMALL_VMEM else 512       # v7x vs v5e/v6e budget
    tm = _tile_rows(M, tm_target)
    ti = _tile(I, ti_target, align=128)
    return pl.pallas_call(
        functools.partial(_mlp_kernel, eps=eps),
        out_shape=jax.ShapeDtypeStruct((M, D), x.dtype),
        grid=(M // tm, I // ti),
        in_specs=[
            pl.BlockSpec((tm, D), lambda m, i: (m, 0)),
            pl.BlockSpec((1, D), lambda m, i: (0, 0)),
            pl.BlockSpec((D, ti), lambda m, i: (0, i)),
            pl.BlockSpec((D, ti), lambda m, i: (0, i)),
            pl.BlockSpec((ti, D), lambda m, i: (i, 0)),
        ],
        out_specs=pl.BlockSpec((tm, D), lambda m, i: (m, 0)),
        scratch_shapes=[pltpu.VMEM((tm, D), x.dtype),
                        pltpu.VMEM((tm, D), jnp.float32)],
        compiler_params=pltpu.CompilerParams(
            dimension_semantics=("parallel", "arbitrary"),
            vmem_limit_bytes=_VMEM_LIMIT),
    )(x, ln_w.reshape(1, D), wg_t, wu_t, wd_t)


# --------------------------------------------------------------------------
# TransformerBlock forward (prefill, start_pos=0, chunk_prefilling=False).
# --------------------------------------------------------------------------
def transformer_block_forward(x, params, rope_cos, rope_sin, *,
                              kv_tile_target=512):
    B, S, D = x.shape
    H = params["n_heads"]
    KVH = params["n_kv_heads"]
    assert D % H == 0 and H % KVH == 0
    hd = D // H
    eps = params["eps"]

    xf = x.reshape(B * S, D)

    # RMSNorm + fused QKV GEMM + RoPE (+ 1/sqrt(hd) on Q) — one kernel.
    qkv = qkv_rope_proj(xf, params["input_layernorm"], params["wqkv_t"],
                        rope_cos, rope_sin, n_q_heads=H, n_kv_heads=KVH,
                        head_dim=hd, eps=eps)

    # Flash attention straight off the QKV slab (head/GQA selection + causal
    # triangular schedule handled by BlockSpecs) — no transposes or slices.
    attn = flash_attention(qkv.reshape(B, S, -1), n_heads=H, n_kv_heads=KVH,
                           head_dim=hd, kv_tile_target=kv_tile_target)

    # o_proj with the residual add fused into the epilogue (reshape = view).
    h = matmul_residual(attn.reshape(B * S, H * hd), params["wo_t"], xf)

    # RMSNorm + SwiGLU + down-proj + residual — one kernel.
    out = mlp_block(h, params["post_attention_layernorm"], params["wgate_t"],
                    params["wup_t"], params["wdown_t"], eps=eps)
    return out.reshape(B, S, D)


# --------------------------------------------------------------------------
# Pure-JAX reference (mirrors the PyTorch module) for validation.
# --------------------------------------------------------------------------
def _ref_rmsnorm(x, w, eps):
    xf = x.astype(jnp.float32)
    inv = jax.lax.rsqrt(jnp.mean(xf * xf, axis=-1, keepdims=True) + eps)
    return (xf * inv * w).astype(x.dtype)


def _ref_rope(t, cos, sin):
    hd = t.shape[-1]
    t1 = t[..., : hd // 2]
    t2 = t[..., hd // 2:]
    c = cos[None, :, None, :]
    s = sin[None, :, None, :]
    return jnp.concatenate([t1 * c - t2 * s, t1 * s + t2 * c],
                           axis=-1).astype(t.dtype)


def reference_forward(x, raw, cos, sin, H, KVH, eps):
    B, S, D = x.shape
    hd = D // H
    groups = H // KVH
    hn = _ref_rmsnorm(x, raw["input_layernorm"], eps)
    xq = (hn @ raw["q_proj"].T).reshape(B, S, H, hd)
    xk = (hn @ raw["k_proj"].T).reshape(B, S, KVH, hd)
    xv = (hn @ raw["v_proj"].T).reshape(B, S, KVH, hd)
    xq = _ref_rope(xq, cos, sin)
    xk = _ref_rope(xk, cos, sin)
    keys = jnp.repeat(xk, groups, axis=2)
    values = jnp.repeat(xv, groups, axis=2)
    q = xq.transpose(0, 2, 1, 3)
    k = keys.transpose(0, 2, 1, 3)
    v = values.transpose(0, 2, 1, 3)
    scores = jnp.einsum("bhqd,bhkd->bhqk", q, k) / math.sqrt(hd)
    mask = jnp.triu(jnp.full((S, S), -1e30, jnp.float32), k=1)
    scores = scores + mask[None, None]
    p = jax.nn.softmax(scores.astype(jnp.float32), axis=-1)
    o = jnp.einsum("bhqk,bhkd->bhqd", p, v)
    o = o.transpose(0, 2, 1, 3).reshape(B, S, H * hd)
    h = x + o @ raw["o_proj"].T
    hn2 = _ref_rmsnorm(h, raw["post_attention_layernorm"], eps)
    g = hn2 @ raw["gate_proj"].T
    u = hn2 @ raw["up_proj"].T
    return h + (jax.nn.silu(g) * u) @ raw["down_proj"].T


# --------------------------------------------------------------------------
# Main
# --------------------------------------------------------------------------
if __name__ == "__main__":
    # Small but lane-aligned shapes (head_dim = 128, as in production Llama).
    B, S, D = 2, 64, 256
    H, KVH = 2, 1
    hd = D // H
    I = 512
    eps = 1e-6
    rope_theta = 10000.0

    key = jax.random.PRNGKey(0)
    ks = jax.random.split(key, 8)

    def winit(k, shape):
        return (0.02 * jax.random.normal(k, shape)).astype(jnp.float32)

    # raw weights in torch nn.Linear layout (out, in)
    raw = {
        "q_proj": winit(ks[0], (H * hd, D)),
        "k_proj": winit(ks[1], (KVH * hd, D)),
        "v_proj": winit(ks[2], (KVH * hd, D)),
        "o_proj": winit(ks[3], (D, H * hd)),
        "gate_proj": winit(ks[4], (I, D)),
        "up_proj": winit(ks[5], (I, D)),
        "down_proj": winit(ks[6], (D, I)),
        "input_layernorm": jnp.ones((D,), jnp.float32),
        "post_attention_layernorm": jnp.ones((D,), jnp.float32),
    }

    # Pre-transpose / fuse weights ONCE at parameter load.
    params = {
        "n_heads": H,
        "n_kv_heads": KVH,
        "eps": eps,
        "wqkv_t": jnp.concatenate(
            [raw["q_proj"], raw["k_proj"], raw["v_proj"]], axis=0).T,
        "wo_t": raw["o_proj"].T,
        "wgate_t": raw["gate_proj"].T,
        "wup_t": raw["up_proj"].T,
        "wdown_t": raw["down_proj"].T,
        "input_layernorm": raw["input_layernorm"],
        "post_attention_layernorm": raw["post_attention_layernorm"],
    }

    x = jax.random.normal(ks[7], (B, S, D), dtype=jnp.float32)

    # Rotary tables (freqs_cis equivalent).
    inv_freq = 1.0 / (rope_theta **
                      (jnp.arange(0, hd, 2, dtype=jnp.float32) / hd))
    pos = jnp.arange(S, dtype=jnp.float32)
    ang = pos[:, None] * inv_freq[None, :]
    cos_half, sin_half = jnp.cos(ang), jnp.sin(ang)              # (S, hd//2)
    # Tables consumed by the fused RoPE epilogue: [c, c] and [-s, s].
    rope_cos = jnp.concatenate([cos_half, cos_half], axis=-1)    # (S, hd)
    rope_sin = jnp.concatenate([-sin_half, sin_half], axis=-1)   # (S, hd)

    # Small kv tile to exercise the multi-tile triangular schedule in the test
    # (production default is 512).
    fwd = jax.jit(functools.partial(transformer_block_forward, params=params,
                                    rope_cos=rope_cos, rope_sin=rope_sin,
                                    kv_tile_target=16))
    out = fwd(x)
    jax.block_until_ready(out)

    ref = reference_forward(x, raw, cos_half, sin_half, H, KVH, eps)

    assert out.shape == (B, S, D)
    assert bool(jnp.all(jnp.isfinite(out)))
    err = float(jnp.max(jnp.abs(out - ref)))
    assert bool(jnp.allclose(out, ref, atol=2e-3, rtol=2e-3)), err
    print("KERNEL_OK")
</pallas_src>

<mosaic_0001>
module attributes {stable_mosaic.version = 11 : i64} {
  func.func @_qkv_rope_kernel(%arg0: i32, %arg1: i32, %arg2: memref<64x256xf32, #tpu.memory_space<vmem>>, %arg3: memref<1x256xf32, #tpu.memory_space<vmem>>, %arg4: memref<256x512xf32, #tpu.memory_space<vmem>>, %arg5: memref<64x128xf32, #tpu.memory_space<vmem>>, %arg6: memref<64x128xf32, #tpu.memory_space<vmem>>, %arg7: memref<64x512xf32, #tpu.memory_space<vmem>>) attributes {dimension_semantics = [#tpu.dimension_semantics<parallel>, #tpu.dimension_semantics<parallel>], iteration_bounds = array<i64: 2, 1>, scalar_prefetch = 0 : i64, scratch_operands = 0 : i64, tpu.core_type = #tpu.core_type<tc>, window_params = [{transform_indices = @transform_0, window_bounds = array<i64: 64, 256>}, {pipeline_mode = #tpu.pipeline_mode<synchronous>, transform_indices = @transform_1, window_bounds = array<i64: 1, 256>}, {transform_indices = @transform_2, window_bounds = array<i64: 256, 512>}, {transform_indices = @transform_3, window_bounds = array<i64: 64, 128>}, {transform_indices = @transform_4, window_bounds = array<i64: 64, 128>}, {transform_indices = @transform_5, window_bounds = array<i64: 64, 512>}]} {
    %c0 = arith.constant 0 : index
    %c0_0 = arith.constant 0 : index
    %0 = vector.load %arg2[%c0, %c0_0] : memref<64x256xf32, #tpu.memory_space<vmem>>, vector<64x256xf32>
    %1 = arith.mulf %0, %0 : vector<64x256xf32>
    %cst = arith.constant dense<0.000000e+00> : vector<64xf32>
    %2 = vector.multi_reduction <add>, %1, %cst [1] : vector<64x256xf32> to vector<64xf32>
    %3 = vector.shape_cast %2 : vector<64xf32> to vector<64x1xf32>
    %cst_1 = arith.constant 2.560000e+02 : f32
    %4 = vector.broadcast %cst_1 : f32 to vector<64x1xf32>
    %5 = arith.divf %3, %4 : vector<64x1xf32>
    %cst_2 = arith.constant 9.99999997E-7 : f32
    %6 = vector.broadcast %cst_2 : f32 to vector<64x1xf32>
    %7 = arith.addf %5, %6 : vector<64x1xf32>
    %8 = math.rsqrt %7 : vector<64x1xf32>
    %9 = vector.broadcast %8 : vector<64x1xf32> to vector<64x256xf32>
    %10 = arith.mulf %0, %9 : vector<64x256xf32>
    %c0_3 = arith.constant 0 : index
    %c0_4 = arith.constant 0 : index
    %11 = vector.load %arg3[%c0_3, %c0_4] : memref<1x256xf32, #tpu.memory_space<vmem>>, vector<1x256xf32>
    %12 = vector.broadcast %11 : vector<1x256xf32> to vector<64x256xf32>
    %13 = arith.mulf %10, %12 : vector<64x256xf32>
    %c0_5 = arith.constant 0 : index
    %c0_6 = arith.constant 0 : index
    %14 = vector.load %arg4[%c0_5, %c0_6] : memref<256x512xf32, #tpu.memory_space<vmem>>, vector<256x512xf32>
    %cst_7 = arith.constant dense<0.000000e+00> : vector<64x512xf32>
    %15 = tpu.matmul %13, %14, %cst_7 {dimension_numbers = #tpu.dot_dimension_numbers<[1], [0], [0], [1], [0, 0, 1, 1], [], []>} : vector<64x256xf32>, vector<256x512xf32>, vector<64x512xf32> -> vector<64x512xf32>
    %c0_8 = arith.constant 0 : index
    %c0_9 = arith.constant 0 : index
    %16 = vector.load %arg5[%c0_8, %c0_9] : memref<64x128xf32, #tpu.memory_space<vmem>>, vector<64x128xf32>
    %c0_10 = arith.constant 0 : index
    %c0_11 = arith.constant 0 : index
    %17 = vector.load %arg6[%c0_10, %c0_11] : memref<64x128xf32, #tpu.memory_space<vmem>>, vector<64x128xf32>
    %c4_i32 = arith.constant 4 : i32
    %18 = arith.muli %arg1, %c4_i32 : i32
    %c0_i32 = arith.constant 0 : i32
    %19 = arith.addi %18, %c0_i32 : i32
    %20 = vector.extract_strided_slice %15 {offsets = [0, 0], sizes = [64, 128], strides = [1, 1]} : vector<64x512xf32> to vector<64x128xf32>
    %21 = arith.mulf %20, %16 : vector<64x128xf32>
    %c64_i32 = arith.constant 64 : i32
    %22 = tpu.dynamic_rotate %20 by %c64_i32 dim 1 : vector<64x128xf32>, i32 -> vector<64x128xf32>
    %23 = arith.mulf %22, %17 : vector<64x128xf32>
    %24 = arith.addf %21, %23 : vector<64x128xf32>
    %c3_i32 = arith.constant 3 : i32
    %25 = arith.cmpi slt, %19, %c3_i32 : i32
    %26 = arith.select %25, %24, %20 : vector<64x128xf32>
    %c2_i32 = arith.constant 2 : i32
    %27 = arith.cmpi slt, %19, %c2_i32 : i32
    %cst_12 = arith.constant 0.0883883461 : f32
    %28 = vector.broadcast %cst_12 : f32 to vector<64x128xf32>
    %29 = arith.mulf %26, %28 : vector<64x128xf32>
    %30 = arith.select %27, %29, %26 : vector<64x128xf32>
    %c4_i32_13 = arith.constant 4 : i32
    %31 = arith.muli %arg1, %c4_i32_13 : i32
    %c1_i32 = arith.constant 1 : i32
    %32 = arith.addi %31, %c1_i32 : i32
    %33 = vector.extract_strided_slice %15 {offsets = [0, 128], sizes = [64, 128], strides = [1, 1]} : vector<64x512xf32> to vector<64x128xf32>
    %34 = arith.mulf %33, %16 : vector<64x128xf32>
    %c64_i32_14 = arith.constant 64 : i32
    %35 = tpu.dynamic_rotate %33 by %c64_i32_14 dim 1 : vector<64x128xf32>, i32 -> vector<64x128xf32>
    %36 = arith.mulf %35, %17 : vector<64x128xf32>
    %37 = arith.addf %34, %36 : vector<64x128xf32>
    %c3_i32_15 = arith.constant 3 : i32
    %38 = arith.cmpi slt, %32, %c3_i32_15 : i32
    %39 = arith.select %38, %37, %33 : vector<64x128xf32>
    %c2_i32_16 = arith.constant 2 : i32
    %40 = arith.cmpi slt, %32, %c2_i32_16 : i32
    %cst_17 = arith.constant 0.0883883461 : f32
    %41 = vector.broadcast %cst_17 : f32 to vector<64x128xf32>
    %42 = arith.mulf %39, %41 : vector<64x128xf32>
    %43 = arith.select %40, %42, %39 : vector<64x128xf32>
    %c4_i32_18 = arith.constant 4 : i32
    %44 = arith.muli %arg1, %c4_i32_18 : i32
    %c2_i32_19 = arith.constant 2 : i32
    %45 = arith.addi %44, %c2_i32_19 : i32
    %46 = vector.extract_strided_slice %15 {offsets = [0, 256], sizes = [64, 128], strides = [1, 1]} : vector<64x512xf32> to vector<64x128xf32>
    %47 = arith.mulf %46, %16 : vector<64x128xf32>
    %c64_i32_20 = arith.constant 64 : i32
    %48 = tpu.dynamic_rotate %46 by %c64_i32_20 dim 1 : vector<64x128xf32>, i32 -> vector<64x128xf32>
    %49 = arith.mulf %48, %17 : vector<64x128xf32>
    %50 = arith.addf %47, %49 : vector<64x128xf32>
    %c3_i32_21 = arith.constant 3 : i32
    %51 = arith.cmpi slt, %45, %c3_i32_21 : i32
    %52 = arith.select %51, %50, %46 : vector<64x128xf32>
    %c2_i32_22 = arith.constant 2 : i32
    %53 = arith.cmpi slt, %45, %c2_i32_22 : i32
    %cst_23 = arith.constant 0.0883883461 : f32
    %54 = vector.broadcast %cst_23 : f32 to vector<64x128xf32>
    %55 = arith.mulf %52, %54 : vector<64x128xf32>
    %56 = arith.select %53, %55, %52 : vector<64x128xf32>
    %c4_i32_24 = arith.constant 4 : i32
    %57 = arith.muli %arg1, %c4_i32_24 : i32
    %c3_i32_25 = arith.constant 3 : i32
    %58 = arith.addi %57, %c3_i32_25 : i32
    %59 = vector.extract_strided_slice %15 {offsets = [0, 384], sizes = [64, 128], strides = [1, 1]} : vector<64x512xf32> to vector<64x128xf32>
    %60 = arith.mulf %59, %16 : vector<64x128xf32>
    %c64_i32_26 = arith.constant 64 : i32
    %61 = tpu.dynamic_rotate %59 by %c64_i32_26 dim 1 : vector<64x128xf32>, i32 -> vector<64x128xf32>
    %62 = arith.mulf %61, %17 : vector<64x128xf32>
    %63 = arith.addf %60, %62 : vector<64x128xf32>
    %c3_i32_27 = arith.constant 3 : i32
    %64 = arith.cmpi slt, %58, %c3_i32_27 : i32
    %65 = arith.select %64, %63, %59 : vector<64x128xf32>
    %c2_i32_28 = arith.constant 2 : i32
    %66 = arith.cmpi slt, %58, %c2_i32_28 : i32
    %cst_29 = arith.constant 0.0883883461 : f32
    %67 = vector.broadcast %cst_29 : f32 to vector<64x128xf32>
    %68 = arith.mulf %65, %67 : vector<64x128xf32>
    %69 = arith.select %66, %68, %65 : vector<64x128xf32>
    %70 = tpu.concatenate %30, %43, %56, %69 in 1 : vector<64x128xf32>, vector<64x128xf32>, vector<64x128xf32>, vector<64x128xf32> -> vector<64x512xf32>
    %c0_30 = arith.constant 0 : index
    %c0_31 = arith.constant 0 : index
    %71 = vector.load %arg7[%c0_30, %c0_31] : memref<64x512xf32, #tpu.memory_space<vmem>>, vector<64x512xf32>
    tpu.vector_store %arg7[%c0_30, %c0_31], %70 {strides = array<i32>} : memref<64x512xf32, #tpu.memory_space<vmem>>, vector<64x512xf32>,
    return
  }
  func.func @transform_0(%arg0: i32, %arg1: i32) -> (i32, i32) {
    %c0_i32 = arith.constant 0 : i32
    %c0_i32_0 = arith.constant 0 : i32
    return %arg0, %c0_i32 : i32, i32
  }
  func.func @transform_1(%arg0: i32, %arg1: i32) -> (i32, i32) {
    %c0_i32 = arith.constant 0 : i32
    %c0_i32_0 = arith.constant 0 : i32
    %c0_i32_1 = arith.constant 0 : i32
    return %c0_i32, %c0_i32_0 : i32, i32
  }
  func.func @transform_2(%arg0: i32, %arg1: i32) -> (i32, i32) {
    %c0_i32 = arith.constant 0 : i32
    %c0_i32_0 = arith.constant 0 : i32
    return %c0_i32, %arg1 : i32, i32
  }
  func.func @transform_3(%arg0: i32, %arg1: i32) -> (i32, i32) {
    %c0_i32 = arith.constant 0 : i32
    %c0_i32_0 = arith.constant 0 : i32
    return %arg0, %c0_i32 : i32, i32
  }
  func.func @transform_4(%arg0: i32, %arg1: i32) -> (i32, i32) {
    %c0_i32 = arith.constant 0 : i32
    %c0_i32_0 = arith.constant 0 : i32
    return %arg0, %c0_i32 : i32, i32
  }
  func.func @transform_5(%arg0: i32, %arg1: i32) -> (i32, i32) {
    %c0_i32 = arith.constant 0 : i32
    return %arg0, %arg1 : i32, i32
  }
}

module attributes {stable_mosaic.version = 11 : i64} {
  func.func @_matmul_residual_kernel(%arg0: i32, %arg1: i32, %arg2: i32, %arg3: memref<64x256xf32, #tpu.memory_space<vmem>>, %arg4: memref<256x256xf32, #tpu.memory_space<vmem>>, %arg5: memref<64x256xf32, #tpu.memory_space<vmem>>, %arg6: memref<64x256xf32, #tpu.memory_space<vmem>>, %arg7: memref<64x256xf32, #tpu.memory_space<vmem>>) attributes {dimension_semantics = [#tpu.dimension_semantics<parallel>, #tpu.dimension_semantics<parallel>, #tpu.dimension_semantics<arbitrary>], iteration_bounds = array<i64: 2, 1, 1>, scalar_prefetch = 0 : i64, scratch_operands = 1 : i64, tpu.core_type = #tpu.core_type<tc>, window_params = [{transform_indices = @transform_0, window_bounds = array<i64: 64, 256>}, {transform_indices = @transform_1, window_bounds = array<i64: 256, 256>}, {transform_indices = @transform_2, window_bounds = array<i64: 64, 256>}, {transform_indices = @transform_3, window_bounds = array<i64: 64, 256>}]} {
    %c0_i32 = arith.constant 0 : i32
    %0 = arith.cmpi eq, %arg2, %c0_i32 : i32
    %1 = arith.extui %0 : i1 to i32
    %c0_i32_0 = arith.constant 0 : i32
    %2 = arith.cmpi ne, %1, %c0_i32_0 : i32
    scf.if %2 {
      %cst_10 = arith.constant 0.000000e+00 : f32
      %12 = vector.broadcast %cst_10 : f32 to vector<64x256xf32>
      %c0_11 = arith.constant 0 : index
      %c0_12 = arith.constant 0 : index
      %13 = vector.load %arg7[%c0_11, %c0_12] : memref<64x256xf32, #tpu.memory_space<vmem>>, vector<64x256xf32>
      tpu.vector_store %arg7[%c0_11, %c0_12], %12 {strides = array<i32>} : memref<64x256xf32, #tpu.memory_space<vmem>>, vector<64x256xf32>,
    } else {
    }
    %c0 = arith.constant 0 : index
    %c0_1 = arith.constant 0 : index
    %3 = vector.load %arg7[%c0, %c0_1] : memref<64x256xf32, #tpu.memory_space<vmem>>, vector<64x256xf32>
    %c0_2 = arith.constant 0 : index
    %c0_3 = arith.constant 0 : index
    %4 = vector.load %arg3[%c0_2, %c0_3] : memref<64x256xf32, #tpu.memory_space<vmem>>, vector<64x256xf32>
    %c0_4 = arith.constant 0 : index
    %c0_5 = arith.constant 0 : index
    %5 = vector.load %arg4[%c0_4, %c0_5] : memref<256x256xf32, #tpu.memory_space<vmem>>, vector<256x256xf32>
    %cst = arith.constant dense<0.000000e+00> : vector<64x256xf32>
    %6 = tpu.matmul %4, %5, %cst {dimension_numbers = #tpu.dot_dimension_numbers<[1], [0], [0], [1], [0, 0, 1, 1], [], []>} : vector<64x256xf32>, vector<256x256xf32>, vector<64x256xf32> -> vector<64x256xf32>
    %7 = arith.addf %3, %6 : vector<64x256xf32>
    %c0_6 = arith.constant 0 : index
    %c0_7 = arith.constant 0 : index
    %8 = vector.load %arg7[%c0_6, %c0_7] : memref<64x256xf32, #tpu.memory_space<vmem>>, vector<64x256xf32>
    tpu.vector_store %arg7[%c0_6, %c0_7], %7 {strides = array<i32>} : memref<64x256xf32, #tpu.memory_space<vmem>>, vector<64x256xf32>,
    %c0_i32_8 = arith.constant 0 : i32
    %9 = arith.cmpi eq, %arg2, %c0_i32_8 : i32
    %10 = arith.extui %9 : i1 to i32
    %c0_i32_9 = arith.constant 0 : i32
    %11 = arith.cmpi ne, %10, %c0_i32_9 : i32
    scf.if %11 {
      %c0_10 = arith.constant 0 : index
      %c0_11 = arith.constant 0 : index
      %12 = vector.load %arg7[%c0_10, %c0_11] : memref<64x256xf32, #tpu.memory_space<vmem>>, vector<64x256xf32>
      %c0_12 = arith.constant 0 : index
      %c0_13 = arith.constant 0 : index
      %13 = vector.load %arg5[%c0_12, %c0_13] : memref<64x256xf32, #tpu.memory_space<vmem>>, vector<64x256xf32>
      %14 = arith.addf %12, %13 : vector<64x256xf32>
      %c0_14 = arith.constant 0 : index
      %c0_15 = arith.constant 0 : index
      %15 = vector.load %arg6[%c0_14, %c0_15] : memref<64x256xf32, #tpu.memory_space<vmem>>, vector<64x256xf32>
      tpu.vector_store %arg6[%c0_14, %c0_15], %14 {strides = array<i32>} : memref<64x256xf32, #tpu.memory_space<vmem>>, vector<64x256xf32>,
    } else {
    }
    return
  }
  func.func @transform_0(%arg0: i32, %arg1: i32, %arg2: i32) -> (i32, i32) {
    %c0_i32 = arith.constant 0 : i32
    return %arg0, %arg2 : i32, i32
  }
  func.func @transform_1(%arg0: i32, %arg1: i32, %arg2: i32) -> (i32, i32) {
    %c0_i32 = arith.constant 0 : i32
    return %arg2, %arg1 : i32, i32
  }
  func.func @transform_2(%arg0: i32, %arg1: i32, %arg2: i32) -> (i32, i32) {
    %c0_i32 = arith.constant 0 : i32
    return %arg0, %arg1 : i32, i32
  }
  func.func @transform_3(%arg0: i32, %arg1: i32, %arg2: i32) -> (i32, i32) {
    %c0_i32 = arith.constant 0 : i32
    return %arg0, %arg1 : i32, i32
  }
}

module attributes {stable_mosaic.version = 11 : i64} {
  func.func @_flash_kernel(%arg0: i32, %arg1: i32, %arg2: i32, %arg3: memref<10xi32, #tpu.memory_space<smem>>, %arg4: memref<10xi32, #tpu.memory_space<smem>>, %arg5: memref<1x16x256xf32, #tpu.memory_space<vmem>>, %arg6: memref<1x16x128xf32, #tpu.memory_space<vmem>>, %arg7: memref<1x16x128xf32, #tpu.memory_space<vmem>>, %arg8: memref<1x16x256xf32, #tpu.memory_space<vmem>>, %arg9: memref<2x16x1xf32, #tpu.memory_space<vmem>>, %arg10: memref<2x16x1xf32, #tpu.memory_space<vmem>>, %arg11: memref<2x16x128xf32, #tpu.memory_space<vmem>>) attributes {dimension_semantics = [#tpu.dimension_semantics<parallel>, #tpu.dimension_semantics<parallel>, #tpu.dimension_semantics<arbitrary>], iteration_bounds = array<i64: 2, 1, 10>, scalar_prefetch = 2 : i64, scratch_operands = 3 : i64, tpu.core_type = #tpu.core_type<tc>, window_params = [{transform_indices = @transform_0, window_bounds = array<i64: 1, 16, 256>}, {transform_indices = @transform_1, window_bounds = array<i64: 1, 16, 128>}, {transform_indices = @transform_2, window_bounds = array<i64: 1, 16, 128>}, {transform_indices = @transform_3, window_bounds = array<i64: 1, 16, 256>}]} {
    %0 = arith.index_cast %arg2 : i32 to index
    %1 = memref.load %arg3[%0] : memref<10xi32, #tpu.memory_space<smem>>
    %2 = arith.index_cast %arg2 : i32 to index
    %3 = memref.load %arg4[%2] : memref<10xi32, #tpu.memory_space<smem>>
    %c0_i32 = arith.constant 0 : i32
    %4 = arith.cmpi eq, %3, %c0_i32 : i32
    %5 = arith.extui %4 : i1 to i32
    %c0_i32_0 = arith.constant 0 : i32
    %6 = arith.cmpi ne, %5, %c0_i32_0 : i32
    scf.if %6 {
      %cst_55 = arith.constant -1.000000e+30 : f32
      %95 = vector.broadcast %cst_55 : f32 to vector<2x16x1xf32>
      %c0_56 = arith.constant 0 : index
      %c0_57 = arith.constant 0 : index
      %c0_58 = arith.constant 0 : index
      %96 = vector.load %arg9[%c0_56, %c0_57, %c0_58] : memref<2x16x1xf32, #tpu.memory_space<vmem>>, vector<2x16x1xf32>
      tpu.vector_store %arg9[%c0_56, %c0_57, %c0_58], %95 {strides = array<i32>} : memref<2x16x1xf32, #tpu.memory_space<vmem>>, vector<2x16x1xf32>,
      %cst_59 = arith.constant 0.000000e+00 : f32
      %97 = vector.broadcast %cst_59 : f32 to vector<2x16x1xf32>
      %c0_60 = arith.constant 0 : index
      %c0_61 = arith.constant 0 : index
      %c0_62 = arith.constant 0 : index
      %98 = vector.load %arg10[%c0_60, %c0_61, %c0_62] : memref<2x16x1xf32, #tpu.memory_space<vmem>>, vector<2x16x1xf32>
      tpu.vector_store %arg10[%c0_60, %c0_61, %c0_62], %97 {strides = array<i32>} : memref<2x16x1xf32, #tpu.memory_space<vmem>>, vector<2x16x1xf32>,
      %cst_63 = arith.constant 0.000000e+00 : f32
      %99 = vector.broadcast %cst_63 : f32 to vector<2x16x128xf32>
      %c0_64 = arith.constant 0 : index
      %c0_65 = arith.constant 0 : index
      %c0_66 = arith.constant 0 : index
      %100 = vector.load %arg11[%c0_64, %c0_65, %c0_66] : memref<2x16x128xf32, #tpu.memory_space<vmem>>, vector<2x16x128xf32>
      tpu.vector_store %arg11[%c0_64, %c0_65, %c0_66], %99 {strides = array<i32>} : memref<2x16x128xf32, #tpu.memory_space<vmem>>, vector<2x16x128xf32>,
    } else {
    }
    %c0 = arith.constant 0 : index
    %c0_1 = arith.constant 0 : index
    %c0_2 = arith.constant 0 : index
    %7 = vector.load %arg6[%c0, %c0_1, %c0_2] : memref<1x16x128xf32, #tpu.memory_space<vmem>>, vector<1x16x128xf32>
    %8 = vector.shape_cast %7 : vector<1x16x128xf32> to vector<16x128xf32>
    %c0_3 = arith.constant 0 : index
    %c0_4 = arith.constant 0 : index
    %c0_5 = arith.constant 0 : index
    %9 = vector.load %arg7[%c0_3, %c0_4, %c0_5] : memref<1x16x128xf32, #tpu.memory_space<vmem>>, vector<1x16x128xf32>
    %10 = vector.shape_cast %9 : vector<1x16x128xf32> to vector<16x128xf32>
    %c0_6 = arith.constant 0 : index
    %c0_7 = arith.constant 0 : index
    %c0_8 = arith.constant 0 : index
    %11 = vector.load %arg5[%c0_6, %c0_7, %c0_8] : memref<1x16x256xf32, #tpu.memory_space<vmem>>, vector<1x16x256xf32>
    %12 = vector.shape_cast %11 : vector<1x16x256xf32> to vector<16x256xf32>
    %c16_i32 = arith.constant 16 : i32
    %13 = arith.muli %1, %c16_i32 : i32
    %14 = tpu.iota {dimensions = array<i32: 0>} : vector<16x16xi32>
    %15 = vector.broadcast %13 : i32 to vector<16x16xi32>
    %16 = arith.addi %15, %14 : vector<16x16xi32>
    %c16_i32_9 = arith.constant 16 : i32
    %17 = arith.muli %3, %c16_i32_9 : i32
    %18 = tpu.iota {dimensions = array<i32: 1>} : vector<16x16xi32>
    %19 = vector.broadcast %17 : i32 to vector<16x16xi32>
    %20 = arith.addi %19, %18 : vector<16x16xi32>
    %21 = arith.cmpi sge, %16, %20 : vector<16x16xi32>
    %22 = vector.extract_strided_slice %12 {offsets = [0, 0], sizes = [16, 128], strides = [1, 1]} : vector<16x256xf32> to vector<16x128xf32>
    %cst = arith.constant dense<0.000000e+00> : vector<16x16xf32>
    %23 = tpu.matmul %22, %8, %cst {dimension_numbers = #tpu.dot_dimension_numbers<[1], [1], [0], [0], [0, 0, 1, 0], [], []>} : vector<16x128xf32>, vector<16x128xf32>, vector<16x16xf32> -> vector<16x16xf32>
    %cst_10 = arith.constant -1.000000e+30 : f32
    %24 = vector.broadcast %cst_10 : f32 to vector<16x16xf32>
    %25 = arith.select %21, %23, %24 : vector<16x16xi1>, vector<16x16xf32>
    %c0_11 = arith.constant 0 : index
    %c0_12 = arith.constant 0 : index
    %c0_13 = arith.constant 0 : index
    %26 = vector.load %arg9[%c0_11, %c0_12, %c0_13] : memref<2x16x1xf32, #tpu.memory_space<vmem>>, vector<1x16x1xf32>
    %27 = vector.shape_cast %26 : vector<1x16x1xf32> to vector<16x1xf32>
    %cst_14 = arith.constant dense<0xFF800000> : vector<16xf32>
    %28 = vector.multi_reduction <maximumf>, %25, %cst_14 [1] : vector<16x16xf32> to vector<16xf32>
    %29 = vector.shape_cast %28 : vector<16xf32> to vector<16x1xf32>
    %30 = arith.maximumf %27, %29 : vector<16x1xf32>
    %31 = arith.subf %27, %30 : vector<16x1xf32>
    %32 = math.exp %31 : vector<16x1xf32>
    %33 = vector.broadcast %30 : vector<16x1xf32> to vector<16x16xf32>
    %34 = arith.subf %25, %33 : vector<16x16xf32>
    %35 = math.exp %34 : vector<16x16xf32>
    %c0_15 = arith.constant 0 : index
    %c0_16 = arith.constant 0 : index
    %c0_17 = arith.constant 0 : index
    %36 = vector.load %arg10[%c0_15, %c0_16, %c0_17] : memref<2x16x1xf32, #tpu.memory_space<vmem>>, vector<1x16x1xf32>
    %37 = vector.shape_cast %36 : vector<1x16x1xf32> to vector<16x1xf32>
    %38 = arith.mulf %32, %37 : vector<16x1xf32>
    %cst_18 = arith.constant dense<0.000000e+00> : vector<16xf32>
    %39 = vector.multi_reduction <add>, %35, %cst_18 [1] : vector<16x16xf32> to vector<16xf32>
    %40 = vector.shape_cast %39 : vector<16xf32> to vector<16x1xf32>
    %41 = arith.addf %38, %40 : vector<16x1xf32>
    %c0_19 = arith.constant 0 : index
    %c0_20 = arith.constant 0 : index
    %c0_21 = arith.constant 0 : index
    %42 = vector.load %arg10[%c0_19, %c0_20, %c0_21] : memref<2x16x1xf32, #tpu.memory_space<vmem>>, vector<1x16x1xf32>
    %43 = vector.shape_cast %42 : vector<1x16x1xf32> to vector<16x1xf32>
    %44 = vector.shape_cast %41 : vector<16x1xf32> to vector<1x16x1xf32>
    tpu.vector_store %arg10[%c0_19, %c0_20, %c0_21], %44 {strides = array<i32>} : memref<2x16x1xf32, #tpu.memory_space<vmem>>, vector<1x16x1xf32>,
    %c0_22 = arith.constant 0 : index
    %c0_23 = arith.constant 0 : index
    %c0_24 = arith.constant 0 : index
    %45 = vector.load %arg11[%c0_22, %c0_23, %c0_24] : memref<2x16x128xf32, #tpu.memory_space<vmem>>, vector<1x16x128xf32>
    %46 = vector.shape_cast %45 : vector<1x16x128xf32> to vector<16x128xf32>
    %47 = vector.broadcast %32 : vector<16x1xf32> to vector<16x128xf32>
    %48 = arith.mulf %47, %46 : vector<16x128xf32>
    %cst_25 = arith.constant dense<0.000000e+00> : vector<16x128xf32>
    %49 = tpu.matmul %35, %10, %cst_25 {dimension_numbers = #tpu.dot_dimension_numbers<[1], [0], [0], [1], [0, 0, 1, 1], [], []>} : vector<16x16xf32>, vector<16x128xf32>, vector<16x128xf32> -> vector<16x128xf32>
    %50 = arith.addf %48, %49 : vector<16x128xf32>
    %c0_26 = arith.constant 0 : index
    %c0_27 = arith.constant 0 : index
    %c0_28 = arith.constant 0 : index
    %51 = vector.load %arg11[%c0_26, %c0_27, %c0_28] : memref<2x16x128xf32, #tpu.memory_space<vmem>>, vector<1x16x128xf32>
    %52 = vector.shape_cast %51 : vector<1x16x128xf32> to vector<16x128xf32>
    %53 = vector.shape_cast %50 : vector<16x128xf32> to vector<1x16x128xf32>
    tpu.vector_store %arg11[%c0_26, %c0_27, %c0_28], %53 {strides = array<i32>} : memref<2x16x128xf32, #tpu.memory_space<vmem>>, vector<1x16x128xf32>,
    %c0_29 = arith.constant 0 : index
    %c0_30 = arith.constant 0 : index
    %c0_31 = arith.constant 0 : index
    %54 = vector.load %arg9[%c0_29, %c0_30, %c0_31] : memref<2x16x1xf32, #tpu.memory_space<vmem>>, vector<1x16x1xf32>
    %55 = vector.shape_cast %54 : vector<1x16x1xf32> to vector<16x1xf32>
    %56 = vector.shape_cast %30 : vector<16x1xf32> to vector<1x16x1xf32>
    tpu.vector_store %arg9[%c0_29, %c0_30, %c0_31], %56 {strides = array<i32>} : memref<2x16x1xf32, #tpu.memory_space<vmem>>, vector<1x16x1xf32>,
    %57 = vector.extract_strided_slice %12 {offsets = [0, 128], sizes = [16, 128], strides = [1, 1]} : vector<16x256xf32> to vector<16x128xf32>
    %cst_32 = arith.constant dense<0.000000e+00> : vector<16x16xf32>
    %58 = tpu.matmul %57, %8, %cst_32 {dimension_numbers = #tpu.dot_dimension_numbers<[1], [1], [0], [0], [0, 0, 1, 0], [], []>} : vector<16x128xf32>, vector<16x128xf32>, vector<16x16xf32> -> vector<16x16xf32>
    %cst_33 = arith.constant -1.000000e+30 : f32
    %59 = vector.broadcast %cst_33 : f32 to vector<16x16xf32>
    %60 = arith.select %21, %58, %59 : vector<16x16xi1>, vector<16x16xf32>
    %c1 = arith.constant 1 : index
    %c0_34 = arith.constant 0 : index
    %c0_35 = arith.constant 0 : index
    %61 = vector.load %arg9[%c1, %c0_34, %c0_35] : memref<2x16x1xf32, #tpu.memory_space<vmem>>, vector<1x16x1xf32>
    %62 = vector.shape_cast %61 : vector<1x16x1xf32> to vector<16x1xf32>
    %cst_36 = arith.constant dense<0xFF800000> : vector<16xf32>
    %63 = vector.multi_reduction <maximumf>, %60, %cst_36 [1] : vector<16x16xf32> to vector<16xf32>
    %64 = vector.shape_cast %63 : vector<16xf32> to vector<16x1xf32>
    %65 = arith.maximumf %62, %64 : vector<16x1xf32>
    %66 = arith.subf %62, %65 : vector<16x1xf32>
    %67 = math.exp %66 : vector<16x1xf32>
    %68 = vector.broadcast %65 : vector<16x1xf32> to vector<16x16xf32>
    %69 = arith.subf %60, %68 : vector<16x16xf32>
    %70 = math.exp %69 : vector<16x16xf32>
    %c1_37 = arith.constant 1 : index
    %c0_38 = arith.constant 0 : index
    %c0_39 = arith.constant 0 : index
    %71 = vector.load %arg10[%c1_37, %c0_38, %c0_39] : memref<2x16x1xf32, #tpu.memory_space<vmem>>, vector<1x16x1xf32>
    %72 = vector.shape_cast %71 : vector<1x16x1xf32> to vector<16x1xf32>
    %73 = arith.mulf %67, %72 : vector<16x1xf32>
    %cst_40 = arith.constant dense<0.000000e+00> : vector<16xf32>
    %74 = vector.multi_reduction <add>, %70, %cst_40 [1] : vector<16x16xf32> to vector<16xf32>
    %75 = vector.shape_cast %74 : vector<16xf32> to vector<16x1xf32>
    %76 = arith.addf %73, %75 : vector<16x1xf32>
    %c1_41 = arith.constant 1 : index
    %c0_42 = arith.constant 0 : index
    %c0_43 = arith.constant 0 : index
    %77 = vector.load %arg10[%c1_41, %c0_42, %c0_43] : memref<2x16x1xf32, #tpu.memory_space<vmem>>, vector<1x16x1xf32>
    %78 = vector.shape_cast %77 : vector<1x16x1xf32> to vector<16x1xf32>
    %79 = vector.shape_cast %76 : vector<16x1xf32> to vector<1x16x1xf32>
    tpu.vector_store %arg10[%c1_41, %c0_42, %c0_43], %79 {strides = array<i32>} : memref<2x16x1xf32, #tpu.memory_space<vmem>>, vector<1x16x1xf32>,
    %c1_44 = arith.constant 1 : index
    %c0_45 = arith.constant 0 : index
    %c0_46 = arith.constant 0 : index
    %80 = vector.load %arg11[%c1_44, %c0_45, %c0_46] : memref<2x16x128xf32, #tpu.memory_space<vmem>>, vector<1x16x128xf32>
    %81 = vector.shape_cast %80 : vector<1x16x128xf32> to vector<16x128xf32>
    %82 = vector.broadcast %67 : vector<16x1xf32> to vector<16x128xf32>
    %83 = arith.mulf %82, %81 : vector<16x128xf32>
    %cst_47 = arith.constant dense<0.000000e+00> : vector<16x128xf32>
    %84 = tpu.matmul %70, %10, %cst_47 {dimension_numbers = #tpu.dot_dimension_numbers<[1], [0], [0], [1], [0, 0, 1, 1], [], []>} : vector<16x16xf32>, vector<16x128xf32>, vector<16x128xf32> -> vector<16x128xf32>
    %85 = arith.addf %83, %84 : vector<16x128xf32>
    %c1_48 = arith.constant 1 : index
    %c0_49 = arith.constant 0 : index
    %c0_50 = arith.constant 0 : index
    %86 = vector.load %arg11[%c1_48, %c0_49, %c0_50] : memref<2x16x128xf32, #tpu.memory_space<vmem>>, vector<1x16x128xf32>
    %87 = vector.shape_cast %86 : vector<1x16x128xf32> to vector<16x128xf32>
    %88 = vector.shape_cast %85 : vector<16x128xf32> to vector<1x16x128xf32>
    tpu.vector_store %arg11[%c1_48, %c0_49, %c0_50], %88 {strides = array<i32>} : memref<2x16x128xf32, #tpu.memory_space<vmem>>, vector<1x16x128xf32>,
    %c1_51 = arith.constant 1 : index
    %c0_52 = arith.constant 0 : index
    %c0_53 = arith.constant 0 : index
    %89 = vector.load %arg9[%c1_51, %c0_52, %c0_53] : memref<2x16x1xf32, #tpu.memory_space<vmem>>, vector<1x16x1xf32>
    %90 = vector.shape_cast %89 : vector<1x16x1xf32> to vector<16x1xf32>
    %91 = vector.shape_cast %65 : vector<16x1xf32> to vector<1x16x1xf32>
    tpu.vector_store %arg9[%c1_51, %c0_52, %c0_53], %91 {strides = array<i32>} : memref<2x16x1xf32, #tpu.memory_space<vmem>>, vector<1x16x1xf32>,
    %92 = arith.cmpi eq, %3, %1 : i32
    %93 = arith.extui %92 : i1 to i32
    %c0_i32_54 = arith.constant 0 : i32
    %94 = arith.cmpi ne, %93, %c0_i32_54 : i32
    scf.if %94 {
      %c0_55 = arith.constant 0 : index
      %c0_56 = arith.constant 0 : index
      %c0_57 = arith.constant 0 : index
      %95 = vector.load %arg10[%c0_55, %c0_56, %c0_57] : memref<2x16x1xf32, #tpu.memory_space<vmem>>, vector<1x16x1xf32>
      %96 = vector.shape_cast %95 : vector<1x16x1xf32> to vector<16x1xf32>
      %97 = tpu.reciprocal %96 : vector<16x1xf32> -> vector<16x1xf32>
      %c0_58 = arith.constant 0 : index
      %c0_59 = arith.constant 0 : index
      %c0_60 = arith.constant 0 : index
      %98 = vector.load %arg11[%c0_58, %c0_59, %c0_60] : memref<2x16x128xf32, #tpu.memory_space<vmem>>, vector<1x16x128xf32>
      %99 = vector.shape_cast %98 : vector<1x16x128xf32> to vector<16x128xf32>
      %100 = vector.broadcast %97 : vector<16x1xf32> to vector<16x128xf32>
      %101 = arith.mulf %99, %100 : vector<16x128xf32>
      %c1_61 = arith.constant 1 : index
      %c0_62 = arith.constant 0 : index
      %c0_63 = arith.constant 0 : index
      %102 = vector.load %arg10[%c1_61, %c0_62, %c0_63] : memref<2x16x1xf32, #tpu.memory_space<vmem>>, vector<1x16x1xf32>
      %103 = vector.shape_cast %102 : vector<1x16x1xf32> to vector<16x1xf32>
      %104 = tpu.reciprocal %103 : vector<16x1xf32> -> vector<16x1xf32>
      %c1_64 = arith.constant 1 : index
      %c0_65 = arith.constant 0 : index
      %c0_66 = arith.constant 0 : index
      %105 = vector.load %arg11[%c1_64, %c0_65, %c0_66] : memref<2x16x128xf32, #tpu.memory_space<vmem>>, vector<1x16x128xf32>
      %106 = vector.shape_cast %105 : vector<1x16x128xf32> to vector<16x128xf32>
      %107 = vector.broadcast %104 : vector<16x1xf32> to vector<16x128xf32>
      %108 = arith.mulf %106, %107 : vector<16x128xf32>
      %109 = tpu.concatenate %101, %108 in 1 : vector<16x128xf32>, vector<16x128xf32> -> vector<16x256xf32>
      %c0_67 = arith.constant 0 : index
      %c0_68 = arith.constant 0 : index
      %c0_69 = arith.constant 0 : index
      %110 = vector.load %arg8[%c0_67, %c0_68, %c0_69] : memref<1x16x256xf32, #tpu.memory_space<vmem>>, vector<1x16x256xf32>
      %111 = vector.shape_cast %110 : vector<1x16x256xf32> to vector<16x256xf32>
      %112 = vector.shape_cast %109 : vector<16x256xf32> to vector<1x16x256xf32>
      tpu.vector_store %arg8[%c0_67, %c0_68, %c0_69], %112 {strides = array<i32>} : memref<1x16x256xf32, #tpu.memory_space<vmem>>, vector<1x16x256xf32>,
    } else {
    }
    return
  }
  func.func @transform_0(%arg0: i32, %arg1: i32, %arg2: i32, %arg3: memref<10xi32, #tpu.memory_space<smem>>, %arg4: memref<10xi32, #tpu.memory_space<smem>>) -> (i32, i32, i32) {
    %0 = arith.index_cast %arg2 : i32 to index
    %1 = memref.load %arg3[%0] : memref<10xi32, #tpu.memory_space<smem>>
    %c0_i32 = arith.constant 0 : i32
    return %arg0, %1, %arg1 : i32, i32, i32
  }
  func.func @transform_1(%arg0: i32, %arg1: i32, %arg2: i32, %arg3: memref<10xi32, #tpu.memory_space<smem>>, %arg4: memref<10xi32, #tpu.memory_space<smem>>) -> (i32, i32, i32) {
    %0 = arith.index_cast %arg2 : i32 to index
    %1 = memref.load %arg4[%0] : memref<10xi32, #tpu.memory_space<smem>>
    %c2_i32 = arith.constant 2 : i32
    %2 = arith.addi %c2_i32, %arg1 : i32
    %c0_i32 = arith.constant 0 : i32
    return %arg0, %1, %2 : i32, i32, i32
  }
  func.func @transform_2(%arg0: i32, %arg1: i32, %arg2: i32, %arg3: memref<10xi32, #tpu.memory_space<smem>>, %arg4: memref<10xi32, #tpu.memory_space<smem>>) -> (i32, i32, i32) {
    %0 = arith.index_cast %arg2 : i32 to index
    %1 = memref.load %arg4[%0] : memref<10xi32, #tpu.memory_space<smem>>
    %c3_i32 = arith.constant 3 : i32
    %2 = arith.addi %c3_i32, %arg1 : i32
    %c0_i32 = arith.constant 0 : i32
    return %arg0, %1, %2 : i32, i32, i32
  }
  func.func @transform_3(%arg0: i32, %arg1: i32, %arg2: i32, %arg3: memref<10xi32, #tpu.memory_space<smem>>, %arg4: memref<10xi32, #tpu.memory_space<smem>>) -> (i32, i32, i32) {
    %0 = arith.index_cast %arg2 : i32 to index
    %1 = memref.load %arg3[%0] : memref<10xi32, #tpu.memory_space<smem>>
    %c0_i32 = arith.constant 0 : i32
    return %arg0, %1, %arg1 : i32, i32, i32
  }
}

module attributes {stable_mosaic.version = 11 : i64} {
  func.func @_mlp_kernel(%arg0: i32, %arg1: i32, %arg2: memref<64x256xf32, #tpu.memory_space<vmem>>, %arg3: memref<1x256xf32, #tpu.memory_space<vmem>>, %arg4: memref<256x256xf32, #tpu.memory_space<vmem>>, %arg5: memref<256x256xf32, #tpu.memory_space<vmem>>, %arg6: memref<256x256xf32, #tpu.memory_space<vmem>>, %arg7: memref<64x256xf32, #tpu.memory_space<vmem>>, %arg8: memref<64x256xf32, #tpu.memory_space<vmem>>, %arg9: memref<64x256xf32, #tpu.memory_space<vmem>>) attributes {dimension_semantics = [#tpu.dimension_semantics<parallel>, #tpu.dimension_semantics<arbitrary>], iteration_bounds = array<i64: 2, 2>, scalar_prefetch = 0 : i64, scratch_operands = 2 : i64, tpu.core_type = #tpu.core_type<tc>, window_params = [{transform_indices = @transform_0, window_bounds = array<i64: 64, 256>}, {pipeline_mode = #tpu.pipeline_mode<synchronous>, transform_indices = @transform_1, window_bounds = array<i64: 1, 256>}, {transform_indices = @transform_2, window_bounds = array<i64: 256, 256>}, {transform_indices = @transform_3, window_bounds = array<i64: 256, 256>}, {transform_indices = @transform_4, window_bounds = array<i64: 256, 256>}, {transform_indices = @transform_5, window_bounds = array<i64: 64, 256>}]} {
    %c0_i32 = arith.constant 0 : i32
    %0 = arith.cmpi eq, %arg1, %c0_i32 : i32
    %1 = arith.extui %0 : i1 to i32
    %c0_i32_0 = arith.constant 0 : i32
    %2 = arith.cmpi ne, %1, %c0_i32_0 : i32
    scf.if %2 {
      %cst_16 = arith.constant 0.000000e+00 : f32
      %23 = vector.broadcast %cst_16 : f32 to vector<64x256xf32>
      %c0_17 = arith.constant 0 : index
      %c0_18 = arith.constant 0 : index
      %24 = vector.load %arg9[%c0_17, %c0_18] : memref<64x256xf32, #tpu.memory_space<vmem>>, vector<64x256xf32>
      tpu.vector_store %arg9[%c0_17, %c0_18], %23 {strides = array<i32>} : memref<64x256xf32, #tpu.memory_space<vmem>>, vector<64x256xf32>,
      %c0_19 = arith.constant 0 : index
      %c0_20 = arith.constant 0 : index
      %25 = vector.load %arg2[%c0_19, %c0_20] : memref<64x256xf32, #tpu.memory_space<vmem>>, vector<64x256xf32>
      %26 = arith.mulf %25, %25 : vector<64x256xf32>
      %cst_21 = arith.constant dense<0.000000e+00> : vector<64xf32>
      %27 = vector.multi_reduction <add>, %26, %cst_21 [1] : vector<64x256xf32> to vector<64xf32>
      %28 = vector.shape_cast %27 : vector<64xf32> to vector<64x1xf32>
      %cst_22 = arith.constant 2.560000e+02 : f32
      %29 = vector.broadcast %cst_22 : f32 to vector<64x1xf32>
      %30 = arith.divf %28, %29 : vector<64x1xf32>
      %cst_23 = arith.constant 9.99999997E-7 : f32
      %31 = vector.broadcast %cst_23 : f32 to vector<64x1xf32>
      %32 = arith.addf %30, %31 : vector<64x1xf32>
      %33 = math.rsqrt %32 : vector<64x1xf32>
      %34 = vector.broadcast %33 : vector<64x1xf32> to vector<64x256xf32>
      %35 = arith.mulf %25, %34 : vector<64x256xf32>
      %c0_24 = arith.constant 0 : index
      %c0_25 = arith.constant 0 : index
      %36 = vector.load %arg3[%c0_24, %c0_25] : memref<1x256xf32, #tpu.memory_space<vmem>>, vector<1x256xf32>
      %37 = vector.broadcast %36 : vector<1x256xf32> to vector<64x256xf32>
      %38 = arith.mulf %35, %37 : vector<64x256xf32>
      %c0_26 = arith.constant 0 : index
      %c0_27 = arith.constant 0 : index
      %39 = vector.load %arg8[%c0_26, %c0_27] : memref<64x256xf32, #tpu.memory_space<vmem>>, vector<64x256xf32>
      tpu.vector_store %arg8[%c0_26, %c0_27], %38 {strides = array<i32>} : memref<64x256xf32, #tpu.memory_space<vmem>>, vector<64x256xf32>,
    } else {
    }
    %c0 = arith.constant 0 : index
    %c0_1 = arith.constant 0 : index
    %3 = vector.load %arg8[%c0, %c0_1] : memref<64x256xf32, #tpu.memory_space<vmem>>, vector<64x256xf32>
    %c0_2 = arith.constant 0 : index
    %c0_3 = arith.constant 0 : index
    %4 = vector.load %arg4[%c0_2, %c0_3] : memref<256x256xf32, #tpu.memory_space<vmem>>, vector<256x256xf32>
    %cst = arith.constant dense<0.000000e+00> : vector<64x256xf32>
    %5 = tpu.matmul %3, %4, %cst {dimension_numbers = #tpu.dot_dimension_numbers<[1], [0], [0], [1], [0, 0, 1, 1], [], []>} : vector<64x256xf32>, vector<256x256xf32>, vector<64x256xf32> -> vector<64x256xf32>
    %c0_4 = arith.constant 0 : index
    %c0_5 = arith.constant 0 : index
    %6 = vector.load %arg5[%c0_4, %c0_5] : memref<256x256xf32, #tpu.memory_space<vmem>>, vector<256x256xf32>
    %cst_6 = arith.constant dense<0.000000e+00> : vector<64x256xf32>
    %7 = tpu.matmul %3, %6, %cst_6 {dimension_numbers = #tpu.dot_dimension_numbers<[1], [0], [0], [1], [0, 0, 1, 1], [], []>} : vector<64x256xf32>, vector<256x256xf32>, vector<64x256xf32> -> vector<64x256xf32>
    %8 = arith.negf %5 : vector<64x256xf32>
    %9 = math.exp %8 : vector<64x256xf32>
    %cst_7 = arith.constant 1.000000e+00 : f32
    %10 = vector.broadcast %cst_7 : f32 to vector<64x256xf32>
    %11 = arith.addf %10, %9 : vector<64x256xf32>
    %12 = arith.divf %10, %11 : vector<64x256xf32>
    %13 = arith.mulf %5, %12 : vector<64x256xf32>
    %14 = arith.mulf %13, %7 : vector<64x256xf32>
    %c0_8 = arith.constant 0 : index
    %c0_9 = arith.constant 0 : index
    %15 = vector.load %arg9[%c0_8, %c0_9] : memref<64x256xf32, #tpu.memory_space<vmem>>, vector<64x256xf32>
    %c0_10 = arith.constant 0 : index
    %c0_11 = arith.constant 0 : index
    %16 = vector.load %arg6[%c0_10, %c0_11] : memref<256x256xf32, #tpu.memory_space<vmem>>, vector<256x256xf32>
    %cst_12 = arith.constant dense<0.000000e+00> : vector<64x256xf32>
    %17 = tpu.matmul %14, %16, %cst_12 {dimension_numbers = #tpu.dot_dimension_numbers<[1], [0], [0], [1], [0, 0, 1, 1], [], []>} : vector<64x256xf32>, vector<256x256xf32>, vector<64x256xf32> -> vector<64x256xf32>
    %18 = arith.addf %15, %17 : vector<64x256xf32>
    %c0_13 = arith.constant 0 : index
    %c0_14 = arith.constant 0 : index
    %19 = vector.load %arg9[%c0_13, %c0_14] : memref<64x256xf32, #tpu.memory_space<vmem>>, vector<64x256xf32>
    tpu.vector_store %arg9[%c0_13, %c0_14], %18 {strides = array<i32>} : memref<64x256xf32, #tpu.memory_space<vmem>>, vector<64x256xf32>,
    %c1_i32 = arith.constant 1 : i32
    %20 = arith.cmpi eq, %arg1, %c1_i32 : i32
    %21 = arith.extui %20 : i1 to i32
    %c0_i32_15 = arith.constant 0 : i32
    %22 = arith.cmpi ne, %21, %c0_i32_15 : i32
    scf.if %22 {
      %c0_16 = arith.constant 0 : index
      %c0_17 = arith.constant 0 : index
      %23 = vector.load %arg9[%c0_16, %c0_17] : memref<64x256xf32, #tpu.memory_space<vmem>>, vector<64x256xf32>
      %c0_18 = arith.constant 0 : index
      %c0_19 = arith.constant 0 : index
      %24 = vector.load %arg2[%c0_18, %c0_19] : memref<64x256xf32, #tpu.memory_space<vmem>>, vector<64x256xf32>
      %25 = arith.addf %23, %24 : vector<64x256xf32>
      %c0_20 = arith.constant 0 : index
      %c0_21 = arith.constant 0 : index
      %26 = vector.load %arg7[%c0_20, %c0_21] : memref<64x256xf32, #tpu.memory_space<vmem>>, vector<64x256xf32>
      tpu.vector_store %arg7[%c0_20, %c0_21], %25 {strides = array<i32>} : memref<64x256xf32, #tpu.memory_space<vmem>>, vector<64x256xf32>,
    } else {
    }
    return
  }
  func.func @transform_0(%arg0: i32, %arg1: i32) -> (i32, i32) {
    %c0_i32 = arith.constant 0 : i32
    %c0_i32_0 = arith.constant 0 : i32
    return %arg0, %c0_i32 : i32, i32
  }
  func.func @transform_1(%arg0: i32, %arg1: i32) -> (i32, i32) {
    %c0_i32 = arith.constant 0 : i32
    %c0_i32_0 = arith.constant 0 : i32
    %c0_i32_1 = arith.constant 0 : i32
    return %c0_i32, %c0_i32_0 : i32, i32
  }
  func.func @transform_2(%arg0: i32, %arg1: i32) -> (i32, i32) {
    %c0_i32 = arith.constant 0 : i32
    %c0_i32_0 = arith.constant 0 : i32
    return %c0_i32, %arg1 : i32, i32
  }
  func.func @transform_3(%arg0: i32, %arg1: i32) -> (i32, i32) {
    %c0_i32 = arith.constant 0 : i32
    %c0_i32_0 = arith.constant 0 : i32
    return %c0_i32, %arg1 : i32, i32
  }
  func.func @transform_4(%arg0: i32, %arg1: i32) -> (i32, i32) {
    %c0_i32 = arith.constant 0 : i32
    %c0_i32_0 = arith.constant 0 : i32
    return %arg1, %c0_i32 : i32, i32
  }
  func.func @transform_5(%arg0: i32, %arg1: i32) -> (i32, i32) {
    %c0_i32 = arith.constant 0 : i32
    %c0_i32_0 = arith.constant 0 : i32
    return %arg0, %c0_i32 : i32, i32
  }
}

</mosaic_0001>

<bundles_post_ra>
// kernel: transformer_block_forward.6
= control target key start
LH: loop header
LB: loop body
LE: loop exit
PB: predicated region body
PF: predicated region fallthrough
CT: control target
= control target key end

     0   :  { %s951_s12 = smov 0   ;;  %s953_s13 = smov 0   ;;  %s1241_s0 = inlined_call_operand.vmem [shape: f32[128,256], index: 0, kind: input, shape index: {}]   ;;  %s1242_s1 = inlined_call_operand.vmem [shape: f32[256,256], index: 1, kind: input, shape index: {}]   ;;  %s1243_s2 = inlined_call_operand.vmem [shape: f32[128,256], index: 2, kind: input, shape index: {}]   ;;  %s1244_s3 = inlined_call_operand.vmem [shape: f32[128,256], index: 3, kind: output, shape index: {}]  }
   0x1   :  { %s955_s14 = smov 0  }
   0x2 LB: > { %s32_s15 = sadd.s32 1, %s925_s13  ;;  %p772_p0 = scmp.ge.s32.totalorder %s929_s14, 1  ;;  %s929_s14 = sphi %s955_s14, %s13_s14   ;;  %s925_s13 = sphi %s953_s13, %s1246_s13   ;;  %s921_s12 = sphi %s951_s12, %s1245_s12  }
   0x3   : > { %p34_p1 = scmp.ge.s32.totalorder %s32_s15, 2  ;;  %p205_p2 = scmp.lt.s32.totalorder %s929_s14, 3 }
   0x5   : > { %s1248_s15 = smov (%p34_p1, %s32_s15), 0  ;;  %p206_p3 = pnand %p772_p0, %p205_p2 }
   0x6   : > { %v360_v0 = vld [vmem:[%s1242_s1 + $0x8] sm:$0xff] (!%p206_p3)  ;;  %v362_v1 = vld [vmem:[%s1242_s1 + $0x18] sm:$0xff] (!%p206_p3)  ;;  %v359_v2 = vld [vmem:[%s1242_s1] sm:$0xff] (!%p206_p3)  ;;  %s773_s9 = sshll.u32 (!%p206_p3), %s921_s12, 3 }
   0x7   : > { %209 = sbr.rel (%p206_p3) target bundleno = 301 (0x12d), region = 32  ;;  %v787_v3 = vpack.c.bf16 (!%p206_p3), %v362_v1, %v360_v0  ;;  %v361_v4 = vld [vmem:[%s1242_s1 + $0x10] sm:$0xff] (!%p206_p3)  ;;  %v364_v5 = vld [vmem:[%s1242_s1 + $0x28] sm:$0xff] (!%p206_p3)  ;;  %v366_v6 = vld [vmem:[%s1242_s1 + $0x38] sm:$0xff] (!%p206_p3)  ;;  %p261_p4 = scmp.lt.s32.totalorder (!%p206_p3), %s773_s9, 15 }
   0x8   : > { %v789_v7 = vpack.c.bf16 (!%p206_p3), %v361_v4, %v359_v2  ;;  %v791_v8 = vpack.c.bf16 (!%p206_p3), %v366_v6, %v364_v5  ;;  %v363_v9 = vld [vmem:[%s1242_s1 + $0x20] sm:$0xff] (!%p206_p3)  ;;  %v365_v10 = vld [vmem:[%s1242_s1 + $0x30] sm:$0xff] (!%p206_p3)  ;;  %v368_v11 = vld [vmem:[%s1242_s1 + $0x48] sm:$0xff] (!%p206_p3) }
   0x9   : > { %788 = vmatprep.subr.bf16.mxu0 (!%p206_p3), %v787_v3  ;;  %851 = vmatprep.subr.bf16.mxu1 (!%p206_p3), %v787_v3  ;;  %v370_v12 = vld [vmem:[%s1242_s1 + $0x58] sm:$0xff] (!%p206_p3)  ;;  %v793_v13 = vpack.c.bf16 (!%p206_p3), %v365_v10, %v363_v9  ;;  %v367_v15 = vld [vmem:[%s1242_s1 + $0x40] sm:$0xff] (!%p206_p3)  ;;  %v369_v16 = vld [vmem:[%s1242_s1 + $0x50] sm:$0xff] (!%p206_p3) }
   0xa   : > { %790 = vmatpush1.bf16.msra.mxu0 (!%p206_p3), %v789_v7  ;;  %867 = vmatpush1.bf16.msra.mxu1 (!%p206_p3), %v789_v7  ;;  %v795_v14 = vpack.c.bf16 (!%p206_p3), %v370_v12, %v368_v11  ;;  %v372_v17 = vld [vmem:[%s1242_s1 + $0x68] sm:$0xff] (!%p206_p3)  ;;  %v374_v18 = vld [vmem:[%s1242_s1 + $0x78] sm:$0xff] (!%p206_p3)  ;;  %v797_v19 = vpack.c.bf16 (!%p206_p3), %v369_v16, %v367_v15  ;;  %v371_v21 = vld [vmem:[%s1242_s1 + $0x60] sm:$0xff] (!%p206_p3) }
   0xb   : > { %792 = vmatprep.subr.bf16.mxu0 (!%p206_p3), %v791_v8  ;;  %852 = vmatprep.subr.bf16.mxu1 (!%p206_p3), %v791_v8  ;;  %v799_v20 = vpack.c.bf16 (!%p206_p3), %v374_v18, %v372_v17  ;;  %v373_v22 = vld [vmem:[%s1242_s1 + $0x70] sm:$0xff] (!%p206_p3)  ;;  %v376_v23 = vld [vmem:[%s1242_s1 + $0x88] sm:$0xff] (!%p206_p3)  ;;  %v378_v24 = vld [vmem:[%s1242_s1 + $0x98] sm:$0xff] (!%p206_p3) }
   0xc   : > { %v801_v25 = vpack.c.bf16 (!%p206_p3), %v373_v22, %v371_v21  ;;  %v803_v26 = vpack.c.bf16 (!%p206_p3), %v378_v24, %v376_v23  ;;  %v375_v27 = vld [vmem:[%s1242_s1 + $0x80] sm:$0xff] (!%p206_p3)  ;;  %v377_v28 = vld [vmem:[%s1242_s1 + $0x90] sm:$0xff] (!%p206_p3)  ;;  %v380_v29 = vld [vmem:[%s1242_s1 + $0xa8] sm:$0xff] (!%p206_p3) }
   0xd   : > { %v382_v30 = vld [vmem:[%s1242_s1 + $0xb8] sm:$0xff] (!%p206_p3)  ;;  %v805_v31 = vpack.c.bf16 (!%p206_p3), %v377_v28, %v375_v27  ;;  %v379_v33 = vld [vmem:[%s1242_s1 + $0xa0] sm:$0xff] (!%p206_p3)  ;;  %v381_v34 = vld [vmem:[%s1242_s1 + $0xb0] sm:$0xff] (!%p206_p3) }
   0xe   : > { %794 = vmatpush1.bf16.msra.mxu0 %v793_v13  ;;  %868 = vmatpush1.bf16.msra.mxu1 %v793_v13  ;;  %s1250_s9 = smov (!%p261_p4, %s773_s9), 15  ;;  %v807_v32 = vpack.c.bf16 %v382_v30, %v380_v29  ;;  %v384_v35 = vld [vmem:[%s1242_s1 + $0xc8] sm:$0xff]  ;;  %v386_v36 = vld [vmem:[%s1242_s1 + $0xd8] sm:$0xff]  ;;  %v809_v37 = vpack.c.bf16 %v381_v34, %v379_v33  ;;  %v383_v38 = vld [vmem:[%s1242_s1 + $0xc0] sm:$0xff] }
   0xf   : > { %796 = vmatprep.subr.bf16.mxu0 %v795_v14  ;;  %853 = vmatprep.subr.bf16.mxu1 %v795_v14  ;;  %s1038_s11 = sshll.u32 %s1250_s9, 4  ;;  %v811_v39 = vpack.c.bf16 %v386_v36, %v384_v35  ;;  %v385_v40 = vld [vmem:[%s1242_s1 + $0xd0] sm:$0xff]  ;;  %v388_v43 = vld [vmem:[%s1242_s1 + $0xe8] sm:$0xff]  ;;  %v390_v44 = vld [vmem:[%s1242_s1 + $0xf8] sm:$0xff] }
  0x10   : > { %s1056_s24 = scalar_lea.vmem %s1241_s0, %s1038_s11  ;;  %v813_v45 = vpack.c.bf16 %v385_v40, %v383_v38  ;;  %v815_v46 = vpack.c.bf16 %v390_v44, %v388_v43  ;;  %v387_v47 = vld [vmem:[%s1242_s1 + $0xe0] sm:$0xff]  ;;  %v389_v48 = vld [vmem:[%s1242_s1 + $0xf0] sm:$0xff]  ;;  %v392_v49 = vld [vmem:[%s1242_s1 + $0x108] sm:$0xff]  ;;  %s1192_s16 = scalar_lea.vmem %s1243_s2, %s1038_s11 }
  0x11   : > { %v344_v41 = vld [vmem:[%s1056_s24 + $0x8] sm:$0xff]  ;;  %v394_v50 = vld [vmem:[%s1242_s1 + $0x118] sm:$0xff]  ;;  %v817_v51 = vpack.c.bf16 %v389_v48, %v387_v47  ;;  %v391_v53 = vld [vmem:[%s1242_s1 + $0x100] sm:$0xff]  ;;  %s1202_s18 = scalar_lea.vmem %s1244_s3, %s1038_s11 }
  0x12   : > { %798 = vmatpush1.bf16.msra.mxu0 %v797_v19  ;;  %869 = vmatpush1.bf16.msra.mxu1 %v797_v19  ;;  %v352_v42 = vld [vmem:[%s1056_s24 + $0x48] sm:$0xff]  ;;  %v819_v52 = vpack.c.bf16 %v394_v50, %v392_v49  ;;  %v393_v54 = vld [vmem:[%s1242_s1 + $0x110] sm:$0xff]  ;;  %v398_v56 = vld [vmem:[%s1242_s1 + $0x138] sm:$0xff] }
  0x13   : > { %800 = vmatprep.subr.bf16.mxu0 %v799_v20  ;;  %854 = vmatprep.subr.bf16.mxu1 %v799_v20  ;;  %v396_v55 = vld [vmem:[%s1242_s1 + $0x128] sm:$0xff]  ;;  %v821_v57 = vpack.c.bf16 %v393_v54, %v391_v53  ;;  %v395_v59 = vld [vmem:[%s1242_s1 + $0x120] sm:$0xff]  ;;  %v397_v60 = vld [vmem:[%s1242_s1 + $0x130] sm:$0xff] }
  0x14   : > { %487 = vmatprep.mubr.f32.mxu0 %v344_v41  ;;  %511 = vmatprep.mubr.f32.mxu1 %v352_v42  ;;  %v823_v58 = vpack.c.bf16 %v398_v56, %v396_v55  ;;  %v400_v61 = vld [vmem:[%s1242_s1 + $0x148] sm:$0xff]  ;;  %v402_v62 = vld [vmem:[%s1242_s1 + $0x158] sm:$0xff]  ;;  %v825_v63 = vpack.c.bf16 %v397_v60, %v395_v59  ;;  %v399_v1 = vld [vmem:[%s1242_s1 + $0x140] sm:$0xff] }
  0x15   : > { %v827_v0 = vpack.c.bf16 %v402_v62, %v400_v61  ;;  %v401_v2 = vld [vmem:[%s1242_s1 + $0x150] sm:$0xff]  ;;  %v404_v3 = vld [vmem:[%s1242_s1 + $0x168] sm:$0xff]  ;;  %v406_v4 = vld [vmem:[%s1242_s1 + $0x178] sm:$0xff] }
  0x16   : > { %802 = vmatpush1.bf16.msra.mxu0 %v801_v25  ;;  %870 = vmatpush1.bf16.msra.mxu1 %v801_v25  ;;  %v829_v5 = vpack.c.bf16 %v401_v2, %v399_v1  ;;  %v831_v6 = vpack.c.bf16 %v406_v4, %v404_v3  ;;  %v403_v7 = vld [vmem:[%s1242_s1 + $0x160] sm:$0xff]  ;;  %v405_v8 = vld [vmem:[%s1242_s1 + $0x170] sm:$0xff]  ;;  %v408_v9 = vld [vmem:[%s1242_s1 + $0x188] sm:$0xff] }
  0x17   : > { %804 = vmatprep.subr.bf16.mxu0 %v803_v26  ;;  %855 = vmatprep.subr.bf16.mxu1 %v803_v26  ;;  %v410_v10 = vld [vmem:[%s1242_s1 + $0x198] sm:$0xff]  ;;  %v833_v11 = vpack.c.bf16 %v405_v8, %v403_v7  ;;  %v407_v13 = vld [vmem:[%s1242_s1 + $0x180] sm:$0xff]  ;;  %v409_v14 = vld [vmem:[%s1242_s1 + $0x190] sm:$0xff] }
  0x18   : > { %v835_v12 = vpack.c.bf16 %v410_v10, %v408_v9  ;;  %v412_v15 = vld [vmem:[%s1242_s1 + $0x1a8] sm:$0xff]  ;;  %v414_v16 = vld [vmem:[%s1242_s1 + $0x1b8] sm:$0xff]  ;;  %v837_v17 = vpack.c.bf16 %v409_v14, %v407_v13  ;;  %v411_v19 = vld [vmem:[%s1242_s1 + $0x1a0] sm:$0xff] }
  0x19   : > { %v839_v18 = vpack.c.bf16 %v414_v16, %v412_v15  ;;  %v413_v20 = vld [vmem:[%s1242_s1 + $0x1b0] sm:$0xff]  ;;  %v416_v21 = vld [vmem:[%s1242_s1 + $0x1c8] sm:$0xff]  ;;  %v418_v22 = vld [vmem:[%s1242_s1 + $0x1d8] sm:$0xff] }
  0x1a   : > { %806 = vmatpush1.bf16.msra.mxu0 %v805_v31  ;;  %871 = vmatpush1.bf16.msra.mxu1 %v805_v31  ;;  %v841_v23 = vpack.c.bf16 %v413_v20, %v411_v19  ;;  %v843_v24 = vpack.c.bf16 %v418_v22, %v416_v21  ;;  %v415_v25 = vld [vmem:[%s1242_s1 + $0x1c0] sm:$0xff]  ;;  %v417_v26 = vld [vmem:[%s1242_s1 + $0x1d0] sm:$0xff]  ;;  %v420_v27 = vld [vmem:[%s1242_s1 + $0x1e8] sm:$0xff] }
  0x1b   : > { %808 = vmatprep.subr.bf16.mxu0 %v807_v32  ;;  %856 = vmatprep.subr.bf16.mxu1 %v807_v32  ;;  %v422_v28 = vld [vmem:[%s1242_s1 + $0x1f8] sm:$0xff]  ;;  %v845_v29 = vpack.c.bf16 %v417_v26, %v415_v25  ;;  %v419_v31 = vld [vmem:[%s1242_s1 + $0x1e0] sm:$0xff]  ;;  %v421_v32 = vld [vmem:[%s1242_s1 + $0x1f0] sm:$0xff] }
  0x1c   : > { %v847_v30 = vpack.c.bf16 %v422_v28, %v420_v27  ;;  %v849_v33 = vpack.c.bf16 %v421_v32, %v419_v31  ;;  %v343_v34 = vld [vmem:[%s1056_s24] sm:$0xff]  ;;  %v346_v36 = vld [vmem:[%s1056_s24 + $0x18] sm:$0xff]  ;;  %v345_v38 = vld [vmem:[%s1056_s24 + $0x10] sm:$0xff] }
  0x1d   : > { %v351_v35 = vld [vmem:[%s1056_s24 + $0x40] sm:$0xff]  ;;  %v348_v40 = vld [vmem:[%s1056_s24 + $0x28] sm:$0xff]  ;;  %v350_v44 = vld [vmem:[%s1056_s24 + $0x38] sm:$0xff] }
  0x1e   : > { %810 = vmatpush1.bf16.msra.mxu0 %v809_v37  ;;  %872 = vmatpush1.bf16.msra.mxu1 %v809_v37  ;;  %v354_v37 = vld [vmem:[%s1056_s24 + $0x58] sm:$0xff]  ;;  %v356_v41 = vld [vmem:[%s1056_s24 + $0x68] sm:$0xff]  ;;  %v347_v42 = vld [vmem:[%s1056_s24 + $0x20] sm:$0xff] }
  0x1f   : > { %812 = vmatprep.subr.bf16.mxu0 %v811_v39  ;;  %857 = vmatprep.subr.bf16.mxu1 %v811_v39  ;;  %v353_v39 = vld [vmem:[%s1056_s24 + $0x50] sm:$0xff]  ;;  %v355_v43 = vld [vmem:[%s1056_s24 + $0x60] sm:$0xff]  ;;  %v588_v50 = vld [vmem:[%s1192_s16 + $0x8] sm:$0xff] }
  0x20   : > { %v357_v47 = vld [vmem:[%s1056_s24 + $0x70] sm:$0xff]  ;;  %v587_v48 = vld [vmem:[%s1192_s16] sm:$0xff]  ;;  %v590_v62 = vld [vmem:[%s1192_s16 + $0x18] sm:$0xff] }
  0x21   : > { %v595_v49 = vld [vmem:[%s1192_s16 + $0x40] sm:$0xff]  ;;  %v589_v60 = vld [vmem:[%s1192_s16 + $0x10] sm:$0xff]  ;;  %v592_v10 = vld [vmem:[%s1192_s16 + $0x28] sm:$0xff] }
  0x22   : > { %814 = vmatpush1.bf16.msra.mxu0 %v813_v45  ;;  %873 = vmatpush1.bf16.msra.mxu1 %v813_v45  ;;  %v358_v45 = vld [vmem:[%s1056_s24 + $0x78] sm:$0xff]  ;;  %v597_v61 = vld [vmem:[%s1192_s16 + $0x50] sm:$0xff]  ;;  %v591_v8 = vld [vmem:[%s1192_s16 + $0x20] sm:$0xff] }
  0x23   : > { %816 = vmatprep.subr.bf16.mxu0 %v815_v46  ;;  %858 = vmatprep.subr.bf16.mxu1 %v815_v46  ;;  %v349_v46 = vld [vmem:[%s1056_s24 + $0x30] sm:$0xff]  ;;  %v599_v9 = vld [vmem:[%s1192_s16 + $0x60] sm:$0xff]  ;;  %v594_v22 = vld [vmem:[%s1192_s16 + $0x38] sm:$0xff] }
  0x24   : > { %v593_v20 = vld [vmem:[%s1192_s16 + $0x30] sm:$0xff] }
  0x25   : > { %v601_v21 = vld [vmem:[%s1192_s16 + $0x70] sm:$0xff] }
  0x26   : > { %818 = vmatpush1.bf16.msra.mxu0 %v817_v51  ;;  %874 = vmatpush1.bf16.msra.mxu1 %v817_v51  ;;  %v596_v51 = vld [vmem:[%s1192_s16 + $0x48] sm:$0xff] }
  0x27   : > { %820 = vmatprep.subr.bf16.mxu0 %v819_v52  ;;  %859 = vmatprep.subr.bf16.mxu1 %v819_v52 }
  0x2a   : > { %822 = vmatpush1.bf16.msra.mxu0 %v821_v57  ;;  %875 = vmatpush1.bf16.msra.mxu1 %v821_v57 }
  0x2b   : > { %824 = vmatprep.subr.bf16.mxu0 %v823_v58  ;;  %860 = vmatprep.subr.bf16.mxu1 %v823_v58 }
  0x2e   : > { %826 = vmatpush1.bf16.msra.mxu0 %v825_v63  ;;  %876 = vmatpush1.bf16.msra.mxu1 %v825_v63  ;;  %v598_v63 = vld [vmem:[%s1192_s16 + $0x58] sm:$0xff] }
  0x2f   : > { %828 = vmatprep.subr.bf16.mxu0 %v827_v0  ;;  %861 = vmatprep.subr.bf16.mxu1 %v827_v0 }
  0x32   : > { %830 = vmatpush1.bf16.msra.mxu0 %v829_v5  ;;  %877 = vmatpush1.bf16.msra.mxu1 %v829_v5 }
  0x33   : > { %832 = vmatprep.subr.bf16.mxu0 %v831_v6  ;;  %862 = vmatprep.subr.bf16.mxu1 %v831_v6 }
  0x36   : > { %834 = vmatpush1.bf16.msra.mxu0 %v833_v11  ;;  %878 = vmatpush1.bf16.msra.mxu1 %v833_v11  ;;  %v600_v11 = vld [vmem:[%s1192_s16 + $0x68] sm:$0xff] }
  0x37   : > { %836 = vmatprep.subr.bf16.mxu0 %v835_v12  ;;  %863 = vmatprep.subr.bf16.mxu1 %v835_v12 }
  0x3a   : > { %838 = vmatpush1.bf16.msra.mxu0 %v837_v17  ;;  %879 = vmatpush1.bf16.msra.mxu1 %v837_v17 }
  0x3b   : > { %840 = vmatprep.subr.bf16.mxu0 %v839_v18  ;;  %864 = vmatprep.subr.bf16.mxu1 %v839_v18 }
  0x3e   : > { %842 = vmatpush1.bf16.msra.mxu0 %v841_v23  ;;  %880 = vmatpush1.bf16.msra.mxu1 %v841_v23  ;;  %v602_v23 = vld [vmem:[%s1192_s16 + $0x78] sm:$0xff] }
  0x3f   : > { %844 = vmatprep.subr.bf16.mxu0 %v843_v24  ;;  %865 = vmatprep.subr.bf16.mxu1 %v843_v24 }
  0x42   : > { %846 = vmatpush1.bf16.msra.mxu0 %v845_v29  ;;  %881 = vmatpush1.bf16.msra.mxu1 %v845_v29 }
  0x43   : > { %848 = vmatprep.subr.bf16.mxu0 %v847_v30  ;;  %866 = vmatprep.subr.bf16.mxu1 %v847_v30 }
  0x46   : > { %850 = vmatpush1.bf16.msra.mxu0 %v849_v33  ;;  %882 = vmatpush1.bf16.msra.mxu1 %v849_v33 }
  0x49   : > { %488 = vmatmul.mubr.f32.vlgmr.msra.gmra.mrb[0].mxu0 %v343_v34  ;;  %512 = vmatmul.mubr.f32.vlgmr.msra.gmra.mrb[0].mxu1 %v351_v35 }
  0x4a   : > { %493 = vmatprep.mubr.f32.mxu0 %v346_v36  ;;  %517 = vmatprep.mubr.f32.mxu1 %v354_v37 }
  0x4d   : > { %494 = vmatmul.mubr.f32.gmra.mrb[2].mxu0 %v345_v38  ;;  %518 = vmatmul.mubr.f32.gmra.mrb[2].mxu1 %v353_v39 }
  0x4e   : > { %499 = vmatprep.mubr.f32.mxu0 %v348_v40  ;;  %523 = vmatprep.mubr.f32.mxu1 %v356_v41 }
  0x51   : > { %500 = vmatmul.mubr.f32.gmra.mrb[4].mxu0 %v347_v42  ;;  %524 = vmatmul.mubr.f32.gmra.mrb[4].mxu1 %v355_v43 }
  0x52   : > { %505 = vmatprep.mubr.f32.mxu0 %v350_v44  ;;  %529 = vmatprep.mubr.f32.mxu1 %v358_v45 }
  0x55   : > { %506 = vmatmul.mubr.f32.gmra.mrb[6].mxu0 %v349_v46  ;;  %530 = vmatmul.mubr.f32.gmra.mrb[6].mxu1 %v357_v47 }
 0x11c   : > { %v489_v52 = vpop.f32.mrb[0].mxu0  ;;  %v513_v53 = vpop.f32.mrb[0].mxu1 }
 0x11d   : > { %v603_v54 = vadd.f32 %v587_v48, %v489_v52  ;;  %v611_v55 = vadd.f32 %v595_v49, %v513_v53  ;;  %v491_v56 = vpop.f32.mrb[1].mxu0  ;;  %v515_v57 = vpop.f32.mrb[1].mxu1 }
 0x11e   : > { %v604_v58 = vadd.f32 %v588_v50, %v491_v56  ;;  %v612_v59 = vadd.f32 %v596_v51, %v515_v57 }
 0x11f   : > { %619 = vst [vmem:[%s1202_s18] sm:$0xff] %v603_v54  ;;  %627 = vst [vmem:[%s1202_s18 + $0x40] sm:$0xff] %v611_v55 }
 0x120   : > { %620 = vst [vmem:[%s1202_s18 + $0x8] sm:$0xff] %v604_v58  ;;  %628 = vst [vmem:[%s1202_s18 + $0x48] sm:$0xff] %v612_v59  ;;  %v495_v0 = vpop.f32.mrb[2].mxu0  ;;  %v519_v1 = vpop.f32.mrb[2].mxu1 }
 0x121   : > { %v605_v2 = vadd.f32 %v589_v60, %v495_v0  ;;  %v613_v3 = vadd.f32 %v597_v61, %v519_v1  ;;  %v497_v4 = vpop.f32.mrb[3].mxu0  ;;  %v521_v5 = vpop.f32.mrb[3].mxu1 }
 0x122   : > { %v606_v6 = vadd.f32 %v590_v62, %v497_v4  ;;  %v614_v7 = vadd.f32 %v598_v63, %v521_v5 }
 0x123   : > { %621 = vst [vmem:[%s1202_s18 + $0x10] sm:$0xff] %v605_v2  ;;  %629 = vst [vmem:[%s1202_s18 + $0x50] sm:$0xff] %v613_v3 }
 0x124   : > { %622 = vst [vmem:[%s1202_s18 + $0x18] sm:$0xff] %v606_v6  ;;  %630 = vst [vmem:[%s1202_s18 + $0x58] sm:$0xff] %v614_v7  ;;  %v501_v12 = vpop.f32.mrb[4].mxu0  ;;  %v525_v13 = vpop.f32.mrb[4].mxu1 }
 0x125   : > { %v607_v14 = vadd.f32 %v591_v8, %v501_v12  ;;  %v615_v15 = vadd.f32 %v599_v9, %v525_v13  ;;  %v503_v16 = vpop.f32.mrb[5].mxu0  ;;  %v527_v17 = vpop.f32.mrb[5].mxu1 }
 0x126   : > { %v608_v18 = vadd.f32 %v592_v10, %v503_v16  ;;  %v616_v19 = vadd.f32 %v600_v11, %v527_v17 }
 0x127   : > { %623 = vst [vmem:[%s1202_s18 + $0x20] sm:$0xff] %v607_v14  ;;  %631 = vst [vmem:[%s1202_s18 + $0x60] sm:$0xff] %v615_v15 }
 0x128   : > { %624 = vst [vmem:[%s1202_s18 + $0x28] sm:$0xff] %v608_v18  ;;  %632 = vst [vmem:[%s1202_s18 + $0x68] sm:$0xff] %v616_v19  ;;  %v507_v24 = vpop.f32.mrb[6].mxu0  ;;  %v531_v25 = vpop.f32.mrb[6].mxu1 }
 0x129   : > { %v609_v26 = vadd.f32 %v593_v20, %v507_v24  ;;  %v617_v27 = vadd.f32 %v601_v21, %v531_v25  ;;  %v509_v28 = vpop.f32.mrb[7].mxu0  ;;  %v533_v29 = vpop.f32.mrb[7].mxu1 }
 0x12a   : > { %v610_v30 = vadd.f32 %v594_v22, %v509_v28  ;;  %v618_v31 = vadd.f32 %v602_v23, %v533_v29 }
 0x12b   : > { %625 = vst [vmem:[%s1202_s18 + $0x30] sm:$0xff] %v609_v26  ;;  %633 = vst [vmem:[%s1202_s18 + $0x70] sm:$0xff] %v617_v27 }
 0x12c   : > { %626 = vst [vmem:[%s1202_s18 + $0x38] sm:$0xff] %v610_v30  ;;  %634 = vst [vmem:[%s1202_s18 + $0x78] sm:$0xff] %v618_v31 }
 0x12d PF: > { %s13_s14 = sadd.s32 1, %s929_s14   ;;  %s1245_s12 = smov %s925_s13 }
 0x12e   : > { %p10_p5 = scmp.ge.s32.totalorder %s13_s14, 4   ;;  %s1246_s13 = smov %s1248_s15 }
 0x130   :  { %12 = sbr.rel (!%p10_p5) target bundleno = 2 (0x2), region = 76 }

// kernel: transformer_block_forward.4
= control target key start
LH: loop header
LB: loop body
LE: loop exit
PB: predicated region body
PF: predicated region fallthrough
CT: control target
= control target key end

     0   :  { %10 = vsyncpa [#allocation3], 0  ;;  %s1558_s18 = smov 0   ;;  %s1560_s19 = smov 0   ;;  %s1921_s0 = inlined_call_operand.vmem [shape: f32[128,256], index: 0, kind: input, shape index: {}]   ;;  %s1922_s1 = inlined_call_operand.vmem [shape: f32[1,256], index: 1, kind: input, shape index: {}]   ;;  %s1923_s2 = inlined_call_operand.hbm [shape: f32[256,512], index: 2, kind: input, shape index: {}]   ;;  %s1924_s3 = inlined_call_operand.vmem [shape: f32[128,128], index: 3, kind: input, shape index: {}]   ;;  %s1925_s4 = inlined_call_operand.vmem [shape: f32[128,128], index: 4, kind: input, shape index: {}]   ;;  %s1926_s5 = inlined_call_operand.vmem [shape: f32[128,512], index: 5, kind: output, shape index: {}]  }
   0x1   :  { %s1562_s20 = smov 0  }
   0x2 LB: > { %s1265_s21 = sadd.s32 4294967295, %s1522_s20   ;;  %s28_s22 = sadd.s32 1, %s1518_s19  ;;  %s1522_s20 = sphi %s1562_s20, %s16_s20   ;;  %s1518_s19 = sphi %s1560_s19, %s1936_s19   ;;  %s1514_s18 = sphi %s1558_s18, %s1935_s18  }
   0x3   : > { %p30_p0 = scmp.ge.s32.totalorder %s28_s22, 2  ;;  %p1267_p1 = scmp.ge.s32.totalorder %s1522_s20, 1 }
   0x4   : > { %p186_p2 = scmp.lt.s32.totalorder %s1522_s20, 3  ;;  %p1583_p4 = scmp.eq.s32.totalorder %s1265_s21, 0 }
   0x5   : > { %s1938_s22 = smov (%p30_p0, %s28_s22), 0  ;;  %s1524_s25 = smov [#allocation2]  }
   0x6   : > { %p1579_p3 = pnand %p1267_p1, %p186_p2  ;;  %s204_s26 = sshll.u32 %s1524_s25, 4  ;;  %s205_s26 = int_to_ptr.vmem [resolvable:$true] %s204_s26 }
   0x7   : > { %s1931_s24 = scalar_select %p1583_p4, 1, 0 }
   0x8   : > { %s1930_s23 = scalar_select %p1579_p3, 1, 0 }
   0x9   : > { %p1418_p5 = pneg %p1579_p3  ;;  %s1468_s30 = scalar_lea.hbm %s1923_s2, 16384 }
   0xa   : > { %p1469_p7 = scmp.ne.s32.totalorder %s1923_s2, %s1468_s30  ;;  %p1475_p11 = scmp.lt.u32.totalorder %s1468_s30, %s1923_s2 }
   0xb   : > { %p1591_p6 = pnand %p1583_p4, %p1418_p5 }
   0xd   : > { %p1470_p8 = pneg %p1591_p6 }
   0xf   : > { %p1471_p9 = pnand %p1470_p8, %p1469_p7 }
  0x11   : > { %p1472_p10 = pneg %p1471_p9 }
  0x13   : > { %p1477_p12 = pnand %p1475_p11, %p1472_p10 }
  0x15   : > { %1480 = shalt.err (!%p1477_p12)
}
  0x16   : > { %s1481_s10 = scalar_lea.vmem %s205_s26, 16384  ;;  %p1489_p2 = scmp.lt.s32.totalorder %s205_s26, %s205_s26 }
  0x17   : > { %p1482_p13 = scmp.ne.s32.totalorder %s205_s26, %s1481_s10  ;;  %p1490_p5 = scmp.lt.s32.totalorder %s1481_s10, %s1481_s10 }
  0x19   : > { %p1484_p0 = pnand %p1482_p13, %p1470_p8  ;;  %p1491_p4 = por %p1490_p5, %p1489_p2 }
  0x1b   : > { %p1485_p1 = pneg %p1484_p0 }
  0x1d   : > { %p1492_p3 = pnand %p1491_p4, %p1485_p1 }
  0x1f   : > { %1495 = shalt.err (!%p1492_p3)
}
  0x20   : > { %s1525_s11 = smov 512   ;;  %s1526_s12 = smov 32  }
  0x21   : > { %1421 = dma.hbm_to_vmem [thread:$0]  (!%p1591_p6), %s1923_s2, 16384, %s205_s26, [#allocation3], %s1525_s11, %s1525_s11, %s1526_s12  }
  0x22   : > { %p1933_p7 = scmp.ne.s32.totalorder %s1930_s23, 0 }
  0x23   : > { %p1934_p9 = scmp.ne.s32.totalorder (!%p1933_p7), %s1931_s24, 0 }
  0x24   : > { %248 = sbr.rel (%p1933_p7) target bundleno = 601 (0x259), region = 40 }
  0x2b   : > { %1509 = dma.done.wait (%p1934_p9), [#allocation3], 16384  }
  0x2c   : > { %1511 = vsyncadd (%p1934_p9), [#allocation3], 4294950912  ;;  %s1272_s15 = sshll.u32 %s1514_s18, 3  ;;  %v450_v29 = vld [vmem:[#allocation2 + $0x8] sm:$0xff]  ;;  %v452_v35 = vld [vmem:[#allocation2 + $0x18] sm:$0xff]  ;;  %s1527_s29 = smov 64  }
  0x2d   : > { %p293_p3 = scmp.lt.s32.totalorder %s1272_s15, 15  ;;  %v454_v30 = vld [vmem:[#allocation2 + $0x28] sm:$0xff]  ;;  %v456_v36 = vld [vmem:[#allocation2 + $0x38] sm:$0xff]  ;;  %v449_v37 = vld [vmem:[#allocation2] sm:$0xff] }
  0x2e   : > { %v1286_v34 = vpack.c.bf16 %v454_v30, %v450_v29  ;;  %v1350_v39 = vpack.c.bf16 %v456_v36, %v452_v35  ;;  %v453_v40 = vld [vmem:[#allocation2 + $0x20] sm:$0xff]  ;;  %v451_v41 = vld [vmem:[#allocation2 + $0x10] sm:$0xff]  ;;  %v458_v47 = vld [vmem:[#allocation2 + $0x48] sm:$0xff] }
  0x2f   : > { %s1940_s15 = smov (!%p293_p3, %s1272_s15), 15  ;;  %v455_v42 = vld [vmem:[#allocation2 + $0x30] sm:$0xff]  ;;  %v1288_v45 = vpack.c.bf16 %v453_v40, %v449_v37  ;;  %v462_v48 = vld [vmem:[#allocation2 + $0x68] sm:$0xff]  ;;  %v460_v49 = vld [vmem:[#allocation2 + $0x58] sm:$0xff] }
  0x30   : > { %s1284_s16 = sshll.u32 %s1940_s15, 4  ;;  %1287 = vmatprep.subr.bf16.mxu0 %v1286_v34  ;;  %v1352_v46 = vpack.c.bf16 %v455_v42, %v451_v41  ;;  %1351 = vmatprep.subr.bf16.mxu1 %v1350_v39  ;;  %v1290_v52 = vpack.c.bf16 %v462_v48, %v458_v47  ;;  %v464_v53 = vld [vmem:[#allocation2 + $0x78] sm:$0xff]  ;;  %v457_v54 = vld [vmem:[#allocation2 + $0x40] sm:$0xff]  ;;  %v459_v59 = vld [vmem:[#allocation2 + $0x50] sm:$0xff]  ;;  %s1285_s24 = sshll.u32 %s1940_s15, 5 }
  0x31   : > { %s297_s25 = scalar_lea.vmem %s1921_s0, %s1284_s16  ;;  %v461_v55 = vld [vmem:[#allocation2 + $0x60] sm:$0xff]  ;;  %1289 = vmatpush1.bf16.msra.mxu0 %v1288_v45  ;;  %v1354_v57 = vpack.c.bf16 %v464_v53, %v460_v49  ;;  %v463_v60 = vld [vmem:[#allocation2 + $0x70] sm:$0xff]  ;;  %v466_v61 = vld [vmem:[#allocation2 + $0x88] sm:$0xff]  ;;  %s1731_s28 = scalar_lea.vmem %s1926_s5, %s1285_s24 }
  0x32   : > { %v1624_v0 = vld [vmem:[%s297_s25] sm:$0xff]  ;;  %v1626_v1 = vld [vmem:[%s297_s25 + $0x8] sm:$0xff]  ;;  %v1628_v2 = vld [vmem:[%s297_s25 + $0x10] sm:$0xff]  ;;  %v1292_v58 = vpack.c.bf16 %v461_v55, %v457_v54  ;;  %1353 = vmatpush1.bf16.msra.mxu1 %v1352_v46  ;;  %1291 = vmatprep.subr.bf16.mxu0 %v1290_v52  ;;  %v1356_v62 = vpack.c.bf16 %v463_v60, %v459_v59  ;;  %s1276_s30 = sshll.u32 %s1940_s15, 3 }
  0x33   : > { %v340_v3 = vmul.f32 %v1624_v0, %v1624_v0  ;;  %v341_v4 = vmul.f32 %v1626_v1, %v1626_v1  ;;  %v1634_v5 = vld [vmem:[%s297_s25 + $0x18] sm:$0xff]  ;;  %v342_v6 = vmul.f32 %v1628_v2, %v1628_v2  ;;  %v1638_v7 = vld [vmem:[%s297_s25 + $0x20] sm:$0xff]  ;;  %v1640_v8 = vld [vmem:[%s297_s25 + $0x28] sm:$0xff]  ;;  %1355 = vmatprep.subr.bf16.mxu1 %v1354_v57  ;;  %s1841_s8 = scalar_lea.vmem %s1924_s3, %s1276_s30  ;;  %s1846_s11 = scalar_lea.vmem %s1925_s4, %s1276_s30 }
  0x34   : > { %v343_v9 = vmul.f32 %v1634_v5, %v1634_v5  ;;  %v344_v10 = vmul.f32 %v1638_v7, %v1638_v7  ;;  %v345_v11 = vmul.f32 %v1640_v8, %v1640_v8  ;;  %v1648_v12 = vld [vmem:[%s297_s25 + $0x30] sm:$0xff]  ;;  %v1650_v13 = vld [vmem:[%s297_s25 + $0x38] sm:$0xff]  ;;  %v1652_v14 = vld [vmem:[%s297_s25 + $0x40] sm:$0xff] }
  0x35   : > { %v356_v15 = vadd.f32 %v341_v4, %v340_v3  ;;  %v346_v16 = vmul.f32 %v1648_v12, %v1648_v12  ;;  %v347_v17 = vmul.f32 %v1650_v13, %v1650_v13  ;;  %v1658_v18 = vld [vmem:[%s297_s25 + $0x48] sm:$0xff]  ;;  %v1660_v19 = vld [vmem:[%s297_s25 + $0x50] sm:$0xff]  ;;  %v1662_v20 = vld [vmem:[%s297_s25 + $0x58] sm:$0xff]  ;;  %v348_v22 = vmul.f32 %v1652_v14, %v1652_v14  ;;  %1293 = vmatpush1.bf16.msra.mxu0 %v1292_v58 }
  0x36   : > { %v362_v21 = vadd.f32 %v345_v11, %v344_v10  ;;  %v349_v23 = vmul.f32 %v1658_v18, %v1658_v18  ;;  %v1668_v24 = vld [vmem:[%s297_s25 + $0x60] sm:$0xff]  ;;  %v1670_v25 = vld [vmem:[%s297_s25 + $0x68] sm:$0xff]  ;;  %v1672_v26 = vld [vmem:[%s297_s25 + $0x70] sm:$0xff]  ;;  %v359_v27 = vadd.f32 %v343_v9, %v342_v6  ;;  %v350_v32 = vmul.f32 %v1660_v19, %v1660_v19  ;;  %1357 = vmatpush1.bf16.msra.mxu1 %v1356_v62 }
  0x37   : > { %357 = vadd.xlane.f32.xlu0 %v356_v15  ;;  %v1674_v28 = vld [vmem:[%s297_s25 + $0x78] sm:$0xff]  ;;  %v365_v31 = vadd.f32 %v347_v17, %v346_v16  ;;  %v351_v33 = vmul.f32 %v1662_v20, %v1662_v20  ;;  %v352_v38 = vmul.f32 %v1668_v24, %v1668_v24  ;;  %v353_v44 = vmul.f32 %v1670_v25, %v1670_v25  ;;  %v470_v63 = vld [vmem:[#allocation2 + $0xa8] sm:$0xff]  ;;  %v465_v10 = vld [vmem:[#allocation2 + $0x80] sm:$0xff] }
  0x38   : > { %363 = vadd.xlane.f32.xlu1 %v362_v21  ;;  %v368_v43 = vadd.f32 %v349_v23, %v348_v22  ;;  %v354_v50 = vmul.f32 %v1672_v26, %v1672_v26  ;;  %v355_v51 = vmul.f32 %v1674_v28, %v1674_v28  ;;  %v468_v3 = vld [vmem:[#allocation2 + $0x98] sm:$0xff]  ;;  %v1294_v6 = vpack.c.bf16 %v470_v63, %v466_v61  ;;  %v469_v11 = vld [vmem:[#allocation2 + $0xa0] sm:$0xff]  ;;  %v467_v15 = vld [vmem:[#allocation2 + $0x90] sm:$0xff] }
  0x39   : > { %v371_v56 = vadd.f32 %v351_v33, %v350_v32  ;;  %v472_v4 = vld [vmem:[#allocation2 + $0xb8] sm:$0xff]  ;;  %v374_v16 = vadd.f32 %v353_v44, %v352_v38  ;;  %v471_v17 = vld [vmem:[#allocation2 + $0xb0] sm:$0xff]  ;;  %v474_v21 = vld [vmem:[#allocation2 + $0xc8] sm:$0xff] }
  0x3a   : > { %v1358_v9 = vpack.c.bf16 %v472_v4, %v468_v3  ;;  %v478_v22 = vld [vmem:[#allocation2 + $0xe8] sm:$0xff]  ;;  %v377_v23 = vadd.f32 %v355_v51, %v354_v50  ;;  %v476_v29 = vld [vmem:[#allocation2 + $0xd8] sm:$0xff]  ;;  %1295 = vmatprep.subr.bf16.mxu0 %v1294_v6  ;;  %v473_v33 = vld [vmem:[#allocation2 + $0xc0] sm:$0xff] }
  0x3b   : > { %360 = vadd.xlane.f32.xlu0 %v359_v27  ;;  %v1296_v27 = vpack.c.bf16 %v469_v11, %v465_v10  ;;  %v480_v30 = vld [vmem:[#allocation2 + $0xf8] sm:$0xff]  ;;  %v1298_v32 = vpack.c.bf16 %v478_v22, %v474_v21  ;;  %v477_v34 = vld [vmem:[#allocation2 + $0xe0] sm:$0xff]  ;;  %v475_v35 = vld [vmem:[#allocation2 + $0xd0] sm:$0xff] }
  0x3c   : > { %366 = vadd.xlane.f32.xlu1 %v365_v31  ;;  %v1360_v31 = vpack.c.bf16 %v471_v17, %v467_v15  ;;  %1359 = vmatprep.subr.bf16.mxu1 %v1358_v9  ;;  %v1362_v36 = vpack.c.bf16 %v480_v30, %v476_v29  ;;  %v479_v37 = vld [vmem:[#allocation2 + $0xf0] sm:$0xff]  ;;  %v482_v38 = vld [vmem:[#allocation2 + $0x108] sm:$0xff]  ;;  %v484_v40 = vld [vmem:[#allocation2 + $0x118] sm:$0xff]  ;;  %v1300_v42 = vpack.c.bf16 %v477_v34, %v473_v33 }
  0x3d   : > { %v486_v39 = vld [vmem:[#allocation2 + $0x128] sm:$0xff]  ;;  %v488_v41 = vld [vmem:[#allocation2 + $0x138] sm:$0xff]  ;;  %1297 = vmatpush1.bf16.msra.mxu0 %v1296_v27  ;;  %v481_v45 = vld [vmem:[#allocation2 + $0x100] sm:$0xff] }
  0x3e   : > { %1361 = vmatpush1.bf16.msra.mxu1 %v1360_v31  ;;  %1299 = vmatprep.subr.bf16.mxu0 %v1298_v32  ;;  %v1302_v44 = vpack.c.bf16 %v486_v39, %v482_v38  ;;  %v485_v46 = vld [vmem:[#allocation2 + $0x120] sm:$0xff]  ;;  %v483_v47 = vld [vmem:[#allocation2 + $0x110] sm:$0xff]  ;;  %v1366_v48 = vpack.c.bf16 %v488_v41, %v484_v40  ;;  %v490_v50 = vld [vmem:[#allocation2 + $0x148] sm:$0xff] }
  0x3f   : > { %369 = vadd.xlane.f32.xlu0 %v368_v43  ;;  %v1364_v43 = vpack.c.bf16 %v479_v37, %v475_v35  ;;  %1363 = vmatprep.subr.bf16.mxu1 %v1362_v36  ;;  %v487_v49 = vld [vmem:[#allocation2 + $0x130] sm:$0xff]  ;;  %v494_v51 = vld [vmem:[#allocation2 + $0x168] sm:$0xff]  ;;  %v492_v52 = vld [vmem:[#allocation2 + $0x158] sm:$0xff]  ;;  %v1304_v54 = vpack.c.bf16 %v485_v46, %v481_v45 }
  0x40   : > { %372 = vadd.xlane.f32.xlu1 %v371_v56  ;;  %v496_v53 = vld [vmem:[#allocation2 + $0x178] sm:$0xff]  ;;  %v1368_v55 = vpack.c.bf16 %v487_v49, %v483_v47  ;;  %v1306_v56 = vpack.c.bf16 %v494_v51, %v490_v50  ;;  %v489_v57 = vld [vmem:[#allocation2 + $0x140] sm:$0xff]  ;;  %v491_v59 = vld [vmem:[#allocation2 + $0x150] sm:$0xff] }
  0x41   : > { %1301 = vmatpush1.bf16.msra.mxu0 %v1300_v42  ;;  %v493_v58 = vld [vmem:[#allocation2 + $0x160] sm:$0xff]  ;;  %v1370_v60 = vpack.c.bf16 %v496_v53, %v492_v52  ;;  %v495_v61 = vld [vmem:[#allocation2 + $0x170] sm:$0xff]  ;;  %v498_v62 = vld [vmem:[#allocation2 + $0x188] sm:$0xff] }
  0x42   : > { %1365 = vmatpush1.bf16.msra.mxu1 %v1364_v43  ;;  %1303 = vmatprep.subr.bf16.mxu0 %v1302_v44  ;;  %v502_v63 = vld [vmem:[#allocation2 + $0x1a8] sm:$0xff]  ;;  %v500_v3 = vld [vmem:[#allocation2 + $0x198] sm:$0xff]  ;;  %v1308_v6 = vpack.c.bf16 %v493_v58, %v489_v57  ;;  %v1372_v9 = vpack.c.bf16 %v495_v61, %v491_v59  ;;  %v497_v11 = vld [vmem:[#allocation2 + $0x180] sm:$0xff] }
  0x43   : > { %375 = vadd.xlane.f32.xlu0 %v374_v16  ;;  %1367 = vmatprep.subr.bf16.mxu1 %v1366_v48  ;;  %v504_v4 = vld [vmem:[#allocation2 + $0x1b8] sm:$0xff]  ;;  %v1310_v10 = vpack.c.bf16 %v502_v63, %v498_v62  ;;  %v501_v15 = vld [vmem:[#allocation2 + $0x1a0] sm:$0xff]  ;;  %v499_v16 = vld [vmem:[#allocation2 + $0x190] sm:$0xff] }
  0x44   : > { %378 = vadd.xlane.f32.xlu1 %v377_v23  ;;  %v1374_v17 = vpack.c.bf16 %v504_v4, %v500_v3  ;;  %v503_v21 = vld [vmem:[#allocation2 + $0x1b0] sm:$0xff]  ;;  %v506_v22 = vld [vmem:[#allocation2 + $0x1c8] sm:$0xff]  ;;  %v508_v27 = vld [vmem:[#allocation2 + $0x1d8] sm:$0xff]  ;;  %v1312_v30 = vpack.c.bf16 %v501_v15, %v497_v11 }
  0x45   : > { %1305 = vmatpush1.bf16.msra.mxu0 %v1304_v54  ;;  %v510_v23 = vld [vmem:[#allocation2 + $0x1e8] sm:$0xff]  ;;  %v512_v29 = vld [vmem:[#allocation2 + $0x1f8] sm:$0xff]  ;;  %v1376_v31 = vpack.c.bf16 %v503_v21, %v499_v16  ;;  %v505_v33 = vld [vmem:[#allocation2 + $0x1c0] sm:$0xff] }
  0x46   : > { %1369 = vmatpush1.bf16.msra.mxu1 %v1368_v55  ;;  %1307 = vmatprep.subr.bf16.mxu0 %v1306_v56  ;;  %v1314_v32 = vpack.c.bf16 %v510_v23, %v506_v22  ;;  %v509_v34 = vld [vmem:[#allocation2 + $0x1e0] sm:$0xff]  ;;  %v507_v35 = vld [vmem:[#allocation2 + $0x1d0] sm:$0xff]  ;;  %v1378_v36 = vpack.c.bf16 %v512_v29, %v508_v27  ;;  %v514_v38 = vld [vmem:[#allocation2 + $0x208] sm:$0xff] }
  0x47   : > { %1371 = vmatprep.subr.bf16.mxu1 %v1370_v60  ;;  %v511_v37 = vld [vmem:[#allocation2 + $0x1f0] sm:$0xff]  ;;  %v518_v39 = vld [vmem:[#allocation2 + $0x228] sm:$0xff]  ;;  %v516_v40 = vld [vmem:[#allocation2 + $0x218] sm:$0xff]  ;;  %v1316_v42 = vpack.c.bf16 %v509_v34, %v505_v33 }
  0x48   : > { %v520_v41 = vld [vmem:[#allocation2 + $0x238] sm:$0xff]  ;;  %v1380_v43 = vpack.c.bf16 %v511_v37, %v507_v35  ;;  %v1318_v44 = vpack.c.bf16 %v518_v39, %v514_v38  ;;  %v513_v45 = vld [vmem:[#allocation2 + $0x200] sm:$0xff]  ;;  %v515_v47 = vld [vmem:[#allocation2 + $0x210] sm:$0xff] }
  0x49   : > { %1309 = vmatpush1.bf16.msra.mxu0 %v1308_v6  ;;  %v517_v46 = vld [vmem:[#allocation2 + $0x220] sm:$0xff]  ;;  %v1382_v48 = vpack.c.bf16 %v520_v41, %v516_v40  ;;  %v519_v49 = vld [vmem:[#allocation2 + $0x230] sm:$0xff]  ;;  %v522_v50 = vld [vmem:[#allocation2 + $0x248] sm:$0xff] }
  0x4a   : > { %1373 = vmatpush1.bf16.msra.mxu1 %v1372_v9  ;;  %1311 = vmatprep.subr.bf16.mxu0 %v1310_v10  ;;  %v526_v51 = vld [vmem:[#allocation2 + $0x268] sm:$0xff]  ;;  %v524_v52 = vld [vmem:[#allocation2 + $0x258] sm:$0xff]  ;;  %v1320_v54 = vpack.c.bf16 %v517_v46, %v513_v45  ;;  %v1384_v55 = vpack.c.bf16 %v519_v49, %v515_v47  ;;  %v521_v57 = vld [vmem:[#allocation2 + $0x240] sm:$0xff] }
  0x4b   : > { %1375 = vmatprep.subr.bf16.mxu1 %v1374_v17  ;;  %v528_v53 = vld [vmem:[#allocation2 + $0x278] sm:$0xff]  ;;  %v1322_v56 = vpack.c.bf16 %v526_v51, %v522_v50  ;;  %v525_v58 = vld [vmem:[#allocation2 + $0x260] sm:$0xff]  ;;  %v523_v59 = vld [vmem:[#allocation2 + $0x250] sm:$0xff] }
  0x4c   : > { %v1386_v60 = vpack.c.bf16 %v528_v53, %v524_v52  ;;  %v527_v61 = vld [vmem:[#allocation2 + $0x270] sm:$0xff]  ;;  %v530_v62 = vld [vmem:[#allocation2 + $0x288] sm:$0xff]  ;;  %v532_v3 = vld [vmem:[#allocation2 + $0x298] sm:$0xff]  ;;  %v1324_v6 = vpack.c.bf16 %v525_v58, %v521_v57 }
  0x4d   : > { %1313 = vmatpush1.bf16.msra.mxu0 %v1312_v30  ;;  %v534_v63 = vld [vmem:[#allocation2 + $0x2a8] sm:$0xff]  ;;  %v536_v4 = vld [vmem:[#allocation2 + $0x2b8] sm:$0xff]  ;;  %v1388_v9 = vpack.c.bf16 %v527_v61, %v523_v59  ;;  %v529_v11 = vld [vmem:[#allocation2 + $0x280] sm:$0xff] }
  0x4e   : > { %1377 = vmatpush1.bf16.msra.mxu1 %v1376_v31  ;;  %1315 = vmatprep.subr.bf16.mxu0 %v1314_v32  ;;  %v1326_v10 = vpack.c.bf16 %v534_v63, %v530_v62  ;;  %v533_v15 = vld [vmem:[#allocation2 + $0x2a0] sm:$0xff]  ;;  %v531_v16 = vld [vmem:[#allocation2 + $0x290] sm:$0xff]  ;;  %v1390_v17 = vpack.c.bf16 %v536_v4, %v532_v3  ;;  %v538_v22 = vld [vmem:[#allocation2 + $0x2c8] sm:$0xff] }
  0x4f   : > { %1379 = vmatprep.subr.bf16.mxu1 %v1378_v36  ;;  %v535_v21 = vld [vmem:[#allocation2 + $0x2b0] sm:$0xff]  ;;  %v542_v23 = vld [vmem:[#allocation2 + $0x2e8] sm:$0xff]  ;;  %v540_v27 = vld [vmem:[#allocation2 + $0x2d8] sm:$0xff]  ;;  %v1328_v30 = vpack.c.bf16 %v533_v15, %v529_v11 }
  0x50   : > { %v544_v29 = vld [vmem:[#allocation2 + $0x2f8] sm:$0xff]  ;;  %v1392_v31 = vpack.c.bf16 %v535_v21, %v531_v16  ;;  %v1330_v32 = vpack.c.bf16 %v542_v23, %v538_v22  ;;  %v537_v33 = vld [vmem:[#allocation2 + $0x2c0] sm:$0xff]  ;;  %v539_v35 = vld [vmem:[#allocation2 + $0x2d0] sm:$0xff] }
  0x51   : > { %1317 = vmatpush1.bf16.msra.mxu0 %v1316_v42  ;;  %v541_v34 = vld [vmem:[#allocation2 + $0x2e0] sm:$0xff]  ;;  %v1394_v36 = vpack.c.bf16 %v544_v29, %v540_v27  ;;  %v543_v37 = vld [vmem:[#allocation2 + $0x2f0] sm:$0xff]  ;;  %v546_v38 = vld [vmem:[#allocation2 + $0x308] sm:$0xff] }
  0x52   : > { %1381 = vmatpush1.bf16.msra.mxu1 %v1380_v43  ;;  %1319 = vmatprep.subr.bf16.mxu0 %v1318_v44  ;;  %v550_v39 = vld [vmem:[#allocation2 + $0x328] sm:$0xff]  ;;  %v548_v40 = vld [vmem:[#allocation2 + $0x318] sm:$0xff]  ;;  %v1332_v42 = vpack.c.bf16 %v541_v34, %v537_v33  ;;  %v1396_v43 = vpack.c.bf16 %v543_v37, %v539_v35  ;;  %v545_v45 = vld [vmem:[#allocation2 + $0x300] sm:$0xff] }
  0x53   : > { %1383 = vmatprep.subr.bf16.mxu1 %v1382_v48  ;;  %v552_v41 = vld [vmem:[#allocation2 + $0x338] sm:$0xff]  ;;  %v1334_v44 = vpack.c.bf16 %v550_v39, %v546_v38  ;;  %v549_v46 = vld [vmem:[#allocation2 + $0x320] sm:$0xff]  ;;  %v547_v47 = vld [vmem:[#allocation2 + $0x310] sm:$0xff] }
  0x54   : > { %v1398_v48 = vpack.c.bf16 %v552_v41, %v548_v40  ;;  %v551_v49 = vld [vmem:[#allocation2 + $0x330] sm:$0xff]  ;;  %v554_v50 = vld [vmem:[#allocation2 + $0x348] sm:$0xff]  ;;  %v556_v52 = vld [vmem:[#allocation2 + $0x358] sm:$0xff] }
  0x55   : > { %1321 = vmatpush1.bf16.msra.mxu0 %v1320_v54  ;;  %v558_v51 = vld [vmem:[#allocation2 + $0x368] sm:$0xff]  ;;  %v560_v53 = vld [vmem:[#allocation2 + $0x378] sm:$0xff]  ;;  %v1336_v54 = vpack.c.bf16 %v549_v46, %v545_v45  ;;  %v553_v57 = vld [vmem:[#allocation2 + $0x340] sm:$0xff] }
  0x56   : > { %1385 = vmatpush1.bf16.msra.mxu1 %v1384_v55  ;;  %1323 = vmatprep.subr.bf16.mxu0 %v1322_v56  ;;  %v1400_v55 = vpack.c.bf16 %v551_v49, %v547_v47  ;;  %v1338_v56 = vpack.c.bf16 %v558_v51, %v554_v50  ;;  %v557_v58 = vld [vmem:[#allocation2 + $0x360] sm:$0xff]  ;;  %v555_v59 = vld [vmem:[#allocation2 + $0x350] sm:$0xff]  ;;  %v562_v62 = vld [vmem:[#allocation2 + $0x388] sm:$0xff] }
  0x57   : > { %1387 = vmatprep.subr.bf16.mxu1 %v1386_v60  ;;  %v1402_v60 = vpack.c.bf16 %v560_v53, %v556_v52  ;;  %v559_v61 = vld [vmem:[#allocation2 + $0x370] sm:$0xff]  ;;  %v566_v63 = vld [vmem:[#allocation2 + $0x3a8] sm:$0xff]  ;;  %v564_v3 = vld [vmem:[#allocation2 + $0x398] sm:$0xff] }
  0x58   : > { %v568_v4 = vld [vmem:[#allocation2 + $0x3b8] sm:$0xff]  ;;  %v561_v11 = vld [vmem:[#allocation2 + $0x380] sm:$0xff]  ;;  %v563_v16 = vld [vmem:[#allocation2 + $0x390] sm:$0xff] }
  0x59   : > { %1325 = vmatpush1.bf16.msra.mxu0 %v1324_v6  ;;  %v1340_v6 = vpack.c.bf16 %v557_v58, %v553_v57  ;;  %v565_v15 = vld [vmem:[#allocation2 + $0x3a0] sm:$0xff]  ;;  %v567_v21 = vld [vmem:[#allocation2 + $0x3b0] sm:$0xff]  ;;  %v570_v22 = vld [vmem:[#allocation2 + $0x3c8] sm:$0xff] }
  0x5a   : > { %1389 = vmatpush1.bf16.msra.mxu1 %v1388_v9  ;;  %1327 = vmatprep.subr.bf16.mxu0 %v1326_v10  ;;  %v1404_v9 = vpack.c.bf16 %v559_v61, %v555_v59  ;;  %v1342_v10 = vpack.c.bf16 %v566_v63, %v562_v62  ;;  %v574_v23 = vld [vmem:[#allocation2 + $0x3e8] sm:$0xff]  ;;  %v572_v27 = vld [vmem:[#allocation2 + $0x3d8] sm:$0xff]  ;;  %v569_v33 = vld [vmem:[#allocation2 + $0x3c0] sm:$0xff] }
  0x5b   : > { %1391 = vmatprep.subr.bf16.mxu1 %v1390_v17  ;;  %v1406_v17 = vpack.c.bf16 %v568_v4, %v564_v3  ;;  %v576_v29 = vld [vmem:[#allocation2 + $0x3f8] sm:$0xff]  ;;  %v573_v34 = vld [vmem:[#allocation2 + $0x3e0] sm:$0xff]  ;;  %v575_v37 = vld [vmem:[#allocation2 + $0x3f0] sm:$0xff] }
  0x5c   : > { %v1410_v35 = vpack.c.bf16 %v576_v29, %v572_v27  ;;  %v1348_v38 = vpack.c.bf16 %v573_v34, %v569_v33 }
  0x5d   : > { %1329 = vmatpush1.bf16.msra.mxu0 %v1328_v30  ;;  %v1344_v30 = vpack.c.bf16 %v565_v15, %v561_v11 }
  0x5e   : > { %1393 = vmatpush1.bf16.msra.mxu1 %v1392_v31  ;;  %1331 = vmatprep.subr.bf16.mxu0 %v1330_v32  ;;  %v1408_v31 = vpack.c.bf16 %v567_v21, %v563_v16  ;;  %v1346_v32 = vpack.c.bf16 %v574_v23, %v570_v22 }
  0x5f   : > { %1395 = vmatprep.subr.bf16.mxu1 %v1394_v36  ;;  %v571_v36 = vld [vmem:[#allocation2 + $0x3d0] sm:$0xff] }
  0x60   : > { %v1412_v39 = vpack.c.bf16 %v575_v37, %v571_v36 }
  0x61   : > { %1333 = vmatpush1.bf16.msra.mxu0 %v1332_v42 }
  0x62   : > { %1397 = vmatpush1.bf16.msra.mxu1 %v1396_v43  ;;  %1335 = vmatprep.subr.bf16.mxu0 %v1334_v44  ;;  %v423_v44 = vlaneseq }
  0x63   : > { %1399 = vmatprep.subr.bf16.mxu1 %v1398_v48 }
  0x64   : > { %v424_v51 = vshrl.u32 %v423_v44, 7 }
  0x65   : > { %1337 = vmatpush1.bf16.msra.mxu0 %v1336_v54 }
  0x66   : > { %1401 = vmatpush1.bf16.msra.mxu1 %v1400_v55  ;;  %1339 = vmatprep.subr.bf16.mxu0 %v1338_v56  ;;  %v425_v57 = vsub.s32 0, %v424_v51  ;;  %v429_v58 = vsub.s32 1, %v424_v51 }
  0x67   : > { %1403 = vmatprep.subr.bf16.mxu1 %v1402_v60  ;;  %v421_v60 = vld [vmem:[%s1922_s1] sm:$0x3] }
  0x68   : > { %v1691_v4 = vrot.slane %v421_v60, %v425_v57 }
  0x69   : > { %1341 = vmatpush1.bf16.msra.mxu0 %v1340_v6  ;;  %v1693_v6 = vrot.slane %v421_v60, %v429_v58 }
  0x6a   : > { %1405 = vmatpush1.bf16.msra.mxu1 %v1404_v9  ;;  %1343 = vmatprep.subr.bf16.mxu0 %v1342_v10 }
  0x6b   : > { %1407 = vmatprep.subr.bf16.mxu1 %v1406_v17 }
  0x6d   : > { %1345 = vmatpush1.bf16.msra.mxu0 %v1344_v30 }
  0x6e   : > { %1409 = vmatpush1.bf16.msra.mxu1 %v1408_v31  ;;  %1347 = vmatprep.subr.bf16.mxu0 %v1346_v32 }
  0x6f   : > { %1411 = vmatprep.subr.bf16.mxu1 %v1410_v35 }
  0x71   : > { %1349 = vmatpush1.bf16.msra.mxu0 %v1348_v38 }
  0x72   : > { %1413 = vmatpush1.bf16.msra.mxu1 %v1412_v39 }
  0xc4   : > { %v358_v40 = vpop.xlane.xlu0 %357 }
  0xc5   : > { %v381_v41 = vmul.f32 0.00390625, %v358_v40  ;;  %v364_v42 = vpop.xlane.xlu1 %363 }
  0xc6   : > { %v383_v43 = vmul.f32 0.00390625, %v364_v42 }
  0xc7   : > { %v389_v45 = vadd.f32 1e-06, %v381_v41 }
  0xc8   : > { %v361_v46 = vpop.xlane.xlu0 %360  ;;  %v391_v47 = vadd.f32 1e-06, %v383_v43 }
  0xc9   : > { %1452 = vrsqrt.f32 %v389_v45  ;;  %v382_v48 = vmul.f32 0.00390625, %v361_v46  ;;  %v367_v49 = vpop.xlane.xlu1 %366 }
  0xca   : > { %1454 = vrsqrt.f32 %v391_v47  ;;  %v384_v50 = vmul.f32 0.00390625, %v367_v49 }
  0xcb   : > { %v390_v52 = vadd.f32 1e-06, %v382_v48 }
  0xcc   : > { %v392_v53 = vadd.f32 1e-06, %v384_v50  ;;  %v370_v54 = vpop.xlane.xlu0 %369 }
  0xcd   : > { %1456 = vrsqrt.f32 %v390_v52  ;;  %v385_v55 = vmul.f32 0.00390625, %v370_v54  ;;  %v373_v56 = vpop.xlane.xlu1 %372 }
  0xce   : > { %1458 = vrsqrt.f32 %v392_v53  ;;  %v386_v59 = vmul.f32 0.00390625, %v373_v56 }
  0xcf   : > { %v393_v61 = vadd.f32 1e-06, %v385_v55 }
  0xd0   : > { %v376_v62 = vpop.xlane.xlu0 %375  ;;  %v394_v63 = vadd.f32 1e-06, %v386_v59 }
  0xd1   : > { %1460 = vrsqrt.f32 %v393_v61  ;;  %v387_v3 = vmul.f32 0.00390625, %v376_v62  ;;  %v379_v9 = vpop.xlane.xlu1 %378 }
  0xd2   : > { %1462 = vrsqrt.f32 %v394_v63  ;;  %v388_v21 = vmul.f32 0.00390625, %v379_v9 }
  0xd3   : > { %v1453_v10 = vpop.eup %1452  ;;  %v395_v17 = vadd.f32 1e-06, %v387_v3 }
  0xd4   : > { %v1455_v11 = vpop.eup %1454  ;;  %v406_v15 = vmul.f32 %v1453_v10, %v1626_v1  ;;  %v405_v16 = vmul.f32 %v1453_v10, %v1624_v0  ;;  %v396_v1 = vadd.f32 1e-06, %v388_v21 }
  0xd5   : > { %v410_v27 = vmul.f32 %v1455_v11, %v1640_v8  ;;  %1464 = vrsqrt.f32 %v395_v17  ;;  %v409_v0 = vmul.f32 %v1455_v11, %v1638_v7 }
  0xd6   : > { %v434_v22 = vmul.f32 %v1693_v6, %v406_v15  ;;  %v433_v23 = vmul.f32 %v1691_v4, %v405_v16  ;;  %1466 = vrsqrt.f32 %v396_v1 }
  0xd7   : > { %v1457_v29 = vpop.eup %1456  ;;  %v438_v8 = vmul.f32 %v1693_v6, %v410_v27 }
  0xd8   : > { %v1459_v30 = vpop.eup %1458  ;;  %641 = vmatprep.mubr.f32.mxu0 %v434_v22  ;;  %754 = vmatprep.mubr.f32.mxu1 %v434_v22  ;;  %v408_v31 = vmul.f32 %v1457_v29, %v1634_v5  ;;  %v407_v32 = vmul.f32 %v1457_v29, %v1628_v2  ;;  %v437_v2 = vmul.f32 %v1691_v4, %v409_v0 }
  0xd9   : > { %642 = vmatmul.mubr.f32.vlgmr.msra.gmra.mrb[0].mxu0 %v433_v23  ;;  %755 = vmatmul.mubr.f32.vlgmr.msra.gmra.mrb[0].mxu1 %v433_v23  ;;  %v412_v35 = vmul.f32 %v1459_v30, %v1650_v13  ;;  %v411_v5 = vmul.f32 %v1459_v30, %v1648_v12 }
  0xda   : > { %v436_v33 = vmul.f32 %v1693_v6, %v408_v31  ;;  %v435_v34 = vmul.f32 %v1691_v4, %v407_v32  ;;  %v803_v31 = vld [vmem:[%s1841_s8] sm:$0xff] }
  0xdb   : > { %v1461_v36 = vpop.eup %1460  ;;  %v440_v7 = vmul.f32 %v1693_v6, %v412_v35  ;;  %v439_v13 = vmul.f32 %v1691_v4, %v411_v5  ;;  %v811_v32 = vld [vmem:[%s1846_s11] sm:$0xff] }
  0xdc   : > { %647 = vmatprep.mubr.f32.mxu0 %v436_v33  ;;  %760 = vmatprep.mubr.f32.mxu1 %v436_v33  ;;  %v414_v37 = vmul.f32 %v1461_v36, %v1658_v18  ;;  %v1463_v38 = vpop.eup %1462  ;;  %v413_v39 = vmul.f32 %v1461_v36, %v1652_v14 }
  0xdd   : > { %648 = vmatmul.mubr.f32.gmra.mrb[2].mxu0 %v435_v34  ;;  %761 = vmatmul.mubr.f32.gmra.mrb[2].mxu1 %v435_v34  ;;  %v416_v12 = vmul.f32 %v1463_v38, %v1662_v20  ;;  %v415_v18 = vmul.f32 %v1463_v38, %v1660_v19  ;;  %v804_v34 = vld [vmem:[%s1841_s8 + $0x8] sm:$0xff] }
  0xde   : > { %653 = vmatprep.mubr.f32.mxu0 %v438_v8  ;;  %766 = vmatprep.mubr.f32.mxu1 %v438_v8  ;;  %v442_v40 = vmul.f32 %v1693_v6, %v414_v37  ;;  %v441_v42 = vmul.f32 %v1691_v4, %v413_v39  ;;  %v812_v8 = vld [vmem:[%s1846_s11 + $0x8] sm:$0xff] }
  0xdf   : > { %v1465_v41 = vpop.eup %1464  ;;  %v444_v43 = vmul.f32 %v1693_v6, %v416_v12  ;;  %v443_v45 = vmul.f32 %v1691_v4, %v415_v18 }
  0xe0   : > { %v418_v44 = vmul.f32 %v1465_v41, %v1670_v25  ;;  %v1467_v14 = vpop.eup %1466  ;;  %v417_v20 = vmul.f32 %v1465_v41, %v1668_v24 }
  0xe1   : > { %654 = vmatmul.mubr.f32.gmra.mrb[4].mxu0 %v437_v2  ;;  %767 = vmatmul.mubr.f32.gmra.mrb[4].mxu1 %v437_v2  ;;  %v420_v19 = vmul.f32 %v1467_v14, %v1674_v28  ;;  %v419_v25 = vmul.f32 %v1467_v14, %v1672_v26 }
  0xe2   : > { %659 = vmatprep.mubr.f32.mxu0 %v440_v7  ;;  %772 = vmatprep.mubr.f32.mxu1 %v440_v7  ;;  %v446_v46 = vmul.f32 %v1693_v6, %v418_v44  ;;  %v445_v47 = vmul.f32 %v1691_v4, %v417_v20  ;;  %v813_v20 = vld [vmem:[%s1846_s11 + $0x10] sm:$0xff] }
  0xe3   : > { %v448_v48 = vmul.f32 %v1693_v6, %v420_v19  ;;  %v447_v24 = vmul.f32 %v1691_v4, %v419_v25 }
  0xe5   : > { %660 = vmatmul.mubr.f32.gmra.mrb[6].mxu0 %v439_v13  ;;  %773 = vmatmul.mubr.f32.gmra.mrb[6].mxu1 %v439_v13 }
  0xe6   : > { %665 = vmatprep.mubr.f32.mxu0 %v442_v40  ;;  %778 = vmatprep.mubr.f32.mxu1 %v442_v40 }
  0xe9   : > { %666 = vmatmul.mubr.f32.gmra.mrb[8].mxu0 %v441_v42  ;;  %779 = vmatmul.mubr.f32.gmra.mrb[8].mxu1 %v441_v42 }
  0xea   : > { %671 = vmatprep.mubr.f32.mxu0 %v444_v43  ;;  %784 = vmatprep.mubr.f32.mxu1 %v444_v43 }
  0xed   : > { %672 = vmatmul.mubr.f32.gmra.mrb[10].mxu0 %v443_v45  ;;  %785 = vmatmul.mubr.f32.gmra.mrb[10].mxu1 %v443_v45  ;;  %v805_v45 = vld [vmem:[%s1841_s8 + $0x10] sm:$0xff] }
  0xee   : > { %677 = vmatprep.mubr.f32.mxu0 %v446_v46  ;;  %790 = vmatprep.mubr.f32.mxu1 %v446_v46 }
  0xf1   : > { %678 = vmatmul.mubr.f32.gmra.mrb[12].mxu0 %v445_v47  ;;  %791 = vmatmul.mubr.f32.gmra.mrb[12].mxu1 %v445_v47 }
  0xf2   : > { %683 = vmatprep.mubr.f32.mxu0 %v448_v48  ;;  %796 = vmatprep.mubr.f32.mxu1 %v448_v48 }
  0xf5   : > { %684 = vmatmul.mubr.f32.gmra.mrb[14].mxu0 %v447_v24  ;;  %797 = vmatmul.mubr.f32.gmra.mrb[14].mxu1 %v447_v24 }
 0x1ac   : > { %v1733_v26 = vpop.f32.mrb[0].mxu0  ;;  %v1735_v28 = vpop.f32.mrb[0].mxu1 }
 0x1ad   : > { %v758_v49 = vpop.f32.mrb[1].mxu1  ;;  %828 = vrot.lane.b32.xlu0 %v1733_v26, %s1527_s29  ;;  %v1739_v50 = vpop.f32.mrb[1].mxu0  ;;  %v820_v1 = vmul.f32 %v803_v31, %v1733_v26  ;;  %v966_v36 = vmul.f32 %v803_v31, %v1735_v28 }
 0x1ae   : > { %1114 = vst [vmem:[%s1731_s28 + $0x18] sm:$0xff] %v758_v49  ;;  %v893_v12 = vmul.f32 %v803_v31, %v1739_v50  ;;  %v815_v31 = vld [vmem:[%s1846_s11 + $0x20] sm:$0xff] }
 0x1b0   : > { %v1742_v51 = vpop.f32.mrb[2].mxu0  ;;  %v1744_v52 = vpop.f32.mrb[2].mxu1 }
 0x1b1   : > { %974 = vrot.lane.b32.xlu0 %v1735_v28, %s1527_s29  ;;  %v764_v53 = vpop.f32.mrb[3].mxu1  ;;  %830 = vrot.lane.b32.xlu1 %v1742_v51, %s1527_s29  ;;  %v1750_v54 = vpop.f32.mrb[3].mxu0  ;;  %v821_v7 = vmul.f32 %v804_v34, %v1742_v51  ;;  %v967_v18 = vmul.f32 %v804_v34, %v1744_v52 }
 0x1b2   : > { %1118 = vst [vmem:[%s1731_s28 + $0x38] sm:$0xff] %v764_v53  ;;  %v894_v47 = vmul.f32 %v804_v34, %v1750_v54 }
 0x1b4   : > { %v1753_v55 = vpop.f32.mrb[4].mxu1  ;;  %v1755_v56 = vpop.f32.mrb[4].mxu0 }
 0x1b5   : > { %901 = vrot.lane.b32.xlu0 %v1739_v50, %s1527_s29  ;;  %976 = vrot.lane.b32.xlu1 %v1744_v52, %s1527_s29  ;;  %v1761_v57 = vpop.f32.mrb[5].mxu0  ;;  %v770_v58 = vpop.f32.mrb[5].mxu1  ;;  %v968_v24 = vmul.f32 %v805_v45, %v1753_v55  ;;  %v822_v52 = vmul.f32 %v805_v45, %v1755_v56 }
 0x1b6   : > { %1122 = vst [vmem:[%s1731_s28 + $0x58] sm:$0xff] %v770_v58  ;;  %v895_v58 = vmul.f32 %v805_v45, %v1761_v57 }
 0x1b8   : > { %v1764_v59 = vpop.f32.mrb[6].mxu0  ;;  %v1766_v60 = vpop.f32.mrb[6].mxu1 }
 0x1b9   : > { %978 = vrot.lane.b32.xlu0 %v1753_v55, %s1527_s29  ;;  %903 = vrot.lane.b32.xlu1 %v1750_v54, %s1527_s29  ;;  %v1772_v61 = vpop.f32.mrb[7].mxu0  ;;  %v776_v62 = vpop.f32.mrb[7].mxu1 }
 0x1ba   : > { %1126 = vst [vmem:[%s1731_s28 + $0x78] sm:$0xff] %v776_v62  ;;  %v806_v62 = vld [vmem:[%s1841_s8 + $0x18] sm:$0xff] }
 0x1bc   : > { %v1775_v63 = vpop.f32.mrb[8].mxu0  ;;  %v1777_v3 = vpop.f32.mrb[8].mxu1 }
 0x1bd   : > { %832 = vrot.lane.b32.xlu1 %v1755_v56, %s1527_s29  ;;  %905 = vrot.lane.b32.xlu0 %v1761_v57, %s1527_s29  ;;  %v1783_v4 = vpop.f32.mrb[9].mxu0  ;;  %v782_v6 = vpop.f32.mrb[9].mxu1 }
 0x1be   : > { %1130 = vst [vmem:[%s1731_s28 + $0x98] sm:$0xff] %v782_v6  ;;  %v807_v6 = vld [vmem:[%s1841_s8 + $0x20] sm:$0xff] }
 0x1bf   : > { %v824_v56 = vmul.f32 %v807_v6, %v1775_v63 }
 0x1c0   : > { %v1786_v9 = vpop.f32.mrb[10].mxu0  ;;  %v1788_v10 = vpop.f32.mrb[10].mxu1 }
 0x1c1   : > { %834 = vrot.lane.b32.xlu1 %v1764_v59, %s1527_s29  ;;  %836 = vrot.lane.b32.xlu0 %v1775_v63, %s1527_s29  ;;  %v1794_v11 = vpop.f32.mrb[11].mxu0  ;;  %v788_v15 = vpop.f32.mrb[11].mxu1 }
 0x1c2   : > { %1134 = vst [vmem:[%s1731_s28 + $0xb8] sm:$0xff] %v788_v15 }
 0x1c4   : > { %v1797_v16 = vpop.f32.mrb[12].mxu0  ;;  %v1799_v17 = vpop.f32.mrb[12].mxu1 }
 0x1c5   : > { %980 = vrot.lane.b32.xlu1 %v1766_v60, %s1527_s29  ;;  %982 = vrot.lane.b32.xlu0 %v1777_v3, %s1527_s29  ;;  %v1805_v21 = vpop.f32.mrb[13].mxu0  ;;  %v794_v22 = vpop.f32.mrb[13].mxu1 }
 0x1c6   : > { %1138 = vst [vmem:[%s1731_s28 + $0xd8] sm:$0xff] %v794_v22 }
 0x1c8   : > { %v1808_v23 = vpop.f32.mrb[14].mxu0  ;;  %v1810_v27 = vpop.f32.mrb[14].mxu1 }
 0x1c9   : > { %907 = vrot.lane.b32.xlu1 %v1772_v61, %s1527_s29  ;;  %909 = vrot.lane.b32.xlu0 %v1783_v4, %s1527_s29  ;;  %v1816_v29 = vpop.f32.mrb[15].mxu0  ;;  %v800_v30 = vpop.f32.mrb[15].mxu1 }
 0x1ca   : > { %1142 = vst [vmem:[%s1731_s28 + $0xf8] sm:$0xff] %v800_v30  ;;  %v814_v30 = vld [vmem:[%s1846_s11 + $0x18] sm:$0xff] }
 0x1cd   : > { %838 = vrot.lane.b32.xlu1 %v1786_v9, %s1527_s29  ;;  %840 = vrot.lane.b32.xlu0 %v1797_v16, %s1527_s29 }
 0x1d1   : > { %984 = vrot.lane.b32.xlu1 %v1788_v10, %s1527_s29  ;;  %913 = vrot.lane.b32.xlu0 %v1805_v21, %s1527_s29 }
 0x1d5   : > { %911 = vrot.lane.b32.xlu1 %v1794_v11, %s1527_s29  ;;  %986 = vrot.lane.b32.xlu0 %v1799_v17, %s1527_s29 }
 0x1d9   : > { %842 = vrot.lane.b32.xlu1 %v1808_v23, %s1527_s29 }
 0x1dd   : > { %915 = vrot.lane.b32.xlu1 %v1816_v29, %s1527_s29 }
 0x1e1   : > { %988 = vrot.lane.b32.xlu1 %v1810_v27, %s1527_s29 }
 0x21f   : > { %v829_v0 = vpop.permute.xlu0 %828 }
 0x220   : > { %v844_v33 = vmul.f32 %v829_v0, %v811_v32 }
 0x222   : > { %v852_v35 = vadd.f32 %v844_v33, %v820_v1  ;;  %v823_v1 = vmul.f32 %v806_v62, %v1764_v59 }
 0x223   : > { %v831_v2 = vpop.permute.xlu1 %830  ;;  %v975_v5 = vpop.permute.xlu0 %974 }
 0x224   : > { %v873_v37 = vmul.f32 0.088388346, %v852_v35  ;;  %v845_v38 = vmul.f32 %v831_v2, %v812_v8  ;;  %v990_v13 = vmul.f32 %v975_v5, %v811_v32 }
 0x226   : > { %1111 = vst [vmem:[%s1731_s28] sm:$0xff] %v873_v37  ;;  %v853_v39 = vadd.f32 %v845_v38, %v821_v7  ;;  %v998_v40 = vadd.f32 %v990_v13, %v966_v36  ;;  %v969_v7 = vmul.f32 %v806_v62, %v1766_v60  ;;  %v970_v37 = vmul.f32 %v807_v6, %v1777_v3 }
 0x227   : > { %v977_v41 = vpop.permute.xlu1 %976  ;;  %v902_v42 = vpop.permute.xlu0 %901  ;;  %v897_v3 = vmul.f32 %v807_v6, %v1783_v4 }
 0x228   : > { %v874_v43 = vmul.f32 0.088388346, %v853_v39  ;;  %1113 = vst [vmem:[%s1731_s28 + $0x10] sm:$0xff] %v998_v40  ;;  %v991_v44 = vmul.f32 %v977_v41, %v812_v8  ;;  %v917_v14 = vmul.f32 %v902_v42, %v811_v32 }
 0x22a   : > { %1115 = vst [vmem:[%s1731_s28 + $0x20] sm:$0xff] %v874_v43  ;;  %v999_v46 = vadd.f32 %v991_v44, %v967_v18  ;;  %v925_v19 = vadd.f32 %v917_v14, %v893_v12  ;;  %v896_v18 = vmul.f32 %v806_v62, %v1772_v61  ;;  %v808_v43 = vld [vmem:[%s1841_s8 + $0x28] sm:$0xff]  ;;  %v809_v44 = vld [vmem:[%s1841_s8 + $0x30] sm:$0xff] }
 0x22b   : > { %v904_v25 = vpop.permute.xlu1 %903  ;;  %v979_v48 = vpop.permute.xlu0 %978 }
 0x22c   : > { %1117 = vst [vmem:[%s1731_s28 + $0x30] sm:$0xff] %v999_v46  ;;  %v946_v26 = vmul.f32 0.088388346, %v925_v19  ;;  %v918_v28 = vmul.f32 %v904_v25, %v812_v8  ;;  %v992_v49 = vmul.f32 %v979_v48, %v813_v20  ;;  %v817_v46 = vld [vmem:[%s1846_s11 + $0x30] sm:$0xff]  ;;  %v825_v25 = vmul.f32 %v808_v43, %v1786_v9 }
 0x22d   : > { %v826_v48 = vmul.f32 %v809_v44, %v1797_v16 }
 0x22e   : > { %1112 = vst [vmem:[%s1731_s28 + $0x8] sm:$0xff] %v946_v26  ;;  %v926_v50 = vadd.f32 %v918_v28, %v894_v47  ;;  %v1000_v51 = vadd.f32 %v992_v49, %v968_v24 }
 0x22f   : > { %v833_v53 = vpop.permute.xlu1 %832  ;;  %v906_v54 = vpop.permute.xlu0 %905 }
 0x230   : > { %v947_v15 = vmul.f32 0.088388346, %v926_v50  ;;  %1121 = vst [vmem:[%s1731_s28 + $0x50] sm:$0xff] %v1000_v51  ;;  %v846_v55 = vmul.f32 %v833_v53, %v813_v20  ;;  %v919_v22 = vmul.f32 %v906_v54, %v813_v20  ;;  %v816_v20 = vld [vmem:[%s1846_s11 + $0x28] sm:$0xff]  ;;  %v899_v53 = vmul.f32 %v809_v44, %v1805_v21 }
 0x231   : > { %v972_v21 = vmul.f32 %v809_v44, %v1799_v17 }
 0x232   : > { %1116 = vst [vmem:[%s1731_s28 + $0x28] sm:$0xff] %v947_v15  ;;  %v854_v32 = vadd.f32 %v846_v55, %v822_v52  ;;  %v927_v0 = vadd.f32 %v919_v22, %v895_v58  ;;  %v971_v52 = vmul.f32 %v808_v43, %v1788_v10  ;;  %v898_v22 = vmul.f32 %v808_v43, %v1794_v11 }
 0x233   : > { %v835_v33 = vpop.permute.xlu1 %834  ;;  %v837_v34 = vpop.permute.xlu0 %836 }
 0x234   : > { %v875_v57 = vmul.f32 0.088388346, %v854_v32  ;;  %v948_v8 = vmul.f32 0.088388346, %v927_v0  ;;  %v847_v35 = vmul.f32 %v835_v33, %v814_v30  ;;  %v848_v36 = vmul.f32 %v837_v34, %v815_v31 }
 0x236   : > { %1119 = vst [vmem:[%s1731_s28 + $0x40] sm:$0xff] %v875_v57  ;;  %1120 = vst [vmem:[%s1731_s28 + $0x48] sm:$0xff] %v948_v8  ;;  %v855_v2 = vadd.f32 %v847_v35, %v823_v1  ;;  %v856_v5 = vadd.f32 %v848_v36, %v824_v56  ;;  %v810_v1 = vld [vmem:[%s1841_s8 + $0x38] sm:$0xff] }
 0x237   : > { %v981_v59 = vpop.permute.xlu1 %980  ;;  %v983_v63 = vpop.permute.xlu0 %982  ;;  %v818_v56 = vld [vmem:[%s1846_s11 + $0x38] sm:$0xff]  ;;  %v827_v8 = vmul.f32 %v810_v1, %v1808_v23 }
 0x238   : > { %v876_v38 = vmul.f32 0.088388346, %v855_v2  ;;  %v877_v13 = vmul.f32 0.088388346, %v856_v5  ;;  %v993_v39 = vmul.f32 %v981_v59, %v814_v30  ;;  %v994_v40 = vmul.f32 %v983_v63, %v815_v31 }
 0x239   : > { %v900_v2 = vmul.f32 %v810_v1, %v1816_v29  ;;  %v973_v63 = vmul.f32 %v810_v1, %v1810_v27 }
 0x23a   : > { %1123 = vst [vmem:[%s1731_s28 + $0x60] sm:$0xff] %v876_v38  ;;  %1127 = vst [vmem:[%s1731_s28 + $0x80] sm:$0xff] %v877_v13  ;;  %v1001_v12 = vadd.f32 %v993_v39, %v969_v7  ;;  %v1002_v41 = vadd.f32 %v994_v40, %v970_v37 }
 0x23b   : > { %v908_v42 = vpop.permute.xlu1 %907  ;;  %v910_v60 = vpop.permute.xlu0 %909 }
 0x23c   : > { %1125 = vst [vmem:[%s1731_s28 + $0x70] sm:$0xff] %v1001_v12  ;;  %1129 = vst [vmem:[%s1731_s28 + $0x90] sm:$0xff] %v1002_v41  ;;  %v920_v14 = vmul.f32 %v908_v42, %v814_v30  ;;  %v921_v45 = vmul.f32 %v910_v60, %v815_v31 }
 0x23e   : > { %v928_v19 = vadd.f32 %v920_v14, %v896_v18  ;;  %v929_v47 = vadd.f32 %v921_v45, %v897_v3 }
 0x23f   : > { %v839_v24 = vpop.permute.xlu1 %838  ;;  %v841_v61 = vpop.permute.xlu0 %840 }
 0x240   : > { %v949_v26 = vmul.f32 0.088388346, %v928_v19  ;;  %v950_v4 = vmul.f32 0.088388346, %v929_v47  ;;  %v849_v28 = vmul.f32 %v839_v24, %v816_v20  ;;  %v850_v49 = vmul.f32 %v841_v61, %v817_v46 }
 0x242   : > { %1124 = vst [vmem:[%s1731_s28 + $0x68] sm:$0xff] %v949_v26  ;;  %1128 = vst [vmem:[%s1731_s28 + $0x88] sm:$0xff] %v950_v4  ;;  %v857_v50 = vadd.f32 %v849_v28, %v825_v25  ;;  %v858_v51 = vadd.f32 %v850_v49, %v826_v48 }
 0x243   : > { %v985_v9 = vpop.permute.xlu1 %984  ;;  %v914_v54 = vpop.permute.xlu0 %913 }
 0x244   : > { %v878_v16 = vmul.f32 0.088388346, %v857_v50  ;;  %v879_v58 = vmul.f32 0.088388346, %v858_v51  ;;  %v995_v62 = vmul.f32 %v985_v9, %v816_v20  ;;  %v923_v6 = vmul.f32 %v914_v54, %v817_v46 }
 0x246   : > { %1131 = vst [vmem:[%s1731_s28 + $0xa0] sm:$0xff] %v878_v16  ;;  %1135 = vst [vmem:[%s1731_s28 + $0xc0] sm:$0xff] %v879_v58  ;;  %v1003_v15 = vadd.f32 %v995_v62, %v971_v52  ;;  %v931_v55 = vadd.f32 %v923_v6, %v899_v53 }
 0x247   : > { %v912_v10 = vpop.permute.xlu1 %911  ;;  %v987_v30 = vpop.permute.xlu0 %986 }
 0x248   : > { %1133 = vst [vmem:[%s1731_s28 + $0xb0] sm:$0xff] %v1003_v15  ;;  %v952_v31 = vmul.f32 0.088388346, %v931_v55  ;;  %v922_v32 = vmul.f32 %v912_v10, %v816_v20  ;;  %v996_v0 = vmul.f32 %v987_v30, %v817_v46 }
 0x24a   : > { %1136 = vst [vmem:[%s1731_s28 + $0xc8] sm:$0xff] %v952_v31  ;;  %v930_v33 = vadd.f32 %v922_v32, %v898_v22  ;;  %v1004_v34 = vadd.f32 %v996_v0, %v972_v21 }
 0x24b   : > { %v843_v57 = vpop.permute.xlu1 %842 }
 0x24c   : > { %v951_v11 = vmul.f32 0.088388346, %v930_v33  ;;  %1137 = vst [vmem:[%s1731_s28 + $0xd0] sm:$0xff] %v1004_v34  ;;  %v851_v35 = vmul.f32 %v843_v57, %v818_v56 }
 0x24e   : > { %1132 = vst [vmem:[%s1731_s28 + $0xa8] sm:$0xff] %v951_v11  ;;  %v859_v17 = vadd.f32 %v851_v35, %v827_v8 }
 0x24f   : > { %v916_v36 = vpop.permute.xlu1 %915 }
 0x250   : > { %v880_v5 = vmul.f32 0.088388346, %v859_v17  ;;  %v924_v7 = vmul.f32 %v916_v36, %v818_v56 }
 0x252   : > { %1139 = vst [vmem:[%s1731_s28 + $0xe0] sm:$0xff] %v880_v5  ;;  %v932_v37 = vadd.f32 %v924_v7, %v900_v2 }
 0x253   : > { %v989_v59 = vpop.permute.xlu1 %988 }
 0x254   : > { %v953_v38 = vmul.f32 0.088388346, %v932_v37  ;;  %v997_v13 = vmul.f32 %v989_v59, %v818_v56 }
 0x256   : > { %1140 = vst [vmem:[%s1731_s28 + $0xe8] sm:$0xff] %v953_v38  ;;  %v1005_v23 = vadd.f32 %v997_v13, %v973_v63 }
 0x258   : > { %1141 = vst [vmem:[%s1731_s28 + $0xf0] sm:$0xff] %v1005_v23 }
 0x259 PF: > { %s16_s20 = sadd.s32 1, %s1522_s20   ;;  %s1935_s18 = smov %s1518_s19 }
 0x25a   : > { %p13_p4 = scmp.ge.s32.totalorder %s16_s20, 4   ;;  %s1936_s19 = smov %s1938_s22 }
 0x25c   :  { %15 = sbr.rel (!%p13_p4) target bundleno = 2 (0x2), region = 82 }
 0x263   :  { %1176 = vsyncpa [#allocation3], 1 }
 0x264   :  { %1178 = vsyncpa [#allocation3 + $0x1], 1 }

// kernel: transformer_block_forward.5
= control target key start
LH: loop header
LB: loop body
LE: loop exit
PB: predicated region body
PF: predicated region fallthrough
CT: control target
= control target key end

     0   :  { %s1755_s0 = inlined_call_operand.vmem [shape: s32[10], index: 0, kind: input, shape index: {}]   ;;  %s1756_s2 = inlined_call_operand.vmem [shape: f32[2,64,512], index: 2, kind: input, shape index: {}, may-alias: {2,3,4}]   ;;  %s1757_s3 = inlined_call_operand.vmem [shape: f32[2,64,512], index: 3, kind: input, shape index: {}, may-alias: {2,3,4}]   ;;  %s1758_s4 = inlined_call_operand.vmem [shape: f32[2,64,512], index: 4, kind: input, shape index: {}, may-alias: {2,3,4}]   ;;  %s1759_s5 = inlined_call_operand.vmem [shape: f32[2,64,256], index: 5, kind: output, shape index: {}]   ;;  %s1760_s1 = inlined_call_operand.vmem [shape: s32[10], index: 1, kind: input, shape index: {}]  }
   0x1   :  { %1765 = sst [smem:[#allocation16_spill]] %s1756_s2  ;;  %s10_s20 = sshll.u32 %s1755_s0, 4  ;;  %s11_s20 = int_to_ptr.vmem [resolvable:$true] %s10_s20 }
   0x2   :  { %1766 = sst [smem:[#allocation17_spill]] %s1757_s3  ;;  %s14_s23 = sshll.u32 %s1760_s1, 4  ;;  %s15_s23 = int_to_ptr.vmem [resolvable:$true] %s14_s23 }
   0x3   :  { %1767 = sst [smem:[#allocation18_spill]] %s1759_s5  ;;  %s1350_s24 = scalar_lea.vmem %s11_s20, 16 }
   0x4   :  { %p1351_p0 = scmp.ne.s32.totalorder %s11_s20, %s1350_s24  ;;  %p1355_p1 = scmp.lt.s32.totalorder %s11_s20, %s11_s20 }
   0x5   :  { %p1356_p2 = scmp.lt.s32.totalorder %s1350_s24, %s1350_s24 }
   0x7   :  { %p1357_p3 = por %p1356_p2, %p1355_p1 }
   0x9   :  { %p1358_p4 = pnand %p1357_p3, %p1351_p0 }
   0xb   :  { %1361 = shalt.err (!%p1358_p4)  }
   0xc   :  { %s1464_s25 = smov [#allocation6]   ;;  %s1362_s26 = scalar_lea.vmem %s15_s23, 16 }
   0xd   :  { %13 = dma.vmem_to_smem %s11_s20, 16, %s1464_s25, [#allocation5] }
   0xe   :  { %p1363_p5 = scmp.ne.s32.totalorder %s15_s23, %s1362_s26  ;;  %p1367_p6 = scmp.lt.s32.totalorder %s15_s23, %s15_s23 }
   0xf   :  { %p1368_p7 = scmp.lt.s32.totalorder %s1362_s26, %s1362_s26 }
  0x11   :  { %p1369_p8 = por %p1368_p7, %p1367_p6 }
  0x13   :  { %p1370_p9 = pnand %p1369_p8, %p1363_p5 }
  0x15   :  { %1373 = shalt.err (!%p1370_p9)  }
  0x16   :  { %s1465_s0 = smov [#allocation7]  }
  0x17   :  { %17 = dma.vmem_to_smem %s15_s23, 16, %s1465_s0, [#allocation5] }
  0x18   :  { %1418 = dma.done.wait [#allocation5], 32 }
  0x19   :  { %1419 = vsyncadd [#allocation5], 4294967264 }
  0x1a   :  { %19 = sfence }
  0x1b   :  { %s1506_s1 = smov 0   ;;  %s1508_s27 = smov 0  }
  0x1c   :  { %s1510_s28 = smov 0   ;;  %s1512_s29 = smov 0  }
  0x1d   :  { %s1514_s30 = smov 0   ;;  %s1516_s6 = smov 0  }
  0x1e   :  { %s1518_s7 = smov 0   ;;  %s1520_s8 = smov 0  }
  0x1f   :  { %s1522_s9 = smov 0   ;;  %s1524_s10 = smov 0  }
  0x20   :  { %s1526_s11 = smov 0  }
  0x21 LB: > { %1768 = sst [smem:[#allocation12_spill]] %s1430_s28  ;;  %s37_s12 = sadd.s32 1, %s1454_s9  ;;  %s1462_s11 = sphi %s1526_s11, %s25_s11   ;;  %s1458_s10 = sphi %s1524_s10, %s1791_s10   ;;  %s1454_s9 = sphi %s1522_s9, %s1790_s9   ;;  %s1450_s8 = sphi %s1520_s8, %s1789_s8   ;;  %s1446_s7 = sphi %s1518_s7, %s1788_s7   ;;  %s1442_s6 = sphi %s1516_s6, %s1787_s6   ;;  %s1438_s30 = sphi %s1514_s30, %s1786_s30   ;;  %s1434_s29 = sphi %s1512_s29, %s1785_s29   ;;  %s1430_s28 = sphi %s1510_s28, %s1784_s28   ;;  %s1426_s27 = sphi %s1508_s27, %s1783_s27   ;;  %s1422_s1 = sphi %s1506_s1, %s1782_s1  }
  0x22   : > { %1769 = sst [smem:[#allocation13_spill]] %s1446_s7  ;;  %p38_p10 = scmp.ge.s32.totalorder %s37_s12, 10 }
  0x23   : > { %1770 = sst [smem:[#allocation14_spill]] %s1450_s8  ;;  %s44_s13 = sadd.s32 1, %s1458_s10 }
  0x24   : > { %s48_s14 = sld [smem:[#allocation6 + %s1454_s9]]  ;;  %p64_p11 = scmp.ne.s32.totalorder %s1442_s6, %s1438_s30 }
  0x25   : > { %s1793_s12 = smov (%p38_p10, %s37_s12), 0  ;;  %s1795_s13 = smov (!%p38_p10, %s44_s13), %s1458_s10 }
  0x26   : > { %s49_s15 = sld [smem:[#allocation6 + %s1793_s12]]  ;;  %p65_p12 = scmp.eq.s32.totalorder %s1462_s11, 0 }
  0x27   : > { %p46_p13 = scmp.ge.s32.totalorder %s1795_s13, 2  ;;  %s80_s16 = sld [smem:[#allocation7 + %s1454_s9]] }
  0x28   : > { %p1574_p0 = por %p65_p12, %p64_p11  ;;  %s82_s18 = sld [smem:[#allocation7 + %s1793_s12]] }
  0x29   : > { %s1797_s13 = smov (%p46_p13, %s1795_s13), 0  ;;  %s57_s19 = sadd.s32 1, %s1442_s6 }
  0x2a   : > { %1772 = sst [smem:[#allocation15_spill]] %s1797_s13  ;;  %p98_p1 = scmp.ne.s32.totalorder %s1434_s29, %s1430_s28 }
  0x2b   : > { %s50_s20 = ssub.s32 %s1458_s10, %s1797_s13  ;;  %s114_s21 = sld [smem:[#allocation7 + %s1454_s9]] }
  0x2c   : > { %s51_s22 = ssub.s32 %s48_s14, %s49_s15  ;;  %p1589_p2 = por %p98_p1, %p65_p12 }
  0x2d   : > { %s52_s24 = sor.u32 %s51_s22, %s50_s20  ;;  %s116_s25 = sld [smem:[#allocation7 + %s1793_s12]] }
  0x2e   : > { %p55_p3 = scmp.eq.s32.totalorder %s52_s24, 0  ;;  %s85_s26 = ssub.s32 %s80_s16, %s82_s18 }
  0x2f   : > { %s86_s0 = sor.u32 %s85_s26, %s50_s20  ;;  %s91_s5 = sadd.s32 1, %s1434_s29 }
  0x30   : > { %s1596_s8 = scalar_select %p55_p3, %s1442_s6, %s57_s19  }
  0x31   : > { %p89_p4 = scmp.eq.s32.totalorder %s86_s0, 0  ;;  %p132_p5 = scmp.ne.s32.totalorder %s1426_s27, %s1422_s1 }
  0x32   : > { %s125_s28 = sadd.s32 1, %s1426_s27  ;;  %p1131_p8 = scmp.ge.s32.totalorder %s1462_s11, 20 }
  0x33   : > { %s1601_s13 = scalar_select %p89_p4, %s1434_s29, %s91_s5  }
  0x34   : > { %s119_s7 = ssub.s32 %s114_s21, %s116_s25  ;;  %p1605_p6 = por %p132_p5, %p65_p12 }
  0x35   : > { %s120_s15 = sor.u32 %s119_s7, %s50_s20  ;;  %190 = sbr.rel (%p1131_p8) target bundleno = 99 (0x63), region = 16 }
  0x36   : > { %p123_p7 = scmp.eq.s32.totalorder %s120_s15, 0 }
  0x38   : > { %s1611_s22 = scalar_select %p123_p7, %s1426_s27, %s125_s28  }
  0x3c   : > { %193 = sbr.rel (!%p1574_p0) target bundleno = 73 (0x49), region = 20  ;;  %s198_s5 = sld [smem:[#allocation6 + %s1454_s9]] (%p1574_p0) }
  0x3d   : > { %s195_s16 = sand.u32 (%p1574_p0), 1, %s1442_s6   ;;  %s1135_s18 = sshll.u32 (%p1574_p0), %s1458_s10, 5 }
  0x3e   : > { %s1132_s19 = sshll.u32 (%p1574_p0), %s195_s16, 5  ;;  %s1775_s2 = sld [smem:[#allocation16_spill]] (%p1574_p0) }
  0x3f   : > { %s197_s26 = scalar_lea.vmem (%p1574_p0), [#allocation8], %s1132_s19 }
  0x42   : > { %s1167_s21 = sshll.u32 (%p1574_p0), %s198_s5, 3 }
  0x43   : > { %s204_s24 = sadd.s32 %s1167_s21, %s1135_s18 }
  0x44   : > { %s1136_s7 = sshll.u32 %s204_s24, 3 }
  0x45   : > { %s206_s28 = scalar_lea.vmem %s1775_s2, %s1136_s7 }
  0x46   : > { %v219_v0 = vld [vmem:[%s206_s28] sm:$0xff]  ;;  %v221_v1 = vld [vmem:[%s206_s28 + $0x8] sm:$0xff] }
  0x47   : > { %v223_v2 = vld [vmem:[%s206_s28 + $0x20] sm:$0xff]  ;;  %220 = vst [vmem:[%s197_s26] sm:$0xff] %v219_v0  ;;  %222 = vst [vmem:[%s197_s26 + $0x8] sm:$0xff] %v221_v1  ;;  %v225_v3 = vld [vmem:[%s206_s28 + $0x28] sm:$0xff] }
  0x48   : > { %224 = vst [vmem:[%s197_s26 + $0x10] sm:$0xff] %v223_v2  ;;  %226 = vst [vmem:[%s197_s26 + $0x18] sm:$0xff] %v225_v3 }
  0x49 PF: > { %232 = sbr.rel (!%p1589_p2) target bundleno = 86 (0x56), region = 43  ;;  %s237_s17 = sld [smem:[#allocation7 + %s1454_s9]] (%p1589_p2) }
  0x4a   : > { %s234_s0 = sand.u32 (%p1589_p2), 1, %s1434_s29   ;;  %s1139_s15 = sshll.u32 (%p1589_p2), %s1458_s10, 5 }
  0x4b   : > { %s1137_s5 = sshll.u32 (%p1589_p2), %s234_s0, 4  ;;  %s1776_s3 = sld [smem:[#allocation17_spill]] (%p1589_p2) }
  0x4c   : > { %s236_s20 = scalar_lea.vmem (%p1589_p2), [#allocation9], %s1137_s5 }
  0x4f   : > { %s1138_s16 = sshll.u32 (%p1589_p2), %s237_s17, 3 }
  0x50   : > { %s1020_s18 = sadd.s32 %s1139_s15, %s1138_s16 }
  0x51   : > { %s1140_s21 = sshll.u32 %s1020_s18, 3 }
  0x52   : > { %s1022_s7 = scalar_lea.vmem %s1776_s3, %s1140_s21 }
  0x53   : > { %v1141_v4 = vld [vmem:[%s1022_s7 + $0x10] sm:$0xff] }
  0x54   : > { %v1142_v5 = vld [vmem:[%s1022_s7 + $0x30] sm:$0xff]  ;;  %276 = vst [vmem:[%s236_s20] sm:$0xff] %v1141_v4 }
  0x55   : > { %278 = vst [vmem:[%s236_s20 + $0x8] sm:$0xff] %v1142_v5 }
  0x56 PF: > { %284 = sbr.rel (!%p1605_p6) target bundleno = 99 (0x63), region = 81  ;;  %s289_s23 = sld [smem:[#allocation7 + %s1454_s9]] (%p1605_p6) }
  0x57   : > { %s286_s25 = sand.u32 (%p1605_p6), 1, %s1426_s27   ;;  %s1145_s28 = sshll.u32 (%p1605_p6), %s1458_s10, 5 }
  0x58   : > { %s1143_s26 = sshll.u32 (%p1605_p6), %s286_s25, 4 }
  0x59   : > { %s288_s21 = scalar_lea.vmem (%p1605_p6), [#allocation10], %s1143_s26 }
  0x5c   : > { %s1144_s17 = sshll.u32 (%p1605_p6), %s289_s23, 3 }
  0x5d   : > { %s1029_s0 = sadd.s32 %s1145_s28, %s1144_s17 }
  0x5e   : > { %s1146_s15 = sshll.u32 %s1029_s0, 3 }
  0x5f   : > { %s1031_s5 = scalar_lea.vmem %s1758_s4, %s1146_s15 }
  0x60   : > { %v1147_v6 = vld [vmem:[%s1031_s5 + $0x18] sm:$0xff] }
  0x61   : > { %v1148_v7 = vld [vmem:[%s1031_s5 + $0x38] sm:$0xff]  ;;  %328 = vst [vmem:[%s288_s21] sm:$0xff] %v1147_v6 }
  0x62   : > { %330 = vst [vmem:[%s288_s21 + $0x8] sm:$0xff] %v1148_v7 }
  0x63 PF: > { %p1149_p9 = scmp.ge.s32.totalorder %s1462_s11, 1  ;;  %p335_p10 = scmp.lt.s32.totalorder %s1462_s11, 21 }
  0x65   : > { %p336_p11 = pnand %p1149_p9, %p335_p10 }
  0x66   : > { %s1777_s14 = sld [smem:[#allocation12_spill]] (!%p336_p11)  ;;  %s1778_s19 = sld [smem:[#allocation13_spill]] (!%p336_p11) }
  0x67   : > { %339 = sbr.rel (%p336_p11) target bundleno = 1456 (0x5b0), region = 119  ;;  %s1779_s24 = sld [smem:[#allocation14_spill]] (!%p336_p11) }
  0x68   : > { %s342_s7 = sand.u32 (!%p336_p11), 1, %s1438_s30   ;;  %s356_s28 = sand.u32 (!%p336_p11), 1, %s1422_s1  }
  0x69   : > { %s1150_s23 = sshll.u32 (!%p336_p11), %s342_s7, 5  ;;  %s1646_s17 = sshll.u32 (!%p336_p11), %s356_s28, 4 }
  0x6a   : > { %s1780_s7 = sld [smem:[#allocation18_spill]] (!%p336_p11)  ;;  %s1661_s28 = scalar_lea.vmem (!%p336_p11), [#allocation8], %s1150_s23 }
  0x6b   : > { %s358_s3 = scalar_lea.vmem (!%p336_p11), [#allocation10], %s1646_s17 }
  0x6c   : > { %s349_s20 = sand.u32 (!%p336_p11), 1, %s1777_s14   ;;  %s406_s26 = sld [smem:[#allocation6 + %s1778_s19]] (!%p336_p11) }
  0x6d   : > { %s1642_s25 = sshll.u32 (!%p336_p11), %s349_s20, 4  ;;  %p409_p12 = scmp.lt.s32.totalorder (!%p336_p11), %s1779_s24, 1 }
  0x6e   : > { %s1650_s0 = sld [smem:[#allocation6 + %s1778_s19]]  ;;  %s351_s2 = scalar_lea.vmem [#allocation9], %s1642_s25 }
  0x6f   : > { %s1799_s24 = smov (!%p409_p12, %s1779_s24), 1  ;;  %s1654_s15 = sld [smem:[#allocation7 + %s1778_s19]] }
  0x70   : > { %s1155_s18 = sshll.u32 %s1799_s24, 4 }
  0x72   : > { %s1153_s16 = sshll.u32 %s406_s26, 1 }
  0x73   : > { %p411_p13 = scmp.lt.s32.totalorder %s1153_s16, 7 }
  0x75   : > { %s1801_s16 = smov (!%p411_p13, %s1153_s16), 7  ;;  %p1157_p0 = scmp.ne.s32.totalorder %s1654_s15, 0 }
  0x76   : > { %s1154_s30 = sshll.u32 %s1801_s16, 1  ;;  %vm430_vm0 = vcmask (!%p1157_p0), 7168   ;;  %v1466_v8 = vmov (!%p1157_p0), -1e+30   ;;  %v1467_v9 = vmov (!%p1157_p0), 0.0  }
  0x77   : > { %s418_s5 = sadd.s32 %s1155_s18, %s1154_s30  ;;  %429 = sbr.rel (%p1157_p0) target bundleno = 126 (0x7e), region = 135  ;;  %431 = vst.msk [vmem:[#allocation2] sm:$0xff] (!%p1157_p0), %vm430_vm0, %v1466_v8  ;;  %432 = vst.msk [vmem:[#allocation2 + $0x8] sm:$0xff] (!%p1157_p0), %vm430_vm0, %v1466_v8 }
  0x78   : > { %s1156_s21 = sshll.u32 %s418_s5, 3  ;;  %433 = vst.msk [vmem:[#allocation2 + $0x10] sm:$0xff] (!%p1157_p0), %vm430_vm0, %v1466_v8  ;;  %434 = vst.msk [vmem:[#allocation2 + $0x18] sm:$0xff] (!%p1157_p0), %vm430_vm0, %v1466_v8 }
  0x79   : > { %s1659_s20 = scalar_lea.vmem %s1780_s7, %s1156_s21  ;;  %435 = vst.msk [vmem:[#allocation3] sm:$0xff] (!%p1157_p0), %vm430_vm0, %v1467_v9  ;;  %436 = vst.msk [vmem:[#allocation3 + $0x8] sm:$0xff] (!%p1157_p0), %vm430_vm0, %v1467_v9 }
  0x7a   : > { %437 = vst.msk [vmem:[#allocation3 + $0x10] sm:$0xff] (!%p1157_p0), %vm430_vm0, %v1467_v9  ;;  %438 = vst.msk [vmem:[#allocation3 + $0x18] sm:$0xff] (!%p1157_p0), %vm430_vm0, %v1467_v9 }
  0x7b   : > { %439 = vst [vmem:[#allocation4] sm:$0xff] (!%p1157_p0), %v1467_v9  ;;  %440 = vst [vmem:[#allocation4 + $0x8] sm:$0xff] (!%p1157_p0), %v1467_v9 }
  0x7c   : > { %441 = vst [vmem:[#allocation4 + $0x10] sm:$0xff] (!%p1157_p0), %v1467_v9  ;;  %442 = vst [vmem:[#allocation4 + $0x18] sm:$0xff] (!%p1157_p0), %v1467_v9 }
  0x7e PF: > { %v443_v10 = vld [vmem:[%s351_s2] sm:$0xff]  ;;  %v444_v11 = vld [vmem:[%s351_s2 + $0x8] sm:$0xff]  ;;  %v452_v15 = vlaneseq  ;;  %s1158_s19 = sshll.u32 %s1650_s0, 4  ;;  %s1159_s24 = sshll.u32 %s1654_s15, 4  ;;  %vm544_vm2 = vcmask 130048   ;;  %v1468_v30 = vmov 0  }
  0x7f   : > { %v447_v12 = vld [vmem:[%s1661_s28] sm:$0xff]  ;;  %v1667_v13 = vpack.c.bf16 %v444_v11, %v443_v10  ;;  %v449_v14 = vld [vmem:[%s1661_s28 + $0x10] sm:$0xff]  ;;  %v455_v18 = vstv %s1158_s19  ;;  %v461_v19 = vstv %s1159_s24  ;;  %1322 = vset.pattern.permute.xlu1 %v1468_v30  ;;  %1323 = vset.pattern.permute.xlu0 %v1468_v30  ;;  %vm587_vm4 = vcmask 7168   ;;  %v543_v34 = vld [vmem:[#allocation2 + $0x8] sm:$0xff]  ;;  %p1164_p1 = scmp.ne.s32.totalorder %s1654_s15, %s1650_s0 }
  0x80   : > { %1188 = vmatprep.mubr.f32.mxu0 %v447_v12  ;;  %v453_v16 = vshrl.u32 %v452_v15, 7  ;;  %v460_v17 = vand.u32 127, %v452_v15  ;;  %v1678_v31 = vld [vmem:[#allocation2] sm:$0xff]  ;;  %v446_v40 = vld [vmem:[%s358_s3 + $0x8] sm:$0xff]  ;;  %v769_v61 = vld [vmem:[#allocation2 + $0x10] sm:$0xff] }
  0x81   : > { %1213 = vmatprep.subr.bf16.mxu0 %v1667_v13  ;;  %v445_v39 = vld [vmem:[%s358_s3] sm:$0xff]  ;;  %v448_v49 = vld [vmem:[%s1661_s28 + $0x8] sm:$0xff]  ;;  %v450_v51 = vld [vmem:[%s1661_s28 + $0x18] sm:$0xff] }
  0x82   : > { %1215 = vmatpush3.bf16.xpose.msra.mxu0 %v1667_v13  ;;  %v454_v20 = vadd.s32 8, %v453_v16  ;;  %v462_v21 = vadd.s32 %v461_v19, %v460_v17  ;;  %v456_v22 = vadd.s32 %v455_v18, %v453_v16  ;;  %v1216_v41 = vpack.c.bf16 %v446_v40, %v445_v39  ;;  %v770_v60 = vld [vmem:[#allocation2 + $0x18] sm:$0xff] }
  0x83   : > { %v803_v40 = vld [vmem:[#allocation3 + $0x18] sm:$0xff] }
  0x84   : > { %v457_v23 = vadd.s32 %v455_v18, %v454_v20  ;;  %vm463_vm1 = vcmp.ge.s32.totalorder %v456_v22, %v462_v21  ;;  %1217 = vmatprep.subr.bf16.mxu1 %v1216_v41  ;;  %1225 = vmatprep.subr.bf16.mxu0 %v1216_v41 }
  0x85   : > { %1219 = vmatpush3.bf16.msra.mxu1 %v1216_v41 }
  0x86   : > { %vm464_vm3 = vcmp.ge.s32.totalorder %v457_v23, %v462_v21  ;;  %1221 = vmatprep.subr.bf16.mxu1 %v1667_v13 }
  0x89   : > { %1189 = vmatmul.mubr.f32.vlgmr.msra.gmra.mrb[0].mxu0 %v449_v14 }
  0x8a   : > { %1227 = vmatpush3.bf16.msra.mxu0 %v1216_v41 }
 0x15c   : > { %v1190_v24 = vpop.f32.mrb[0].mxu0 }
 0x15d   : > { %v531_v25 = vpop.f32.mrb[1].mxu0  ;;  %v541_v28 = vsel %vm464_vm3, %v1190_v24, -1e+30  ;;  %v575_v24 = vld [vmem:[#allocation3] sm:$0xff] }
 0x15e   : > { %v540_v26 = vsel %vm463_vm1, %v531_v25, -1e+30  ;;  %v548_v29 = vsel %vm544_vm2, %v541_v28, -inf }
 0x15f   : > { %v545_v27 = vsel %vm544_vm2, %v540_v26, -inf }
 0x160   : > { %546 = vmax.xlane.f32.xlu0 %v545_v27  ;;  %v576_v27 = vld [vmem:[#allocation3 + $0x8] sm:$0xff] }
 0x164   : > { %549 = vmax.xlane.f32.xlu0 %v548_v29 }
 0x1ed   : > { %v547_v32 = vpop.xlane.xlu0 %546 }
 0x1ee   : > { %v551_v33 = vmax.f32 %v1678_v31, %v547_v32  ;;  %v590_v32 = vld [vmem:[#allocation4] sm:$0xff] }
 0x1f0   : > { %v553_v35 = vsub.f32 %v1678_v31, %v551_v33  ;;  %689 = vst.msk [vmem:[#allocation2] sm:$0xff] %vm587_vm4, %v551_v33  ;;  %561 = vperm.xlu1 %1322, %v551_v33   ;;  %v591_v33 = vld [vmem:[#allocation4 + $0x8] sm:$0xff] }
 0x1f1   : > { %v550_v36 = vpop.xlane.xlu0 %549 }
 0x1f2   : > { %v552_v37 = vmax.f32 %v543_v34, %v550_v36  ;;  %v555_v7 = vmul.f32 1.442695, %v553_v35 }
 0x1f4   : > { %v554_v38 = vsub.f32 %v543_v34, %v552_v37  ;;  %690 = vst.msk [vmem:[#allocation2 + $0x8] sm:$0xff] %vm587_vm4, %v552_v37  ;;  %566 = vperm.xlu1 %1322, %v552_v37  }
 0x1f6   : > { %v557_v5 = vmul.f32 1.442695, %v554_v38 }
 0x26f   : > { %v562_v42 = vpop.permute.xlu1 %561 }
 0x270   : > { %v569_v43 = vsub.f32 %v540_v26, %v562_v42 }
 0x272   : > { %v571_v44 = vmul.f32 1.442695, %v569_v43  ;;  %v802_v43 = vld [vmem:[#allocation3 + $0x10] sm:$0xff] }
 0x273   : > { %v567_v45 = vpop.permute.xlu1 %566 }
 0x274   : > { %1324 = vpow2.f32 %v571_v44  ;;  %v570_v46 = vsub.f32 %v541_v28, %v567_v45 }
 0x276   : > { %v573_v47 = vmul.f32 1.442695, %v570_v46 }
 0x278   : > { %1326 = vpow2.f32 %v573_v47 }
 0x279   : > { %1328 = vpow2.f32 %v557_v5 }
 0x27a   : > { %1330 = vpow2.f32 %v555_v7 }
 0x27e   : > { %v1325_v48 = vpop.eup %1324 }
 0x27f   : > { %1195 = vmatprep.mubr.msk.f32.mxu1 %vm544_vm2, %v1325_v48  ;;  %v579_v3 = vsel %vm544_vm2, %v1325_v48, 0.0  ;;  %v818_v48 = vld [vmem:[#allocation4 + $0x18] sm:$0xff] }
 0x282   : > { %v1327_v50 = vpop.eup %1326 }
 0x283   : > { %1196 = vmatmul.mubr.msk.f32.vlgmr.msra.gmra.mrb[0].mxu1 %vm544_vm2, %v1327_v50  ;;  %v582_v4 = vsel %vm544_vm2, %v1327_v50, 0.0  ;;  %v1329_v9 = vpop.eup %1328  ;;  %v817_v50 = vld [vmem:[#allocation4 + $0x10] sm:$0xff] }
 0x284   : > { %1223 = vmatpush3.bf16.xpose.msra.mxu1 %v1667_v13  ;;  %1202 = vmatprep.mubr.f32.mxu1 %v448_v49  ;;  %v1331_v10 = vpop.eup %1330  ;;  %v578_v29 = vmul.f32 %v1329_v9, %v576_v27 }
 0x285   : > { %v577_v25 = vmul.f32 %v1331_v10, %v575_v24 }
 0x28b   : > { %1203 = vmatmul.mubr.f32.vlgmr.msra.gmra.mrb[2].mxu1 %v450_v51 }
 0x356   : > { %v1694_v52 = vpop.f32.mrb[0].mxu1 }
 0x357   : > { %v1696_v53 = vpop.f32.mrb[1].mxu1 }
 0x35e   : > { %v1204_v54 = vpop.f32.mrb[2].mxu1 }
 0x35f   : > { %v767_v55 = vsel %vm464_vm3, %v1204_v54, -1e+30  ;;  %v757_v56 = vpop.f32.mrb[3].mxu1 }
 0x360   : > { %v766_v57 = vsel %vm463_vm1, %v757_v56, -1e+30  ;;  %v774_v58 = vsel %vm544_vm2, %v767_v55, -inf }
 0x361   : > { %775 = vmax.xlane.f32.xlu1 %v774_v58  ;;  %v771_v59 = vsel %vm544_vm2, %v766_v57, -inf }
 0x362   : > { %772 = vmax.xlane.f32.xlu0 %v771_v59 }
 0x3ee   : > { %v776_v62 = vpop.xlane.xlu1 %775 }
 0x3ef   : > { %v778_v63 = vmax.f32 %v770_v60, %v776_v62  ;;  %v773_v0 = vpop.xlane.xlu0 %772 }
 0x3f0   : > { %v777_v1 = vmax.f32 %v769_v61, %v773_v0 }
 0x3f1   : > { %v780_v2 = vsub.f32 %v770_v60, %v778_v63  ;;  %917 = vst.msk [vmem:[#allocation2 + $0x18] sm:$0xff] %vm587_vm4, %v778_v63  ;;  %792 = vperm.xlu1 %1322, %v778_v63  }
 0x3f2   : > { %916 = vst.msk [vmem:[#allocation2 + $0x10] sm:$0xff] %vm587_vm4, %v777_v1  ;;  %787 = vperm.xlu0 %1323, %v777_v1   ;;  %v779_v6 = vsub.f32 %v769_v61, %v777_v1  ;;  %v1469_v61 = vmov (!%p1164_p1), 0  }
 0x3f3   : > { %v783_v22 = vmul.f32 1.442695, %v780_v2 }
 0x3f4   : > { %v781_v8 = vmul.f32 1.442695, %v779_v6 }
 0x3f6   : > { %1332 = vpow2.f32 %v781_v8 }
 0x400   : > { %v1333_v11 = vpop.eup %1332 }
 0x401   : > { %v804_v45 = vmul.f32 %v1333_v11, %v802_v43 }
 0x411   : > { %580 = vadd.xlane.f32.xlu0 %v579_v3 }
 0x415   : > { %583 = vadd.xlane.f32.xlu1 %v582_v4 }
 0x426   : > { %599 = vperm.xlu1 %1322, %v1329_v9  }
 0x427   : > { %594 = vperm.xlu0 %1323, %v1331_v10  }
 0x42a   : > { %821 = vperm.xlu1 %1322, %v1333_v11  }
 0x42e   : > { %1341 = vset.pattern.permute.xlu1 (!%p1164_p1), %v1469_v61 }
 0x470   : > { %v793_v12 = vpop.permute.xlu1 %792 }
 0x471   : > { %v796_v13 = vsub.f32 %v767_v55, %v793_v12  ;;  %v788_v14 = vpop.permute.xlu0 %787 }
 0x472   : > { %v795_v15 = vsub.f32 %v766_v57, %v788_v14 }
 0x473   : > { %v799_v16 = vmul.f32 1.442695, %v796_v13 }
 0x474   : > { %v797_v17 = vmul.f32 1.442695, %v795_v15 }
 0x475   : > { %1334 = vpow2.f32 %v799_v16 }
 0x476   : > { %1336 = vpow2.f32 %v797_v17 }
 0x477   : > { %1338 = vpow2.f32 %v783_v22 }
 0x47f   : > { %v1335_v18 = vpop.eup %1334 }
 0x480   : > { %v1337_v19 = vpop.eup %1336  ;;  %v809_v20 = vsel %vm544_vm2, %v1335_v18, 0.0 }
 0x481   : > { %810 = vadd.xlane.f32.xlu0 %v809_v20  ;;  %1209 = vmatprep.mubr.msk.f32.mxu0 %vm544_vm2, %v1337_v19  ;;  %v806_v21 = vsel %vm544_vm2, %v1337_v19, 0.0  ;;  %v1339_v23 = vpop.eup %1338 }
 0x482   : > { %1210 = vmatmul.mubr.msk.f32.vlgmr.msra.gmra.mrb[2].mxu0 %vm544_vm2, %v1335_v18  ;;  %v805_v41 = vmul.f32 %v1339_v23, %v803_v40 }
 0x485   : > { %807 = vadd.xlane.f32.xlu0 %v806_v21 }
 0x49b   : > { %826 = vperm.xlu0 %1323, %v1339_v23  }
 0x49e   : > { %v581_v26 = vpop.xlane.xlu0 %580 }
 0x49f   : > { %v585_v28 = vadd.f32 %v581_v26, %v577_v25  ;;  %1340 = vset.pattern.permute.xlu0 (!%p1164_p1), %v1469_v61 }
 0x4a1   : > { %588 = vst.msk [vmem:[#allocation3] sm:$0xff] %vm587_vm4, %v585_v28 }
 0x4a2   : > { %v584_v30 = vpop.xlane.xlu1 %583 }
 0x4a3   : > { %v586_v31 = vadd.f32 %v584_v30, %v578_v29 }
 0x4a5   : > { %589 = vst.msk [vmem:[#allocation3 + $0x8] sm:$0xff] %vm587_vm4, %v586_v31 }
 0x4a6   : > { %v595_v34 = vpop.permute.xlu0 %594  ;;  %v600_v35 = vpop.permute.xlu1 %599 }
 0x4a7   : > { %v602_v36 = vmul.f32 %v595_v34, %v590_v32  ;;  %v603_v37 = vmul.f32 %v600_v35, %v591_v33 }
 0x4a8   : > { %v922_v59 = vld [vmem:[#allocation3] sm:$0xff] (!%p1164_p1) }
 0x4a9   : > { %v685_v38 = vadd.f32 %v1696_v53, %v602_v36  ;;  %v686_v39 = vadd.f32 %v1694_v52, %v603_v37 }
 0x4aa   : > { %v822_v51 = vpop.permute.xlu1 %821 }
 0x4ab   : > { %687 = vst [vmem:[#allocation4] sm:$0xff] %v685_v38  ;;  %688 = vst [vmem:[#allocation4 + $0x8] sm:$0xff] %v686_v39  ;;  %v829_v52 = vmul.f32 %v822_v51, %v817_v50 }
 0x4ac   : > { %v923_v62 = vld [vmem:[#allocation3 + $0x8] sm:$0xff] (!%p1164_p1) }
 0x4b2   : > { %v926_v4 = vld [vmem:[#allocation4] sm:$0xff] (!%p1164_p1)  ;;  %v927_v10 = vld [vmem:[#allocation4 + $0x8] sm:$0xff] (!%p1164_p1) }
 0x50e   : > { %v811_v42 = vpop.xlane.xlu0 %810 }
 0x50f   : > { %v813_v44 = vadd.f32 %v811_v42, %v805_v41 }
 0x511   : > { %815 = vst.msk [vmem:[#allocation3 + $0x18] sm:$0xff] %vm587_vm4, %v813_v44 }
 0x512   : > { %v808_v46 = vpop.xlane.xlu0 %807 }
 0x513   : > { %v812_v47 = vadd.f32 %v808_v46, %v804_v45 }
 0x515   : > { %814 = vst.msk [vmem:[#allocation3 + $0x10] sm:$0xff] %vm587_vm4, %v812_v47 }
 0x518   : > { %v941_v60 = vld [vmem:[#allocation3 + $0x18] sm:$0xff] (!%p1164_p1) }
 0x51a   : > { %v827_v49 = vpop.permute.xlu0 %826 }
 0x51b   : > { %v830_v53 = vmul.f32 %v827_v49, %v818_v48 }
 0x51c   : > { %v940_v58 = vld [vmem:[#allocation3 + $0x10] sm:$0xff] (!%p1164_p1) }
 0x51d   : > { %1342 = vrcp.f32 (!%p1164_p1), %v940_v58 }
 0x51e   : > { %1344 = vrcp.f32 (!%p1164_p1), %v922_v59 }
 0x51f   : > { %1346 = vrcp.f32 (!%p1164_p1), %v941_v60 }
 0x520   : > { %1348 = vrcp.f32 (!%p1164_p1), %v923_v62 }
 0x527   : > { %v1343_v63 = vpop.eup (!%p1164_p1), %1342 }
 0x528   : > { %v1345_v0 = vpop.eup (!%p1164_p1), %1344  ;;  %948 = vperm.xlu1 (!%p1164_p1), %1341, %v1343_v63  }
 0x529   : > { %v1347_v1 = vpop.eup (!%p1164_p1), %1346  ;;  %930 = vperm.xlu0 (!%p1164_p1), %1340, %v1345_v0  }
 0x52a   : > { %v1349_v2 = vpop.eup (!%p1164_p1), %1348 }
 0x52c   : > { %953 = vperm.xlu1 (!%p1164_p1), %1341, %v1347_v1  }
 0x52d   : > { %935 = vperm.xlu0 (!%p1164_p1), %1340, %v1349_v2  }
 0x553   : > { %921 = sbr.rel (%p1164_p1) target bundleno = 1456 (0x5b0), region = 139 }
 0x555   : > { %v1211_v54 = vpop.f32.mrb[2].mxu0 }
 0x556   : > { %v913_v55 = vadd.f32 %v1211_v54, %v830_v53  ;;  %v903_v56 = vpop.f32.mrb[3].mxu0 }
 0x557   : > { %v912_v57 = vadd.f32 %v903_v56, %v829_v52 }
 0x558   : > { %915 = vst [vmem:[#allocation4 + $0x18] sm:$0xff] %v913_v55 }
 0x559   : > { %914 = vst [vmem:[#allocation4 + $0x10] sm:$0xff] %v912_v57 }
 0x55f   : > { %v945_v9 = vld [vmem:[#allocation4 + $0x18] sm:$0xff] }
 0x560   : > { %v944_v3 = vld [vmem:[#allocation4 + $0x10] sm:$0xff] }
 0x5a7   : > { %v949_v5 = vpop.permute.xlu1 %948 }
 0x5a8   : > { %v956_v6 = vmul.f32 %v949_v5, %v944_v3  ;;  %v931_v7 = vpop.permute.xlu0 %930 }
 0x5a9   : > { %v938_v8 = vmul.f32 %v931_v7, %v926_v4 }
 0x5aa   : > { %959 = vst [vmem:[%s1659_s20 + $0x8] sm:$0xff] %v956_v6 }
 0x5ab   : > { %958 = vst [vmem:[%s1659_s20] sm:$0xff] %v938_v8  ;;  %v954_v11 = vpop.permute.xlu1 %953 }
 0x5ac   : > { %v957_v12 = vmul.f32 %v954_v11, %v945_v9  ;;  %v936_v13 = vpop.permute.xlu0 %935 }
 0x5ad   : > { %v939_v14 = vmul.f32 %v936_v13, %v927_v10 }
 0x5ae   : > { %961 = vst [vmem:[%s1659_s20 + $0x18] sm:$0xff] %v957_v12 }
 0x5af   : > { %960 = vst [vmem:[%s1659_s20 + $0x10] sm:$0xff] %v939_v14 }
 0x5b0 PF: > { %s25_s11 = sadd.s32 1, %s1462_s11   ;;  %s1781_s2 = sld [smem:[#allocation15_spill]] }
 0x5b1   : > { %p22_p2 = scmp.ge.s32.totalorder %s25_s11, 22   ;;  %s1782_s1 = smov %s1426_s27 }
 0x5b2   : > { %s1783_s27 = smov %s1611_s22  ;;  %s1784_s28 = smov %s1434_s29 }
 0x5b3   : > { %s1785_s29 = smov %s1601_s13  ;;  %s1786_s30 = smov %s1442_s6 }
 0x5b4   : > { %s1787_s6 = smov %s1596_s8  ;;  %s1788_s7 = smov %s1454_s9 }
 0x5b5   : > { %s1789_s8 = smov %s1458_s10  ;;  %s1790_s9 = smov %s1793_s12 }
 0x5b6   : > { %s1791_s10 = smov %s1781_s2  ;;  %24 = sbr.rel (!%p22_p2) target bundleno = 33 (0x21), region = 193 }

// kernel: transformer_block_forward.7
= control target key start
LH: loop header
LB: loop body
LE: loop exit
PB: predicated region body
PF: predicated region fallthrough
CT: control target
= control target key end

     0   :  { %s3165_s0 = inlined_call_operand.vmem [shape: f32[128,256], index: 0, kind: input, shape index: {}]   ;;  %s3166_s1 = inlined_call_operand.vmem [shape: f32[1,256], index: 1, kind: input, shape index: {}]   ;;  %s3167_s2 = inlined_call_operand.vmem [shape: f32[256,512], index: 2, kind: input, shape index: {}]   ;;  %s3168_s3 = inlined_call_operand.vmem [shape: f32[256,512], index: 3, kind: input, shape index: {}]   ;;  %s3169_s4 = inlined_call_operand.vmem [shape: f32[512,256], index: 4, kind: input, shape index: {}]   ;;  %s3170_s5 = inlined_call_operand.hbm [shape: f32[128,256], index: 5, kind: output, shape index: {}]  }
   0x1   :  { %3175 = sst [smem:[#allocation12_spill]] %s3167_s2 }
   0x2   :  { %3176 = sst [smem:[#allocation13_spill]] %s3168_s3 }
   0x3   :  { %10 = vsyncpa [#allocation7], 0 }
   0x4   :  { %12 = vsyncpa [#allocation7 + $0x1], 0  ;;  %s2278_s18 = smov 0   ;;  %s2280_s19 = smov 0  }
   0x5   :  { %s2282_s20 = smov 0   ;;  %s2284_s21 = smov 0  }
   0x6   :  { %s2286_s22 = smov 0   ;;  %s2288_s23 = smov 0  }
   0x7   :  { %s2290_s24 = smov 0   ;;  %s2292_s25 = smov 0  }
   0x8   :  { %s2294_s26 = smov 0   ;;  %s2296_s27 = smov 0  }
   0x9 LB: > { %3177 = sst [smem:[#allocation9_spill]] %s2238_s26  ;;  %s1688_s28 = sadd.s32 4294967295, %s2242_s27   ;;  %s2242_s27 = sphi %s2296_s27, %s18_s27   ;;  %s2238_s26 = sphi %s2294_s26, %s3188_s26   ;;  %s2234_s25 = sphi %s2292_s25, %s3195_s25   ;;  %s2230_s24 = sphi %s2290_s24, %s3186_s24   ;;  %s2226_s23 = sphi %s2288_s23, %s3194_s23   ;;  %s2222_s22 = sphi %s2286_s22, %s3193_s22   ;;  %s2218_s21 = sphi %s2284_s21, %s3192_s21   ;;  %s2214_s20 = sphi %s2282_s20, %s3191_s20   ;;  %s2210_s19 = sphi %s2280_s19, %s3190_s19   ;;  %s2206_s18 = sphi %s2278_s18, %s3189_s18  }
   0xa   : > { %s1689_s29 = sadd.s32 4294967294, %s2242_s27   ;;  %s27_s30 = sadd.s32 1, %s2234_s25 }
   0xb   : > { %s30_s6 = sadd.s32 1, %s2238_s26  ;;  %p28_p0 = scmp.ge.s32.totalorder %s27_s30, 2 }
   0xc   : > { %s84_s7 = sadd.s32 1, %s2222_s22  ;;  %p91_p1 = scmp.ne.s32.totalorder %s2222_s22, %s2218_s21 }
   0xd   : > { %p92_p2 = scmp.eq.s32.totalorder %s2242_s27, 0  ;;  %s3197_s30 = smov (%p28_p0, %s27_s30), 0 }
   0xe   : > { %3178 = sst [smem:[#allocation10_spill]] %s3197_s30  ;;  %s3199_s6 = smov (!%p28_p0, %s30_s6), %s2238_s26 }
   0xf   : > { %s81_s8 = ssub.s32 %s2234_s25, %s3197_s30  ;;  %p2341_p3 = por %p92_p2, %p91_p1 }
  0x10   : > { %p32_p4 = scmp.ge.s32.totalorder %s3199_s6, 2  ;;  %p82_p5 = scmp.eq.s32.totalorder %s81_s8, 0 }
  0x11   : > { %s162_s10 = sadd.s32 1, %s2214_s20  ;;  %p172_p6 = scmp.ne.s32.totalorder %s2214_s20, %s2210_s19 }
  0x12   : > { %s3201_s6 = smov (%p32_p4, %s3199_s6), 0  ;;  %p173_p7 = scmp.eq.s32.totalorder %s1688_s28, 3 }
  0x13   : > { %3180 = sst [smem:[#allocation11_spill]] %s3201_s6  ;;  %s159_s12 = ssub.s32 %s2238_s26, %s3201_s6 }
  0x14   : > { %s2351_s11 = scalar_select %p82_p5, %s2222_s22, %s84_s7  }
  0x15   : > { %p160_p8 = scmp.eq.s32.totalorder %s159_s12, 0  ;;  %p178_p9 = scmp.ne.s32.totalorder %s2210_s19, %s2206_s18 }
  0x16   : > { %p2357_p10 = por %p173_p7, %p172_p6  ;;  %p179_p11 = scmp.eq.s32.totalorder %s1689_s29, 3 }
  0x17   : > { %s2362_s14 = scalar_select %p160_p8, %s2214_s20, %s162_s10  }
  0x18   : > { %p2364_p12 = por %p179_p11, %p178_p9  ;;  %p1691_p13 = scmp.ge.s32.totalorder %s2242_s27, 4 }
  0x1a   : > { %198 = sbr.rel (%p1691_p13) target bundleno = 117 (0x75), region = 20 }
  0x21   : > { %211 = sbr.rel (!%p2341_p3) target bundleno = 75 (0x4b), region = 28  ;;  %s213_s16 = sand.u32 (%p2341_p3), 1, %s2222_s22  }
  0x22   : > { %s1732_s17 = sshll.u32 (%p2341_p3), %s2234_s25, 4  ;;  %s1692_s28 = sshll.u32 (%p2341_p3), %s213_s16, 9 }
  0x23   : > { %s3183_s2 = sld [smem:[#allocation12_spill]] (%p2341_p3)  ;;  %s2381_s10 = scalar_lea.vmem (%p2341_p3), [#allocation4], %s1692_s28 }
  0x29   : > { %s2376_s29 = scalar_lea.vmem %s3183_s2, %s1732_s17 }
  0x2a   : > { %v231_v0 = vld [vmem:[%s2376_s29] sm:$0xff]  ;;  %v233_v1 = vld [vmem:[%s2376_s29 + $0x8] sm:$0xff] }
  0x2b   : > { %v235_v2 = vld [vmem:[%s2376_s29 + $0x20] sm:$0xff]  ;;  %232 = vst [vmem:[%s2381_s10] sm:$0xff] %v231_v0  ;;  %234 = vst [vmem:[%s2381_s10 + $0x8] sm:$0xff] %v233_v1  ;;  %v237_v3 = vld [vmem:[%s2376_s29 + $0x28] sm:$0xff] }
  0x2c   : > { %236 = vst [vmem:[%s2381_s10 + $0x10] sm:$0xff] %v235_v2  ;;  %v239_v4 = vld [vmem:[%s2376_s29 + $0x40] sm:$0xff]  ;;  %v241_v5 = vld [vmem:[%s2376_s29 + $0x48] sm:$0xff]  ;;  %238 = vst [vmem:[%s2381_s10 + $0x18] sm:$0xff] %v237_v3 }
  0x2d   : > { %240 = vst [vmem:[%s2381_s10 + $0x20] sm:$0xff] %v239_v4  ;;  %242 = vst [vmem:[%s2381_s10 + $0x28] sm:$0xff] %v241_v5  ;;  %v243_v6 = vld [vmem:[%s2376_s29 + $0x60] sm:$0xff]  ;;  %v245_v7 = vld [vmem:[%s2376_s29 + $0x68] sm:$0xff] }
  0x2e   : > { %v247_v8 = vld [vmem:[%s2376_s29 + $0x80] sm:$0xff]  ;;  %244 = vst [vmem:[%s2381_s10 + $0x30] sm:$0xff] %v243_v6  ;;  %246 = vst [vmem:[%s2381_s10 + $0x38] sm:$0xff] %v245_v7  ;;  %v249_v9 = vld [vmem:[%s2376_s29 + $0x88] sm:$0xff] }
  0x2f   : > { %248 = vst [vmem:[%s2381_s10 + $0x40] sm:$0xff] %v247_v8  ;;  %v251_v10 = vld [vmem:[%s2376_s29 + $0xa0] sm:$0xff]  ;;  %v253_v11 = vld [vmem:[%s2376_s29 + $0xa8] sm:$0xff]  ;;  %250 = vst [vmem:[%s2381_s10 + $0x48] sm:$0xff] %v249_v9 }
  0x30   : > { %252 = vst [vmem:[%s2381_s10 + $0x50] sm:$0xff] %v251_v10  ;;  %254 = vst [vmem:[%s2381_s10 + $0x58] sm:$0xff] %v253_v11  ;;  %v255_v12 = vld [vmem:[%s2376_s29 + $0xc0] sm:$0xff]  ;;  %v257_v13 = vld [vmem:[%s2376_s29 + $0xc8] sm:$0xff] }
  0x31   : > { %v259_v14 = vld [vmem:[%s2376_s29 + $0xe0] sm:$0xff]  ;;  %256 = vst [vmem:[%s2381_s10 + $0x60] sm:$0xff] %v255_v12  ;;  %258 = vst [vmem:[%s2381_s10 + $0x68] sm:$0xff] %v257_v13  ;;  %v261_v15 = vld [vmem:[%s2376_s29 + $0xe8] sm:$0xff] }
  0x32   : > { %260 = vst [vmem:[%s2381_s10 + $0x70] sm:$0xff] %v259_v14  ;;  %v263_v16 = vld [vmem:[%s2376_s29 + $0x100] sm:$0xff]  ;;  %v265_v17 = vld [vmem:[%s2376_s29 + $0x108] sm:$0xff]  ;;  %262 = vst [vmem:[%s2381_s10 + $0x78] sm:$0xff] %v261_v15 }
  0x33   : > { %264 = vst [vmem:[%s2381_s10 + $0x80] sm:$0xff] %v263_v16  ;;  %266 = vst [vmem:[%s2381_s10 + $0x88] sm:$0xff] %v265_v17  ;;  %v267_v18 = vld [vmem:[%s2376_s29 + $0x120] sm:$0xff]  ;;  %v269_v19 = vld [vmem:[%s2376_s29 + $0x128] sm:$0xff] }
  0x34   : > { %v271_v20 = vld [vmem:[%s2376_s29 + $0x140] sm:$0xff]  ;;  %268 = vst [vmem:[%s2381_s10 + $0x90] sm:$0xff] %v267_v18  ;;  %270 = vst [vmem:[%s2381_s10 + $0x98] sm:$0xff] %v269_v19  ;;  %v273_v21 = vld [vmem:[%s2376_s29 + $0x148] sm:$0xff] }
  0x35   : > { %272 = vst [vmem:[%s2381_s10 + $0xa0] sm:$0xff] %v271_v20  ;;  %v275_v22 = vld [vmem:[%s2376_s29 + $0x160] sm:$0xff]  ;;  %v277_v23 = vld [vmem:[%s2376_s29 + $0x168] sm:$0xff]  ;;  %274 = vst [vmem:[%s2381_s10 + $0xa8] sm:$0xff] %v273_v21 }
  0x36   : > { %276 = vst [vmem:[%s2381_s10 + $0xb0] sm:$0xff] %v275_v22  ;;  %278 = vst [vmem:[%s2381_s10 + $0xb8] sm:$0xff] %v277_v23  ;;  %v279_v24 = vld [vmem:[%s2376_s29 + $0x180] sm:$0xff]  ;;  %v281_v25 = vld [vmem:[%s2376_s29 + $0x188] sm:$0xff] }
  0x37   : > { %v283_v26 = vld [vmem:[%s2376_s29 + $0x1a0] sm:$0xff]  ;;  %280 = vst [vmem:[%s2381_s10 + $0xc0] sm:$0xff] %v279_v24  ;;  %282 = vst [vmem:[%s2381_s10 + $0xc8] sm:$0xff] %v281_v25  ;;  %v285_v27 = vld [vmem:[%s2376_s29 + $0x1a8] sm:$0xff] }
  0x38   : > { %284 = vst [vmem:[%s2381_s10 + $0xd0] sm:$0xff] %v283_v26  ;;  %v287_v28 = vld [vmem:[%s2376_s29 + $0x1c0] sm:$0xff]  ;;  %v289_v29 = vld [vmem:[%s2376_s29 + $0x1c8] sm:$0xff]  ;;  %286 = vst [vmem:[%s2381_s10 + $0xd8] sm:$0xff] %v285_v27 }
  0x39   : > { %288 = vst [vmem:[%s2381_s10 + $0xe0] sm:$0xff] %v287_v28  ;;  %290 = vst [vmem:[%s2381_s10 + $0xe8] sm:$0xff] %v289_v29  ;;  %v291_v30 = vld [vmem:[%s2376_s29 + $0x1e0] sm:$0xff]  ;;  %v293_v31 = vld [vmem:[%s2376_s29 + $0x1e8] sm:$0xff] }
  0x3a   : > { %v295_v32 = vld [vmem:[%s2376_s29 + $0x200] sm:$0xff]  ;;  %292 = vst [vmem:[%s2381_s10 + $0xf0] sm:$0xff] %v291_v30  ;;  %294 = vst [vmem:[%s2381_s10 + $0xf8] sm:$0xff] %v293_v31  ;;  %v297_v33 = vld [vmem:[%s2376_s29 + $0x208] sm:$0xff] }
  0x3b   : > { %296 = vst [vmem:[%s2381_s10 + $0x100] sm:$0xff] %v295_v32  ;;  %v299_v34 = vld [vmem:[%s2376_s29 + $0x220] sm:$0xff]  ;;  %v301_v35 = vld [vmem:[%s2376_s29 + $0x228] sm:$0xff]  ;;  %298 = vst [vmem:[%s2381_s10 + $0x108] sm:$0xff] %v297_v33 }
  0x3c   : > { %300 = vst [vmem:[%s2381_s10 + $0x110] sm:$0xff] %v299_v34  ;;  %302 = vst [vmem:[%s2381_s10 + $0x118] sm:$0xff] %v301_v35  ;;  %v303_v36 = vld [vmem:[%s2376_s29 + $0x240] sm:$0xff]  ;;  %v305_v37 = vld [vmem:[%s2376_s29 + $0x248] sm:$0xff] }
  0x3d   : > { %v307_v38 = vld [vmem:[%s2376_s29 + $0x260] sm:$0xff]  ;;  %304 = vst [vmem:[%s2381_s10 + $0x120] sm:$0xff] %v303_v36  ;;  %306 = vst [vmem:[%s2381_s10 + $0x128] sm:$0xff] %v305_v37  ;;  %v309_v39 = vld [vmem:[%s2376_s29 + $0x268] sm:$0xff] }
  0x3e   : > { %308 = vst [vmem:[%s2381_s10 + $0x130] sm:$0xff] %v307_v38  ;;  %v311_v40 = vld [vmem:[%s2376_s29 + $0x280] sm:$0xff]  ;;  %v313_v41 = vld [vmem:[%s2376_s29 + $0x288] sm:$0xff]  ;;  %310 = vst [vmem:[%s2381_s10 + $0x138] sm:$0xff] %v309_v39 }
  0x3f   : > { %312 = vst [vmem:[%s2381_s10 + $0x140] sm:$0xff] %v311_v40  ;;  %314 = vst [vmem:[%s2381_s10 + $0x148] sm:$0xff] %v313_v41  ;;  %v315_v42 = vld [vmem:[%s2376_s29 + $0x2a0] sm:$0xff]  ;;  %v317_v43 = vld [vmem:[%s2376_s29 + $0x2a8] sm:$0xff] }
  0x40   : > { %v319_v44 = vld [vmem:[%s2376_s29 + $0x2c0] sm:$0xff]  ;;  %316 = vst [vmem:[%s2381_s10 + $0x150] sm:$0xff] %v315_v42  ;;  %318 = vst [vmem:[%s2381_s10 + $0x158] sm:$0xff] %v317_v43  ;;  %v321_v45 = vld [vmem:[%s2376_s29 + $0x2c8] sm:$0xff] }
  0x41   : > { %320 = vst [vmem:[%s2381_s10 + $0x160] sm:$0xff] %v319_v44  ;;  %v323_v46 = vld [vmem:[%s2376_s29 + $0x2e0] sm:$0xff]  ;;  %v325_v47 = vld [vmem:[%s2376_s29 + $0x2e8] sm:$0xff]  ;;  %322 = vst [vmem:[%s2381_s10 + $0x168] sm:$0xff] %v321_v45 }
  0x42   : > { %324 = vst [vmem:[%s2381_s10 + $0x170] sm:$0xff] %v323_v46  ;;  %326 = vst [vmem:[%s2381_s10 + $0x178] sm:$0xff] %v325_v47  ;;  %v327_v48 = vld [vmem:[%s2376_s29 + $0x300] sm:$0xff]  ;;  %v329_v49 = vld [vmem:[%s2376_s29 + $0x308] sm:$0xff] }
  0x43   : > { %v331_v50 = vld [vmem:[%s2376_s29 + $0x320] sm:$0xff]  ;;  %328 = vst [vmem:[%s2381_s10 + $0x180] sm:$0xff] %v327_v48  ;;  %330 = vst [vmem:[%s2381_s10 + $0x188] sm:$0xff] %v329_v49  ;;  %v333_v51 = vld [vmem:[%s2376_s29 + $0x328] sm:$0xff] }
  0x44   : > { %332 = vst [vmem:[%s2381_s10 + $0x190] sm:$0xff] %v331_v50  ;;  %v335_v52 = vld [vmem:[%s2376_s29 + $0x340] sm:$0xff]  ;;  %v337_v53 = vld [vmem:[%s2376_s29 + $0x348] sm:$0xff]  ;;  %334 = vst [vmem:[%s2381_s10 + $0x198] sm:$0xff] %v333_v51 }
  0x45   : > { %336 = vst [vmem:[%s2381_s10 + $0x1a0] sm:$0xff] %v335_v52  ;;  %338 = vst [vmem:[%s2381_s10 + $0x1a8] sm:$0xff] %v337_v53  ;;  %v339_v54 = vld [vmem:[%s2376_s29 + $0x360] sm:$0xff]  ;;  %v341_v55 = vld [vmem:[%s2376_s29 + $0x368] sm:$0xff] }
  0x46   : > { %v343_v56 = vld [vmem:[%s2376_s29 + $0x380] sm:$0xff]  ;;  %340 = vst [vmem:[%s2381_s10 + $0x1b0] sm:$0xff] %v339_v54  ;;  %342 = vst [vmem:[%s2381_s10 + $0x1b8] sm:$0xff] %v341_v55  ;;  %v345_v57 = vld [vmem:[%s2376_s29 + $0x388] sm:$0xff] }
  0x47   : > { %344 = vst [vmem:[%s2381_s10 + $0x1c0] sm:$0xff] %v343_v56  ;;  %v347_v58 = vld [vmem:[%s2376_s29 + $0x3a0] sm:$0xff]  ;;  %v349_v59 = vld [vmem:[%s2376_s29 + $0x3a8] sm:$0xff]  ;;  %346 = vst [vmem:[%s2381_s10 + $0x1c8] sm:$0xff] %v345_v57 }
  0x48   : > { %348 = vst [vmem:[%s2381_s10 + $0x1d0] sm:$0xff] %v347_v58  ;;  %350 = vst [vmem:[%s2381_s10 + $0x1d8] sm:$0xff] %v349_v59  ;;  %v351_v60 = vld [vmem:[%s2376_s29 + $0x3c0] sm:$0xff]  ;;  %v353_v61 = vld [vmem:[%s2376_s29 + $0x3c8] sm:$0xff] }
  0x49   : > { %v355_v62 = vld [vmem:[%s2376_s29 + $0x3e0] sm:$0xff]  ;;  %352 = vst [vmem:[%s2381_s10 + $0x1e0] sm:$0xff] %v351_v60  ;;  %354 = vst [vmem:[%s2381_s10 + $0x1e8] sm:$0xff] %v353_v61  ;;  %v357_v63 = vld [vmem:[%s2376_s29 + $0x3e8] sm:$0xff] }
  0x4a   : > { %356 = vst [vmem:[%s2381_s10 + $0x1f0] sm:$0xff] %v355_v62  ;;  %358 = vst [vmem:[%s2381_s10 + $0x1f8] sm:$0xff] %v357_v63 }
  0x4b PF: > { %364 = sbr.rel (!%p2341_p3) target bundleno = 117 (0x75), region = 51  ;;  %s366_s12 = sand.u32 (%p2341_p3), 1, %s2222_s22  }
  0x4c   : > { %s1733_s16 = sshll.u32 (%p2341_p3), %s2234_s25, 4  ;;  %s1695_s17 = sshll.u32 (%p2341_p3), %s366_s12, 9 }
  0x4d   : > { %s3184_s3 = sld [smem:[#allocation13_spill]] (%p2341_p3)  ;;  %s2520_s9 = scalar_lea.vmem (%p2341_p3), [#allocation5], %s1695_s17 }
  0x53   : > { %s2515_s8 = scalar_lea.vmem %s3184_s3, %s1733_s16 }
  0x54   : > { %v384_v0 = vld [vmem:[%s2515_s8] sm:$0xff]  ;;  %v386_v1 = vld [vmem:[%s2515_s8 + $0x8] sm:$0xff] }
  0x55   : > { %v388_v2 = vld [vmem:[%s2515_s8 + $0x20] sm:$0xff]  ;;  %385 = vst [vmem:[%s2520_s9] sm:$0xff] %v384_v0  ;;  %387 = vst [vmem:[%s2520_s9 + $0x8] sm:$0xff] %v386_v1  ;;  %v390_v3 = vld [vmem:[%s2515_s8 + $0x28] sm:$0xff] }
  0x56   : > { %389 = vst [vmem:[%s2520_s9 + $0x10] sm:$0xff] %v388_v2  ;;  %v392_v4 = vld [vmem:[%s2515_s8 + $0x40] sm:$0xff]  ;;  %v394_v5 = vld [vmem:[%s2515_s8 + $0x48] sm:$0xff]  ;;  %391 = vst [vmem:[%s2520_s9 + $0x18] sm:$0xff] %v390_v3 }
  0x57   : > { %393 = vst [vmem:[%s2520_s9 + $0x20] sm:$0xff] %v392_v4  ;;  %395 = vst [vmem:[%s2520_s9 + $0x28] sm:$0xff] %v394_v5  ;;  %v396_v6 = vld [vmem:[%s2515_s8 + $0x60] sm:$0xff]  ;;  %v398_v7 = vld [vmem:[%s2515_s8 + $0x68] sm:$0xff] }
  0x58   : > { %v400_v8 = vld [vmem:[%s2515_s8 + $0x80] sm:$0xff]  ;;  %397 = vst [vmem:[%s2520_s9 + $0x30] sm:$0xff] %v396_v6  ;;  %399 = vst [vmem:[%s2520_s9 + $0x38] sm:$0xff] %v398_v7  ;;  %v402_v9 = vld [vmem:[%s2515_s8 + $0x88] sm:$0xff] }
  0x59   : > { %401 = vst [vmem:[%s2520_s9 + $0x40] sm:$0xff] %v400_v8  ;;  %v404_v10 = vld [vmem:[%s2515_s8 + $0xa0] sm:$0xff]  ;;  %v406_v11 = vld [vmem:[%s2515_s8 + $0xa8] sm:$0xff]  ;;  %403 = vst [vmem:[%s2520_s9 + $0x48] sm:$0xff] %v402_v9 }
  0x5a   : > { %405 = vst [vmem:[%s2520_s9 + $0x50] sm:$0xff] %v404_v10  ;;  %407 = vst [vmem:[%s2520_s9 + $0x58] sm:$0xff] %v406_v11  ;;  %v408_v12 = vld [vmem:[%s2515_s8 + $0xc0] sm:$0xff]  ;;  %v410_v13 = vld [vmem:[%s2515_s8 + $0xc8] sm:$0xff] }
  0x5b   : > { %v412_v14 = vld [vmem:[%s2515_s8 + $0xe0] sm:$0xff]  ;;  %409 = vst [vmem:[%s2520_s9 + $0x60] sm:$0xff] %v408_v12  ;;  %411 = vst [vmem:[%s2520_s9 + $0x68] sm:$0xff] %v410_v13  ;;  %v414_v15 = vld [vmem:[%s2515_s8 + $0xe8] sm:$0xff] }
  0x5c   : > { %413 = vst [vmem:[%s2520_s9 + $0x70] sm:$0xff] %v412_v14  ;;  %v416_v16 = vld [vmem:[%s2515_s8 + $0x100] sm:$0xff]  ;;  %v418_v17 = vld [vmem:[%s2515_s8 + $0x108] sm:$0xff]  ;;  %415 = vst [vmem:[%s2520_s9 + $0x78] sm:$0xff] %v414_v15 }
  0x5d   : > { %417 = vst [vmem:[%s2520_s9 + $0x80] sm:$0xff] %v416_v16  ;;  %419 = vst [vmem:[%s2520_s9 + $0x88] sm:$0xff] %v418_v17  ;;  %v420_v18 = vld [vmem:[%s2515_s8 + $0x120] sm:$0xff]  ;;  %v422_v19 = vld [vmem:[%s2515_s8 + $0x128] sm:$0xff] }
  0x5e   : > { %v424_v20 = vld [vmem:[%s2515_s8 + $0x140] sm:$0xff]  ;;  %421 = vst [vmem:[%s2520_s9 + $0x90] sm:$0xff] %v420_v18  ;;  %423 = vst [vmem:[%s2520_s9 + $0x98] sm:$0xff] %v422_v19  ;;  %v426_v21 = vld [vmem:[%s2515_s8 + $0x148] sm:$0xff] }
  0x5f   : > { %425 = vst [vmem:[%s2520_s9 + $0xa0] sm:$0xff] %v424_v20  ;;  %v428_v22 = vld [vmem:[%s2515_s8 + $0x160] sm:$0xff]  ;;  %v430_v23 = vld [vmem:[%s2515_s8 + $0x168] sm:$0xff]  ;;  %427 = vst [vmem:[%s2520_s9 + $0xa8] sm:$0xff] %v426_v21 }
  0x60   : > { %429 = vst [vmem:[%s2520_s9 + $0xb0] sm:$0xff] %v428_v22  ;;  %431 = vst [vmem:[%s2520_s9 + $0xb8] sm:$0xff] %v430_v23  ;;  %v432_v24 = vld [vmem:[%s2515_s8 + $0x180] sm:$0xff]  ;;  %v434_v25 = vld [vmem:[%s2515_s8 + $0x188] sm:$0xff] }
  0x61   : > { %v436_v26 = vld [vmem:[%s2515_s8 + $0x1a0] sm:$0xff]  ;;  %433 = vst [vmem:[%s2520_s9 + $0xc0] sm:$0xff] %v432_v24  ;;  %435 = vst [vmem:[%s2520_s9 + $0xc8] sm:$0xff] %v434_v25  ;;  %v438_v27 = vld [vmem:[%s2515_s8 + $0x1a8] sm:$0xff] }
  0x62   : > { %437 = vst [vmem:[%s2520_s9 + $0xd0] sm:$0xff] %v436_v26  ;;  %v440_v28 = vld [vmem:[%s2515_s8 + $0x1c0] sm:$0xff]  ;;  %v442_v29 = vld [vmem:[%s2515_s8 + $0x1c8] sm:$0xff]  ;;  %439 = vst [vmem:[%s2520_s9 + $0xd8] sm:$0xff] %v438_v27 }
  0x63   : > { %441 = vst [vmem:[%s2520_s9 + $0xe0] sm:$0xff] %v440_v28  ;;  %443 = vst [vmem:[%s2520_s9 + $0xe8] sm:$0xff] %v442_v29  ;;  %v444_v30 = vld [vmem:[%s2515_s8 + $0x1e0] sm:$0xff]  ;;  %v446_v31 = vld [vmem:[%s2515_s8 + $0x1e8] sm:$0xff] }
  0x64   : > { %v448_v32 = vld [vmem:[%s2515_s8 + $0x200] sm:$0xff]  ;;  %445 = vst [vmem:[%s2520_s9 + $0xf0] sm:$0xff] %v444_v30  ;;  %447 = vst [vmem:[%s2520_s9 + $0xf8] sm:$0xff] %v446_v31  ;;  %v450_v33 = vld [vmem:[%s2515_s8 + $0x208] sm:$0xff] }
  0x65   : > { %449 = vst [vmem:[%s2520_s9 + $0x100] sm:$0xff] %v448_v32  ;;  %v452_v34 = vld [vmem:[%s2515_s8 + $0x220] sm:$0xff]  ;;  %v454_v35 = vld [vmem:[%s2515_s8 + $0x228] sm:$0xff]  ;;  %451 = vst [vmem:[%s2520_s9 + $0x108] sm:$0xff] %v450_v33 }
  0x66   : > { %453 = vst [vmem:[%s2520_s9 + $0x110] sm:$0xff] %v452_v34  ;;  %455 = vst [vmem:[%s2520_s9 + $0x118] sm:$0xff] %v454_v35  ;;  %v456_v36 = vld [vmem:[%s2515_s8 + $0x240] sm:$0xff]  ;;  %v458_v37 = vld [vmem:[%s2515_s8 + $0x248] sm:$0xff] }
  0x67   : > { %v460_v38 = vld [vmem:[%s2515_s8 + $0x260] sm:$0xff]  ;;  %457 = vst [vmem:[%s2520_s9 + $0x120] sm:$0xff] %v456_v36  ;;  %459 = vst [vmem:[%s2520_s9 + $0x128] sm:$0xff] %v458_v37  ;;  %v462_v39 = vld [vmem:[%s2515_s8 + $0x268] sm:$0xff] }
  0x68   : > { %461 = vst [vmem:[%s2520_s9 + $0x130] sm:$0xff] %v460_v38  ;;  %v464_v40 = vld [vmem:[%s2515_s8 + $0x280] sm:$0xff]  ;;  %v466_v41 = vld [vmem:[%s2515_s8 + $0x288] sm:$0xff]  ;;  %463 = vst [vmem:[%s2520_s9 + $0x138] sm:$0xff] %v462_v39 }
  0x69   : > { %465 = vst [vmem:[%s2520_s9 + $0x140] sm:$0xff] %v464_v40  ;;  %467 = vst [vmem:[%s2520_s9 + $0x148] sm:$0xff] %v466_v41  ;;  %v468_v42 = vld [vmem:[%s2515_s8 + $0x2a0] sm:$0xff]  ;;  %v470_v43 = vld [vmem:[%s2515_s8 + $0x2a8] sm:$0xff] }
  0x6a   : > { %v472_v44 = vld [vmem:[%s2515_s8 + $0x2c0] sm:$0xff]  ;;  %469 = vst [vmem:[%s2520_s9 + $0x150] sm:$0xff] %v468_v42  ;;  %471 = vst [vmem:[%s2520_s9 + $0x158] sm:$0xff] %v470_v43  ;;  %v474_v45 = vld [vmem:[%s2515_s8 + $0x2c8] sm:$0xff] }
  0x6b   : > { %473 = vst [vmem:[%s2520_s9 + $0x160] sm:$0xff] %v472_v44  ;;  %v476_v46 = vld [vmem:[%s2515_s8 + $0x2e0] sm:$0xff]  ;;  %v478_v47 = vld [vmem:[%s2515_s8 + $0x2e8] sm:$0xff]  ;;  %475 = vst [vmem:[%s2520_s9 + $0x168] sm:$0xff] %v474_v45 }
  0x6c   : > { %477 = vst [vmem:[%s2520_s9 + $0x170] sm:$0xff] %v476_v46  ;;  %479 = vst [vmem:[%s2520_s9 + $0x178] sm:$0xff] %v478_v47  ;;  %v480_v48 = vld [vmem:[%s2515_s8 + $0x300] sm:$0xff]  ;;  %v482_v49 = vld [vmem:[%s2515_s8 + $0x308] sm:$0xff] }
  0x6d   : > { %v484_v50 = vld [vmem:[%s2515_s8 + $0x320] sm:$0xff]  ;;  %481 = vst [vmem:[%s2520_s9 + $0x180] sm:$0xff] %v480_v48  ;;  %483 = vst [vmem:[%s2520_s9 + $0x188] sm:$0xff] %v482_v49  ;;  %v486_v51 = vld [vmem:[%s2515_s8 + $0x328] sm:$0xff] }
  0x6e   : > { %485 = vst [vmem:[%s2520_s9 + $0x190] sm:$0xff] %v484_v50  ;;  %v488_v52 = vld [vmem:[%s2515_s8 + $0x340] sm:$0xff]  ;;  %v490_v53 = vld [vmem:[%s2515_s8 + $0x348] sm:$0xff]  ;;  %487 = vst [vmem:[%s2520_s9 + $0x198] sm:$0xff] %v486_v51 }
  0x6f   : > { %489 = vst [vmem:[%s2520_s9 + $0x1a0] sm:$0xff] %v488_v52  ;;  %491 = vst [vmem:[%s2520_s9 + $0x1a8] sm:$0xff] %v490_v53  ;;  %v492_v54 = vld [vmem:[%s2515_s8 + $0x360] sm:$0xff]  ;;  %v494_v55 = vld [vmem:[%s2515_s8 + $0x368] sm:$0xff] }
  0x70   : > { %v496_v56 = vld [vmem:[%s2515_s8 + $0x380] sm:$0xff]  ;;  %493 = vst [vmem:[%s2520_s9 + $0x1b0] sm:$0xff] %v492_v54  ;;  %495 = vst [vmem:[%s2520_s9 + $0x1b8] sm:$0xff] %v494_v55  ;;  %v498_v57 = vld [vmem:[%s2515_s8 + $0x388] sm:$0xff] }
  0x71   : > { %497 = vst [vmem:[%s2520_s9 + $0x1c0] sm:$0xff] %v496_v56  ;;  %v500_v58 = vld [vmem:[%s2515_s8 + $0x3a0] sm:$0xff]  ;;  %v502_v59 = vld [vmem:[%s2515_s8 + $0x3a8] sm:$0xff]  ;;  %499 = vst [vmem:[%s2520_s9 + $0x1c8] sm:$0xff] %v498_v57 }
  0x72   : > { %501 = vst [vmem:[%s2520_s9 + $0x1d0] sm:$0xff] %v500_v58  ;;  %503 = vst [vmem:[%s2520_s9 + $0x1d8] sm:$0xff] %v502_v59  ;;  %v504_v60 = vld [vmem:[%s2515_s8 + $0x3c0] sm:$0xff]  ;;  %v506_v61 = vld [vmem:[%s2515_s8 + $0x3c8] sm:$0xff] }
  0x73   : > { %v508_v62 = vld [vmem:[%s2515_s8 + $0x3e0] sm:$0xff]  ;;  %505 = vst [vmem:[%s2520_s9 + $0x1e0] sm:$0xff] %v504_v60  ;;  %507 = vst [vmem:[%s2520_s9 + $0x1e8] sm:$0xff] %v506_v61  ;;  %v510_v63 = vld [vmem:[%s2515_s8 + $0x3e8] sm:$0xff] }
  0x74   : > { %509 = vst [vmem:[%s2520_s9 + $0x1f0] sm:$0xff] %v508_v62  ;;  %511 = vst [vmem:[%s2520_s9 + $0x1f8] sm:$0xff] %v510_v63 }
  0x75 PF: > { %p1698_p0 = scmp.ge.s32.totalorder %s2242_s27, 1  ;;  %p526_p1 = scmp.lt.s32.totalorder %s2242_s27, 5 }
  0x77   : > { %p527_p2 = pnand %p1698_p0, %p526_p1 }
  0x78   : > { %s533_s29 = sand.u32 (!%p527_p2), 1, %s2218_s21   ;;  %s3173_s10 = sand.u32 (!%p527_p2), 1, %s2210_s19  }
  0x79   : > { %530 = sbr.rel (%p527_p2) target bundleno = 904 (0x388), region = 78  ;;  %s1699_s12 = sshll.u32 (!%p527_p2), %s533_s29, 9 }
  0x7a   : > { %s1701_s16 = sshll.u32 (!%p527_p2), %s3173_s10, 7  ;;  %s1702_s17 = sshll.u32 (!%p527_p2), %s2230_s24, 3 }
  0x7b   : > { %p584_p3 = scmp.lt.s32.totalorder (!%p527_p2), %s1702_s17, 15  ;;  %s1705_s28 = sshll.u32 (!%p527_p2), %s2226_s23, 5 }
  0x7c   : > { %p593_p4 = scmp.lt.s32.totalorder (!%p527_p2), %s1705_s28, 63  ;;  %s2665_s29 = scalar_lea.vmem (!%p527_p2), [#allocation4], %s1699_s12 }
  0x7d   : > { %s2667_s10 = scalar_lea.vmem (!%p527_p2), [#allocation5], %s1699_s12  ;;  %s2669_s26 = scalar_lea.vmem (!%p527_p2), [#allocation6], %s1701_s16 }
  0x7e   : > { %p1708_p5 = scmp.ne.s32.totalorder (!%p527_p2), %s2226_s23, 0 }
  0x80   : > { %s3203_s17 = smov (!%p584_p3, %s1702_s17), 15  ;;  %s3205_s28 = smov (!%p593_p4, %s1705_s28), 63 }
  0x81   : > { %s1734_s7 = sshll.u32 %s3203_s17, 4  ;;  %s1735_s3 = sshll.u32 %s3205_s28, 4  ;;  %v2244_v40 = vmov (!%p1708_p5), 0.0   ;;  %v719_v44 = vlaneseq (!%p1708_p5)  ;;  %v717_v61 = vld [vmem:[%s3166_s1] sm:$0x3] (!%p1708_p5) }
  0x82   : > { %s2658_s2 = scalar_lea.vmem %s3165_s0, %s1734_s7  ;;  %s2663_s21 = scalar_lea.vmem %s3169_s4, %s1735_s3  ;;  %604 = vst [vmem:[#allocation3] sm:$0xff] (!%p1708_p5), %v2244_v40  ;;  %605 = vst [vmem:[#allocation3 + $0x8] sm:$0xff] (!%p1708_p5), %v2244_v40 }
  0x83   : > { %603 = sbr.rel (%p1708_p5) target bundleno = 311 (0x137), region = 90  ;;  %v2673_v0 = vld [vmem:[%s2658_s2 + $0x20] sm:$0xff] (!%p1708_p5)  ;;  %v2676_v1 = vld [vmem:[%s2658_s2 + $0x28] sm:$0xff] (!%p1708_p5)  ;;  %v2691_v7 = vld [vmem:[%s2658_s2 + $0x30] sm:$0xff] (!%p1708_p5)  ;;  %606 = vst [vmem:[#allocation3 + $0x10] sm:$0xff] (!%p1708_p5), %v2244_v40  ;;  %v720_v51 = vshrl.u32 (!%p1708_p5), %v719_v44, 7 }
  0x84   : > { %v2679_v2 = vld [vmem:[%s2658_s2] sm:$0xff] (!%p1708_p5)  ;;  %v640_v3 = vmul.f32 (!%p1708_p5), %v2673_v0, %v2673_v0  ;;  %v641_v4 = vmul.f32 (!%p1708_p5), %v2676_v1, %v2676_v1  ;;  %v2686_v5 = vld [vmem:[%s2658_s2 + $0x8] sm:$0xff] (!%p1708_p5)  ;;  %v2694_v8 = vld [vmem:[%s2658_s2 + $0x38] sm:$0xff] (!%p1708_p5)  ;;  %v642_v10 = vmul.f32 (!%p1708_p5), %v2691_v7, %v2691_v7  ;;  %607 = vst [vmem:[#allocation3 + $0x18] sm:$0xff] (!%p1708_p5), %v2244_v40 }
  0x85   : > { %v636_v6 = vmul.f32 (!%p1708_p5), %v2679_v2, %v2679_v2  ;;  %v637_v9 = vmul.f32 (!%p1708_p5), %v2686_v5, %v2686_v5  ;;  %v643_v11 = vmul.f32 (!%p1708_p5), %v2694_v8, %v2694_v8  ;;  %v2703_v12 = vld [vmem:[%s2658_s2 + $0x10] sm:$0xff] (!%p1708_p5)  ;;  %v2706_v13 = vld [vmem:[%s2658_s2 + $0x18] sm:$0xff] (!%p1708_p5)  ;;  %v2719_v19 = vld [vmem:[%s2658_s2 + $0x40] sm:$0xff] (!%p1708_p5)  ;;  %608 = vst [vmem:[#allocation3 + $0x20] sm:$0xff] (!%p1708_p5), %v2244_v40  ;;  %v721_v58 = vsub.s32 (!%p1708_p5), 0, %v720_v51 }
  0x86   : > { %v2709_v14 = vld [vmem:[%s2658_s2 + $0x50] sm:$0xff] (!%p1708_p5)  ;;  %v658_v15 = vadd.f32 (!%p1708_p5), %v641_v4, %v640_v3  ;;  %v638_v16 = vmul.f32 (!%p1708_p5), %v2703_v12, %v2703_v12  ;;  %v639_v17 = vmul.f32 (!%p1708_p5), %v2706_v13, %v2706_v13  ;;  %v2716_v18 = vld [vmem:[%s2658_s2 + $0x58] sm:$0xff] (!%p1708_p5)  ;;  %v2722_v20 = vld [vmem:[%s2658_s2 + $0x48] sm:$0xff] (!%p1708_p5)  ;;  %v644_v26 = vmul.f32 (!%p1708_p5), %v2719_v19, %v2719_v19  ;;  %609 = vst [vmem:[#allocation3 + $0x28] sm:$0xff] (!%p1708_p5), %v2244_v40 }
  0x87   : > { %v652_v21 = vadd.f32 (!%p1708_p5), %v637_v9, %v636_v6  ;;  %v661_v22 = vadd.f32 (!%p1708_p5), %v643_v11, %v642_v10  ;;  %v646_v23 = vmul.f32 (!%p1708_p5), %v2709_v14, %v2709_v14  ;;  %v647_v24 = vmul.f32 (!%p1708_p5), %v2716_v18, %v2716_v18  ;;  %v2733_v28 = vld [vmem:[%s2658_s2 + $0x70] sm:$0xff] (!%p1708_p5)  ;;  %v2736_v29 = vld [vmem:[%s2658_s2 + $0x78] sm:$0xff] (!%p1708_p5)  ;;  %v2739_v30 = vld [vmem:[%s2658_s2 + $0x60] sm:$0xff] (!%p1708_p5)  ;;  %610 = vst [vmem:[#allocation3 + $0x30] sm:$0xff] (!%p1708_p5), %v2244_v40 }
  0x88   : > { %659 = vadd.xlane.f32.xlu1 (!%p1708_p5), %v658_v15  ;;  %v655_v25 = vadd.f32 (!%p1708_p5), %v639_v17, %v638_v16  ;;  %v645_v27 = vmul.f32 (!%p1708_p5), %v2722_v20, %v2722_v20  ;;  %v2742_v31 = vld [vmem:[%s2658_s2 + $0x68] sm:$0xff] (!%p1708_p5)  ;;  %v650_v33 = vmul.f32 (!%p1708_p5), %v2733_v28, %v2733_v28  ;;  %v651_v34 = vmul.f32 (!%p1708_p5), %v2736_v29, %v2736_v29 }
  0x89   : > { %653 = vadd.xlane.f32.xlu0 (!%p1708_p5), %v652_v21  ;;  %v667_v32 = vadd.f32 (!%p1708_p5), %v647_v24, %v646_v23  ;;  %v648_v36 = vmul.f32 (!%p1708_p5), %v2739_v30, %v2739_v30  ;;  %v649_v37 = vmul.f32 (!%p1708_p5), %v2742_v31, %v2742_v31  ;;  %611 = vst [vmem:[#allocation3 + $0x38] sm:$0xff] (!%p1708_p5), %v2244_v40  ;;  %612 = vst [vmem:[#allocation3 + $0x40] sm:$0xff] (!%p1708_p5), %v2244_v40 }
  0x8a   : > { %v664_v35 = vadd.f32 %v645_v27, %v644_v26  ;;  %v673_v38 = vadd.f32 %v651_v34, %v650_v33  ;;  %613 = vst [vmem:[#allocation3 + $0x48] sm:$0xff] %v2244_v40  ;;  %614 = vst [vmem:[#allocation3 + $0x50] sm:$0xff] %v2244_v40  ;;  %v725_v59 = vsub.s32 1, %v720_v51  ;;  %v722_v9 = vrot.slane %v717_v61, %v721_v58 }
  0x8b   : > { %v670_v39 = vadd.f32 %v649_v37, %v648_v36  ;;  %615 = vst [vmem:[#allocation3 + $0x58] sm:$0xff] %v2244_v40  ;;  %616 = vst [vmem:[#allocation3 + $0x60] sm:$0xff] %v2244_v40 }
  0x8c   : > { %662 = vadd.xlane.f32.xlu1 %v661_v22  ;;  %617 = vst [vmem:[#allocation3 + $0x68] sm:$0xff] %v2244_v40  ;;  %618 = vst [vmem:[#allocation3 + $0x70] sm:$0xff] %v2244_v40  ;;  %v726_v10 = vrot.slane %v717_v61, %v725_v59 }
  0x8d   : > { %656 = vadd.xlane.f32.xlu0 %v655_v25  ;;  %619 = vst [vmem:[#allocation3 + $0x78] sm:$0xff] %v2244_v40 }
  0x90   : > { %668 = vadd.xlane.f32.xlu1 %v667_v32 }
  0x91   : > { %665 = vadd.xlane.f32.xlu0 %v664_v35 }
  0x94   : > { %674 = vadd.xlane.f32.xlu1 %v673_v38 }
  0x95   : > { %671 = vadd.xlane.f32.xlu0 %v670_v39 }
 0x115   : > { %v660_v41 = vpop.xlane.xlu1 %659 }
 0x116   : > { %v679_v42 = vmul.f32 0.00390625, %v660_v41  ;;  %v654_v43 = vpop.xlane.xlu0 %653 }
 0x117   : > { %v677_v45 = vmul.f32 0.00390625, %v654_v43 }
 0x118   : > { %v687_v46 = vadd.f32 1e-06, %v679_v42 }
 0x119   : > { %v685_v47 = vadd.f32 1e-06, %v677_v45  ;;  %v663_v48 = vpop.xlane.xlu1 %662 }
 0x11a   : > { %2052 = vrsqrt.f32 %v687_v46  ;;  %v680_v49 = vmul.f32 0.00390625, %v663_v48  ;;  %v657_v50 = vpop.xlane.xlu0 %656 }
 0x11b   : > { %2054 = vrsqrt.f32 %v685_v47  ;;  %v678_v52 = vmul.f32 0.00390625, %v657_v50 }
 0x11c   : > { %v688_v53 = vadd.f32 1e-06, %v680_v49 }
 0x11d   : > { %v686_v54 = vadd.f32 1e-06, %v678_v52  ;;  %v669_v55 = vpop.xlane.xlu1 %668 }
 0x11e   : > { %2056 = vrsqrt.f32 %v688_v53  ;;  %v682_v56 = vmul.f32 0.00390625, %v669_v55  ;;  %v666_v57 = vpop.xlane.xlu0 %665 }
 0x11f   : > { %2058 = vrsqrt.f32 %v686_v54  ;;  %v681_v60 = vmul.f32 0.00390625, %v666_v57 }
 0x120   : > { %v690_v62 = vadd.f32 1e-06, %v682_v56 }
 0x121   : > { %v689_v63 = vadd.f32 1e-06, %v681_v60  ;;  %v675_v3 = vpop.xlane.xlu1 %674 }
 0x122   : > { %2060 = vrsqrt.f32 %v690_v62  ;;  %v684_v4 = vmul.f32 0.00390625, %v675_v3  ;;  %v672_v6 = vpop.xlane.xlu0 %671 }
 0x123   : > { %2062 = vrsqrt.f32 %v689_v63  ;;  %v683_v11 = vmul.f32 0.00390625, %v672_v6 }
 0x124   : > { %v2053_v15 = vpop.eup %2052  ;;  %v692_v16 = vadd.f32 1e-06, %v684_v4 }
 0x125   : > { %v2055_v17 = vpop.eup %2054  ;;  %v705_v21 = vmul.f32 %v2053_v15, %v2673_v0  ;;  %v706_v22 = vmul.f32 %v2053_v15, %v2676_v1  ;;  %v691_v23 = vadd.f32 1e-06, %v683_v11 }
 0x126   : > { %v701_v24 = vmul.f32 %v2055_v17, %v2679_v2  ;;  %v702_v25 = vmul.f32 %v2055_v17, %v2686_v5  ;;  %2064 = vrsqrt.f32 %v692_v16 }
 0x127   : > { %v733_v26 = vmul.f32 %v722_v9, %v705_v21  ;;  %v734_v27 = vmul.f32 %v726_v10, %v706_v22  ;;  %2066 = vrsqrt.f32 %v691_v23 }
 0x128   : > { %v2057_v32 = vpop.eup %2056  ;;  %v729_v33 = vmul.f32 %v722_v9, %v701_v24  ;;  %v730_v34 = vmul.f32 %v726_v10, %v702_v25 }
 0x129   : > { %v2059_v35 = vpop.eup %2058  ;;  %749 = vst [vmem:[#allocation2 + $0x20] sm:$0xff] %v733_v26  ;;  %750 = vst [vmem:[#allocation2 + $0x28] sm:$0xff] %v734_v27  ;;  %v707_v36 = vmul.f32 %v2057_v32, %v2691_v7  ;;  %v708_v0 = vmul.f32 %v2057_v32, %v2694_v8 }
 0x12a   : > { %745 = vst [vmem:[#allocation2] sm:$0xff] %v729_v33  ;;  %746 = vst [vmem:[#allocation2 + $0x8] sm:$0xff] %v730_v34  ;;  %v703_v1 = vmul.f32 %v2059_v35, %v2703_v12  ;;  %v704_v2 = vmul.f32 %v2059_v35, %v2706_v13 }
 0x12b   : > { %v735_v5 = vmul.f32 %v722_v9, %v707_v36  ;;  %v736_v37 = vmul.f32 %v726_v10, %v708_v0 }
 0x12c   : > { %v2061_v38 = vpop.eup %2060  ;;  %v731_v39 = vmul.f32 %v722_v9, %v703_v1  ;;  %v732_v40 = vmul.f32 %v726_v10, %v704_v2 }
 0x12d   : > { %v2063_v41 = vpop.eup %2062  ;;  %751 = vst [vmem:[#allocation2 + $0x30] sm:$0xff] %v735_v5  ;;  %752 = vst [vmem:[#allocation2 + $0x38] sm:$0xff] %v736_v37  ;;  %v711_v42 = vmul.f32 %v2061_v38, %v2709_v14  ;;  %v712_v7 = vmul.f32 %v2061_v38, %v2716_v18 }
 0x12e   : > { %747 = vst [vmem:[#allocation2 + $0x10] sm:$0xff] %v731_v39  ;;  %748 = vst [vmem:[#allocation2 + $0x18] sm:$0xff] %v732_v40  ;;  %v709_v8 = vmul.f32 %v2063_v41, %v2719_v19  ;;  %v710_v12 = vmul.f32 %v2063_v41, %v2722_v20 }
 0x12f   : > { %v739_v43 = vmul.f32 %v722_v9, %v711_v42  ;;  %v740_v13 = vmul.f32 %v726_v10, %v712_v7 }
 0x130   : > { %v2065_v44 = vpop.eup %2064  ;;  %v737_v45 = vmul.f32 %v722_v9, %v709_v8  ;;  %v738_v46 = vmul.f32 %v726_v10, %v710_v12 }
 0x131   : > { %v2067_v47 = vpop.eup %2066  ;;  %755 = vst [vmem:[#allocation2 + $0x50] sm:$0xff] %v739_v43  ;;  %756 = vst [vmem:[#allocation2 + $0x58] sm:$0xff] %v740_v13  ;;  %v715_v48 = vmul.f32 %v2065_v44, %v2733_v28  ;;  %v716_v14 = vmul.f32 %v2065_v44, %v2736_v29 }
 0x132   : > { %753 = vst [vmem:[#allocation2 + $0x40] sm:$0xff] %v737_v45  ;;  %754 = vst [vmem:[#allocation2 + $0x48] sm:$0xff] %v738_v46  ;;  %v713_v18 = vmul.f32 %v2067_v47, %v2739_v30  ;;  %v714_v19 = vmul.f32 %v2067_v47, %v2742_v31 }
 0x133   : > { %v743_v49 = vmul.f32 %v722_v9, %v715_v48  ;;  %v744_v20 = vmul.f32 %v726_v10, %v716_v14 }
 0x134   : > { %v741_v50 = vmul.f32 %v722_v9, %v713_v18  ;;  %v742_v51 = vmul.f32 %v726_v10, %v714_v19 }
 0x135   : > { %759 = vst [vmem:[#allocation2 + $0x70] sm:$0xff] %v743_v49  ;;  %760 = vst [vmem:[#allocation2 + $0x78] sm:$0xff] %v744_v20 }
 0x136   : > { %757 = vst [vmem:[#allocation2 + $0x60] sm:$0xff] %v741_v50  ;;  %758 = vst [vmem:[#allocation2 + $0x68] sm:$0xff] %v742_v51 }
 0x137 PF: > { %v778_v28 = vld [vmem:[%s2665_s29 + $0x8] sm:$0xff]  ;;  %v780_v29 = vld [vmem:[%s2665_s29 + $0x18] sm:$0xff]  ;;  %v777_v30 = vld [vmem:[%s2665_s29] sm:$0xff]  ;;  %p1725_p6 = scmp.ne.s32.totalorder %s2226_s23, 1 }
 0x138   : > { %v1738_v31 = vpack.c.bf16 %v780_v29, %v778_v28  ;;  %v779_v52 = vld [vmem:[%s2665_s29 + $0x10] sm:$0xff]  ;;  %v782_v53 = vld [vmem:[%s2665_s29 + $0x28] sm:$0xff]  ;;  %v784_v54 = vld [vmem:[%s2665_s29 + $0x38] sm:$0xff] }
 0x139   : > { %v1740_v55 = vpack.c.bf16 %v779_v52, %v777_v30  ;;  %v1742_v56 = vpack.c.bf16 %v784_v54, %v782_v53  ;;  %v781_v57 = vld [vmem:[%s2665_s29 + $0x20] sm:$0xff]  ;;  %v783_v58 = vld [vmem:[%s2665_s29 + $0x30] sm:$0xff]  ;;  %v786_v59 = vld [vmem:[%s2665_s29 + $0x48] sm:$0xff] }
 0x13a   : > { %1739 = vmatprep.subr.bf16.mxu0 %v1738_v31  ;;  %v788_v60 = vld [vmem:[%s2665_s29 + $0x58] sm:$0xff]  ;;  %v1744_v61 = vpack.c.bf16 %v783_v58, %v781_v57  ;;  %v785_v63 = vld [vmem:[%s2665_s29 + $0x40] sm:$0xff]  ;;  %v787_v3 = vld [vmem:[%s2665_s29 + $0x50] sm:$0xff] }
 0x13b   : > { %1741 = vmatpush1.bf16.msra.mxu0 %v1740_v55  ;;  %v1746_v62 = vpack.c.bf16 %v788_v60, %v786_v59  ;;  %v790_v4 = vld [vmem:[%s2665_s29 + $0x68] sm:$0xff]  ;;  %v792_v6 = vld [vmem:[%s2665_s29 + $0x78] sm:$0xff]  ;;  %v1748_v9 = vpack.c.bf16 %v787_v3, %v785_v63  ;;  %v789_v10 = vld [vmem:[%s2665_s29 + $0x60] sm:$0xff] }
 0x13c   : > { %1743 = vmatprep.subr.bf16.mxu0 %v1742_v56  ;;  %v1750_v11 = vpack.c.bf16 %v792_v6, %v790_v4  ;;  %v791_v15 = vld [vmem:[%s2665_s29 + $0x70] sm:$0xff]  ;;  %v955_v16 = vld [vmem:[%s2667_s10 + $0x8] sm:$0xff]  ;;  %v957_v17 = vld [vmem:[%s2667_s10 + $0x18] sm:$0xff] }
 0x13d   : > { %v794_v21 = vld [vmem:[%s2665_s29 + $0x88] sm:$0xff]  ;;  %v796_v22 = vld [vmem:[%s2665_s29 + $0x98] sm:$0xff]  ;;  %v1802_v23 = vpack.c.bf16 %v957_v17, %v955_v16  ;;  %v954_v24 = vld [vmem:[%s2667_s10] sm:$0xff]  ;;  %v1752_v26 = vpack.c.bf16 %v791_v15, %v789_v10 }
 0x13e   : > { %v956_v25 = vld [vmem:[%s2667_s10 + $0x10] sm:$0xff]  ;;  %v793_v27 = vld [vmem:[%s2665_s29 + $0x80] sm:$0xff]  ;;  %v959_v33 = vld [vmem:[%s2667_s10 + $0x28] sm:$0xff]  ;;  %v1754_v35 = vpack.c.bf16 %v796_v22, %v794_v21 }
 0x13f   : > { %1745 = vmatpush1.bf16.msra.mxu0 %v1744_v61  ;;  %1803 = vmatprep.subr.bf16.mxu1 %v1802_v23  ;;  %v1804_v32 = vpack.c.bf16 %v956_v25, %v954_v24  ;;  %v961_v34 = vld [vmem:[%s2667_s10 + $0x38] sm:$0xff]  ;;  %v795_v36 = vld [vmem:[%s2665_s29 + $0x90] sm:$0xff]  ;;  %v958_v1 = vld [vmem:[%s2667_s10 + $0x20] sm:$0xff] }
 0x140   : > { %1747 = vmatprep.subr.bf16.mxu0 %v1746_v62  ;;  %v1806_v0 = vpack.c.bf16 %v961_v34, %v959_v33  ;;  %v960_v2 = vld [vmem:[%s2667_s10 + $0x30] sm:$0xff]  ;;  %v798_v5 = vld [vmem:[%s2665_s29 + $0xa8] sm:$0xff]  ;;  %v800_v37 = vld [vmem:[%s2665_s29 + $0xb8] sm:$0xff]  ;;  %v1756_v41 = vpack.c.bf16 %v795_v36, %v793_v27 }
 0x141   : > { %1805 = vmatpush1.bf16.msra.mxu1 %v1804_v32  ;;  %v1808_v38 = vpack.c.bf16 %v960_v2, %v958_v1  ;;  %v963_v39 = vld [vmem:[%s2667_s10 + $0x48] sm:$0xff]  ;;  %v965_v40 = vld [vmem:[%s2667_s10 + $0x58] sm:$0xff]  ;;  %v797_v42 = vld [vmem:[%s2665_s29 + $0xa0] sm:$0xff]  ;;  %v1758_v43 = vpack.c.bf16 %v800_v37, %v798_v5 }
 0x142   : > { %1807 = vmatprep.subr.bf16.mxu1 %v1806_v0  ;;  %v1810_v7 = vpack.c.bf16 %v965_v40, %v963_v39  ;;  %v962_v8 = vld [vmem:[%s2667_s10 + $0x40] sm:$0xff]  ;;  %v964_v12 = vld [vmem:[%s2667_s10 + $0x50] sm:$0xff]  ;;  %v967_v44 = vld [vmem:[%s2667_s10 + $0x68] sm:$0xff] }
 0x143   : > { %1749 = vmatpush1.bf16.msra.mxu0 %v1748_v9  ;;  %v799_v13 = vld [vmem:[%s2665_s29 + $0xb0] sm:$0xff]  ;;  %v969_v45 = vld [vmem:[%s2667_s10 + $0x78] sm:$0xff]  ;;  %v802_v46 = vld [vmem:[%s2665_s29 + $0xc8] sm:$0xff]  ;;  %v1812_v48 = vpack.c.bf16 %v964_v12, %v962_v8 }
 0x144   : > { %1751 = vmatprep.subr.bf16.mxu0 %v1750_v11  ;;  %v804_v47 = vld [vmem:[%s2665_s29 + $0xd8] sm:$0xff]  ;;  %v1814_v14 = vpack.c.bf16 %v969_v45, %v967_v44  ;;  %v966_v18 = vld [vmem:[%s2667_s10 + $0x60] sm:$0xff]  ;;  %v968_v19 = vld [vmem:[%s2667_s10 + $0x70] sm:$0xff]  ;;  %v1760_v49 = vpack.c.bf16 %v799_v13, %v797_v42 }
 0x145   : > { %1809 = vmatpush1.bf16.msra.mxu1 %v1808_v38  ;;  %v971_v20 = vld [vmem:[%s2667_s10 + $0x88] sm:$0xff]  ;;  %v973_v50 = vld [vmem:[%s2667_s10 + $0x98] sm:$0xff]  ;;  %v1762_v51 = vpack.c.bf16 %v804_v47, %v802_v46  ;;  %v801_v28 = vld [vmem:[%s2665_s29 + $0xc0] sm:$0xff]  ;;  %v1816_v52 = vpack.c.bf16 %v968_v19, %v966_v18 }
 0x146   : > { %1811 = vmatprep.subr.bf16.mxu1 %v1810_v7  ;;  %v803_v29 = vld [vmem:[%s2665_s29 + $0xd0] sm:$0xff]  ;;  %v806_v30 = vld [vmem:[%s2665_s29 + $0xe8] sm:$0xff]  ;;  %v808_v31 = vld [vmem:[%s2665_s29 + $0xf8] sm:$0xff]  ;;  %v1818_v53 = vpack.c.bf16 %v973_v50, %v971_v20 }
 0x147   : > { %1753 = vmatpush1.bf16.msra.mxu0 %v1752_v26  ;;  %v970_v54 = vld [vmem:[%s2667_s10 + $0x80] sm:$0xff]  ;;  %v972_v55 = vld [vmem:[%s2667_s10 + $0x90] sm:$0xff]  ;;  %v1764_v56 = vpack.c.bf16 %v803_v29, %v801_v28  ;;  %v975_v57 = vld [vmem:[%s2667_s10 + $0xa8] sm:$0xff]  ;;  %v1766_v59 = vpack.c.bf16 %v808_v31, %v806_v30 }
 0x148   : > { %1755 = vmatprep.subr.bf16.mxu0 %v1754_v35  ;;  %v977_v58 = vld [vmem:[%s2667_s10 + $0xb8] sm:$0xff]  ;;  %v805_v60 = vld [vmem:[%s2665_s29 + $0xe0] sm:$0xff]  ;;  %v807_v61 = vld [vmem:[%s2665_s29 + $0xf0] sm:$0xff]  ;;  %v1820_v3 = vpack.c.bf16 %v972_v55, %v970_v54 }
 0x149   : > { %1813 = vmatpush1.bf16.msra.mxu1 %v1812_v48  ;;  %v810_v62 = vld [vmem:[%s2665_s29 + $0x108] sm:$0xff]  ;;  %v812_v63 = vld [vmem:[%s2665_s29 + $0x118] sm:$0xff]  ;;  %v1822_v4 = vpack.c.bf16 %v977_v58, %v975_v57  ;;  %v974_v6 = vld [vmem:[%s2667_s10 + $0xa0] sm:$0xff]  ;;  %v1768_v10 = vpack.c.bf16 %v807_v61, %v805_v60 }
 0x14a   : > { %1815 = vmatprep.subr.bf16.mxu1 %v1814_v14  ;;  %v976_v9 = vld [vmem:[%s2667_s10 + $0xb0] sm:$0xff]  ;;  %v979_v11 = vld [vmem:[%s2667_s10 + $0xc8] sm:$0xff]  ;;  %v981_v15 = vld [vmem:[%s2667_s10 + $0xd8] sm:$0xff]  ;;  %v1770_v16 = vpack.c.bf16 %v812_v63, %v810_v62 }
 0x14b   : > { %1757 = vmatpush1.bf16.msra.mxu0 %v1756_v41  ;;  %v809_v17 = vld [vmem:[%s2665_s29 + $0x100] sm:$0xff]  ;;  %v811_v21 = vld [vmem:[%s2665_s29 + $0x110] sm:$0xff]  ;;  %v814_v22 = vld [vmem:[%s2665_s29 + $0x128] sm:$0xff]  ;;  %v1824_v24 = vpack.c.bf16 %v976_v9, %v974_v6  ;;  %v1826_v25 = vpack.c.bf16 %v981_v15, %v979_v11 }
 0x14c   : > { %1759 = vmatprep.subr.bf16.mxu0 %v1758_v43  ;;  %v816_v23 = vld [vmem:[%s2665_s29 + $0x138] sm:$0xff]  ;;  %v978_v26 = vld [vmem:[%s2667_s10 + $0xc0] sm:$0xff]  ;;  %v980_v27 = vld [vmem:[%s2667_s10 + $0xd0] sm:$0xff]  ;;  %v1772_v32 = vpack.c.bf16 %v811_v21, %v809_v17 }
 0x14d   : > { %1817 = vmatpush1.bf16.msra.mxu1 %v1816_v52  ;;  %v983_v33 = vld [vmem:[%s2667_s10 + $0xe8] sm:$0xff]  ;;  %v985_v34 = vld [vmem:[%s2667_s10 + $0xf8] sm:$0xff]  ;;  %v1774_v35 = vpack.c.bf16 %v816_v23, %v814_v22  ;;  %v813_v36 = vld [vmem:[%s2665_s29 + $0x120] sm:$0xff]  ;;  %v1828_v37 = vpack.c.bf16 %v980_v27, %v978_v26 }
 0x14e   : > { %1819 = vmatprep.subr.bf16.mxu1 %v1818_v53  ;;  %v815_v0 = vld [vmem:[%s2665_s29 + $0x130] sm:$0xff]  ;;  %v762_v1 = vld [vmem:[#allocation2 + $0x8] sm:$0xff]  ;;  %v820_v5 = vld [vmem:[%s2665_s29 + $0x158] sm:$0xff]  ;;  %v1830_v38 = vpack.c.bf16 %v985_v34, %v983_v33 }
 0x14f   : > { %1761 = vmatpush1.bf16.msra.mxu0 %v1760_v49  ;;  %v818_v2 = vld [vmem:[%s2665_s29 + $0x148] sm:$0xff]  ;;  %905 = vmatprep.mubr.f32.mxu0 %v762_v1  ;;  %v982_v39 = vld [vmem:[%s2667_s10 + $0xe0] sm:$0xff]  ;;  %v984_v40 = vld [vmem:[%s2667_s10 + $0xf0] sm:$0xff]  ;;  %v1776_v41 = vpack.c.bf16 %v815_v0, %v813_v36 }
 0x150   : > { %1763 = vmatprep.subr.bf16.mxu0 %v1762_v51  ;;  %1082 = vmatprep.mubr.f32.mxu1 %v762_v1  ;;  %v987_v42 = vld [vmem:[%s2667_s10 + $0x108] sm:$0xff]  ;;  %v989_v7 = vld [vmem:[%s2667_s10 + $0x118] sm:$0xff]  ;;  %v1778_v8 = vpack.c.bf16 %v820_v5, %v818_v2  ;;  %v817_v12 = vld [vmem:[%s2665_s29 + $0x140] sm:$0xff]  ;;  %v1832_v45 = vpack.c.bf16 %v984_v40, %v982_v39 }
 0x151   : > { %1821 = vmatpush1.bf16.msra.mxu1 %v1820_v3  ;;  %v819_v43 = vld [vmem:[%s2665_s29 + $0x150] sm:$0xff]  ;;  %v822_v13 = vld [vmem:[%s2665_s29 + $0x168] sm:$0xff]  ;;  %v824_v44 = vld [vmem:[%s2665_s29 + $0x178] sm:$0xff]  ;;  %v1834_v46 = vpack.c.bf16 %v989_v7, %v987_v42 }
 0x152   : > { %1823 = vmatprep.subr.bf16.mxu1 %v1822_v4  ;;  %v986_v47 = vld [vmem:[%s2667_s10 + $0x100] sm:$0xff]  ;;  %v988_v48 = vld [vmem:[%s2667_s10 + $0x110] sm:$0xff]  ;;  %v1780_v14 = vpack.c.bf16 %v819_v43, %v817_v12  ;;  %v991_v18 = vld [vmem:[%s2667_s10 + $0x128] sm:$0xff]  ;;  %v1782_v49 = vpack.c.bf16 %v824_v44, %v822_v13 }
 0x153   : > { %1765 = vmatpush1.bf16.msra.mxu0 %v1764_v56  ;;  %v993_v19 = vld [vmem:[%s2667_s10 + $0x138] sm:$0xff]  ;;  %v821_v20 = vld [vmem:[%s2665_s29 + $0x160] sm:$0xff]  ;;  %v823_v50 = vld [vmem:[%s2665_s29 + $0x170] sm:$0xff]  ;;  %v1836_v29 = vpack.c.bf16 %v988_v48, %v986_v47 }
 0x154   : > { %1767 = vmatprep.subr.bf16.mxu0 %v1766_v59  ;;  %v826_v51 = vld [vmem:[%s2665_s29 + $0x188] sm:$0xff]  ;;  %v828_v28 = vld [vmem:[%s2665_s29 + $0x198] sm:$0xff]  ;;  %v1838_v30 = vpack.c.bf16 %v993_v19, %v991_v18  ;;  %v990_v31 = vld [vmem:[%s2667_s10 + $0x120] sm:$0xff]  ;;  %v1784_v53 = vpack.c.bf16 %v823_v50, %v821_v20 }
 0x155   : > { %1825 = vmatpush1.bf16.msra.mxu1 %v1824_v24  ;;  %v992_v52 = vld [vmem:[%s2667_s10 + $0x130] sm:$0xff]  ;;  %v995_v54 = vld [vmem:[%s2667_s10 + $0x148] sm:$0xff]  ;;  %v997_v55 = vld [vmem:[%s2667_s10 + $0x158] sm:$0xff]  ;;  %v1786_v56 = vpack.c.bf16 %v828_v28, %v826_v51 }
 0x156   : > { %1827 = vmatprep.subr.bf16.mxu1 %v1826_v25  ;;  %v825_v57 = vld [vmem:[%s2665_s29 + $0x180] sm:$0xff]  ;;  %v827_v58 = vld [vmem:[%s2665_s29 + $0x190] sm:$0xff]  ;;  %v830_v59 = vld [vmem:[%s2665_s29 + $0x1a8] sm:$0xff]  ;;  %v1840_v61 = vpack.c.bf16 %v992_v52, %v990_v31  ;;  %v1842_v62 = vpack.c.bf16 %v997_v55, %v995_v54 }
 0x157   : > { %1769 = vmatpush1.bf16.msra.mxu0 %v1768_v10  ;;  %v832_v60 = vld [vmem:[%s2665_s29 + $0x1b8] sm:$0xff]  ;;  %v994_v63 = vld [vmem:[%s2667_s10 + $0x140] sm:$0xff]  ;;  %v996_v3 = vld [vmem:[%s2667_s10 + $0x150] sm:$0xff]  ;;  %v1788_v4 = vpack.c.bf16 %v827_v58, %v825_v57 }
 0x158   : > { %1771 = vmatprep.subr.bf16.mxu0 %v1770_v16  ;;  %v999_v6 = vld [vmem:[%s2667_s10 + $0x168] sm:$0xff]  ;;  %v1001_v9 = vld [vmem:[%s2667_s10 + $0x178] sm:$0xff]  ;;  %v1790_v10 = vpack.c.bf16 %v832_v60, %v830_v59  ;;  %v829_v11 = vld [vmem:[%s2665_s29 + $0x1a0] sm:$0xff]  ;;  %v1844_v21 = vpack.c.bf16 %v996_v3, %v994_v63 }
 0x159   : > { %1829 = vmatpush1.bf16.msra.mxu1 %v1828_v37  ;;  %v831_v15 = vld [vmem:[%s2665_s29 + $0x1b0] sm:$0xff]  ;;  %v834_v16 = vld [vmem:[%s2665_s29 + $0x1c8] sm:$0xff]  ;;  %v836_v17 = vld [vmem:[%s2665_s29 + $0x1d8] sm:$0xff]  ;;  %v1846_v22 = vpack.c.bf16 %v1001_v9, %v999_v6 }
 0x15a   : > { %1831 = vmatprep.subr.bf16.mxu1 %v1830_v38  ;;  %v998_v23 = vld [vmem:[%s2667_s10 + $0x160] sm:$0xff]  ;;  %v1000_v24 = vld [vmem:[%s2667_s10 + $0x170] sm:$0xff]  ;;  %v1792_v25 = vpack.c.bf16 %v831_v15, %v829_v11  ;;  %v1003_v26 = vld [vmem:[%s2667_s10 + $0x188] sm:$0xff] }
 0x15b   : > { %1773 = vmatpush1.bf16.msra.mxu0 %v1772_v32  ;;  %v1005_v27 = vld [vmem:[%s2667_s10 + $0x198] sm:$0xff]  ;;  %v1794_v32 = vpack.c.bf16 %v836_v17, %v834_v16  ;;  %v833_v33 = vld [vmem:[%s2665_s29 + $0x1c0] sm:$0xff]  ;;  %v835_v34 = vld [vmem:[%s2665_s29 + $0x1d0] sm:$0xff]  ;;  %v1848_v0 = vpack.c.bf16 %v1000_v24, %v998_v23 }
 0x15c   : > { %1775 = vmatprep.subr.bf16.mxu0 %v1774_v35  ;;  %v838_v35 = vld [vmem:[%s2665_s29 + $0x1e8] sm:$0xff]  ;;  %v840_v36 = vld [vmem:[%s2665_s29 + $0x1f8] sm:$0xff]  ;;  %v1850_v1 = vpack.c.bf16 %v1005_v27, %v1003_v26  ;;  %v1002_v2 = vld [vmem:[%s2667_s10 + $0x180] sm:$0xff]  ;;  %v1796_v37 = vpack.c.bf16 %v835_v34, %v833_v33 }
 0x15d   : > { %1833 = vmatpush1.bf16.msra.mxu1 %v1832_v45  ;;  %v1004_v5 = vld [vmem:[%s2667_s10 + $0x190] sm:$0xff]  ;;  %v1007_v38 = vld [vmem:[%s2667_s10 + $0x1a8] sm:$0xff]  ;;  %v1009_v39 = vld [vmem:[%s2667_s10 + $0x1b8] sm:$0xff]  ;;  %v1798_v40 = vpack.c.bf16 %v840_v36, %v838_v35 }
 0x15e   : > { %1835 = vmatprep.subr.bf16.mxu1 %v1834_v46  ;;  %v839_v42 = vld [vmem:[%s2665_s29 + $0x1f0] sm:$0xff]  ;;  %v1852_v7 = vpack.c.bf16 %v1004_v5, %v1002_v2  ;;  %v1278_v12 = vld [vmem:[%s2663_s21 + $0x18] sm:$0xff]  ;;  %v1854_v43 = vpack.c.bf16 %v1009_v39, %v1007_v38  ;;  %v1006_v13 = vld [vmem:[%s2667_s10 + $0x1a0] sm:$0xff] }
 0x15f   : > { %1777 = vmatpush1.bf16.msra.mxu0 %v1776_v41  ;;  %v837_v41 = vld [vmem:[%s2665_s29 + $0x1e0] sm:$0xff]  ;;  %v1008_v44 = vld [vmem:[%s2667_s10 + $0x1b0] sm:$0xff]  ;;  %v1011_v46 = vld [vmem:[%s2667_s10 + $0x1c8] sm:$0xff] }
 0x160   : > { %1779 = vmatprep.subr.bf16.mxu0 %v1778_v8  ;;  %v1276_v8 = vld [vmem:[%s2663_s21 + $0x8] sm:$0xff]  ;;  %v1800_v45 = vpack.c.bf16 %v839_v42, %v837_v41  ;;  %v1013_v47 = vld [vmem:[%s2667_s10 + $0x1d8] sm:$0xff]  ;;  %v1277_v18 = vld [vmem:[%s2663_s21 + $0x10] sm:$0xff]  ;;  %v1856_v19 = vpack.c.bf16 %v1008_v44, %v1006_v13 }
 0x161   : > { %1837 = vmatpush1.bf16.msra.mxu1 %v1836_v29  ;;  %v1866_v48 = vpack.c.bf16 %v1278_v12, %v1276_v8  ;;  %v1282_v20 = vld [vmem:[%s2663_s21 + $0x38] sm:$0xff]  ;;  %v1858_v50 = vpack.c.bf16 %v1013_v47, %v1011_v46  ;;  %v1010_v51 = vld [vmem:[%s2667_s10 + $0x1c0] sm:$0xff]  ;;  %v1012_v28 = vld [vmem:[%s2667_s10 + $0x1d0] sm:$0xff] }
 0x162   : > { %1839 = vmatprep.subr.bf16.mxu1 %v1838_v30  ;;  %v761_v29 = vld [vmem:[#allocation2] sm:$0xff]  ;;  %v1015_v30 = vld [vmem:[%s2667_s10 + $0x1e8] sm:$0xff]  ;;  %v1017_v31 = vld [vmem:[%s2667_s10 + $0x1f8] sm:$0xff]  ;;  %v1860_v57 = vpack.c.bf16 %v1012_v28, %v1010_v51 }
 0x163   : > { %1781 = vmatpush1.bf16.msra.mxu0 %v1780_v14  ;;  %v1275_v14 = vld [vmem:[%s2663_s21] sm:$0xff]  ;;  %v1284_v58 = vld [vmem:[%s2663_s21 + $0x48] sm:$0xff]  ;;  %v1286_v59 = vld [vmem:[%s2663_s21 + $0x58] sm:$0xff]  ;;  %v1862_v60 = vpack.c.bf16 %v1017_v31, %v1015_v30 }
 0x164   : > { %1783 = vmatprep.subr.bf16.mxu0 %v1782_v49  ;;  %v1280_v49 = vld [vmem:[%s2663_s21 + $0x28] sm:$0xff]  ;;  %v1868_v52 = vpack.c.bf16 %v1277_v18, %v1275_v14  ;;  %v1279_v55 = vld [vmem:[%s2663_s21 + $0x20] sm:$0xff]  ;;  %v763_v63 = vld [vmem:[#allocation2 + $0x10] sm:$0xff]  ;;  %v1874_v6 = vpack.c.bf16 %v1286_v59, %v1284_v58 }
 0x165   : > { %1841 = vmatpush1.bf16.msra.mxu1 %v1840_v61  ;;  %v1870_v54 = vpack.c.bf16 %v1282_v20, %v1280_v49  ;;  %v1014_v61 = vld [vmem:[%s2667_s10 + $0x1e0] sm:$0xff]  ;;  %v1288_v15 = vld [vmem:[%s2663_s21 + $0x68] sm:$0xff]  ;;  %v1290_v16 = vld [vmem:[%s2663_s21 + $0x78] sm:$0xff] }
 0x166   : > { %1843 = vmatprep.subr.bf16.mxu1 %v1842_v62  ;;  %v1016_v62 = vld [vmem:[%s2667_s10 + $0x1f0] sm:$0xff]  ;;  %v1283_v9 = vld [vmem:[%s2663_s21 + $0x40] sm:$0xff]  ;;  %v1878_v23 = vpack.c.bf16 %v1290_v16, %v1288_v15  ;;  %v1292_v26 = vld [vmem:[%s2663_s21 + $0x88] sm:$0xff] }
 0x167   : > { %1785 = vmatpush1.bf16.msra.mxu0 %v1784_v53  ;;  %v764_v53 = vld [vmem:[#allocation2 + $0x18] sm:$0xff]  ;;  %v1864_v11 = vpack.c.bf16 %v1016_v62, %v1014_v61  ;;  %v765_v17 = vld [vmem:[#allocation2 + $0x20] sm:$0xff]  ;;  %v770_v34 = vld [vmem:[#allocation2 + $0x48] sm:$0xff] }
 0x168   : > { %1787 = vmatprep.subr.bf16.mxu0 %v1786_v56  ;;  %v1281_v56 = vld [vmem:[%s2663_s21 + $0x30] sm:$0xff]  ;;  %v1287_v24 = vld [vmem:[%s2663_s21 + $0x60] sm:$0xff]  ;;  %v1294_v27 = vld [vmem:[%s2663_s21 + $0x98] sm:$0xff] }
 0x169   : > { %1845 = vmatpush1.bf16.msra.mxu1 %v1844_v21  ;;  %v1872_v3 = vpack.c.bf16 %v1281_v56, %v1279_v55  ;;  %v1882_v35 = vpack.c.bf16 %v1294_v27, %v1292_v26  ;;  %v1291_v36 = vld [vmem:[%s2663_s21 + $0x80] sm:$0xff]  ;;  %v1298_v2 = vld [vmem:[%s2663_s21 + $0xb8] sm:$0xff]  ;;  %v1297_v41 = vld [vmem:[%s2663_s21 + $0xb0] sm:$0xff] }
 0x16a   : > { %1847 = vmatprep.subr.bf16.mxu1 %v1846_v22  ;;  %v768_v22 = vld [vmem:[#allocation2 + $0x38] sm:$0xff]  ;;  %v769_v5 = vld [vmem:[#allocation2 + $0x40] sm:$0xff]  ;;  %v1300_v42 = vld [vmem:[%s2663_s21 + $0xc8] sm:$0xff] }
 0x16b   : > { %1789 = vmatpush1.bf16.msra.mxu0 %v1788_v4  ;;  %v766_v4 = vld [vmem:[#allocation2 + $0x28] sm:$0xff]  ;;  %v772_v38 = vld [vmem:[#allocation2 + $0x58] sm:$0xff]  ;;  %v771_v8 = vld [vmem:[#allocation2 + $0x50] sm:$0xff] }
 0x16c   : > { %1791 = vmatprep.subr.bf16.mxu0 %v1790_v10  ;;  %v1285_v10 = vld [vmem:[%s2663_s21 + $0x50] sm:$0xff]  ;;  %v1299_v44 = vld [vmem:[%s2663_s21 + $0xc0] sm:$0xff]  ;;  %v1304_v46 = vld [vmem:[%s2663_s21 + $0xe8] sm:$0xff] }
 0x16d   : > { %1849 = vmatpush1.bf16.msra.mxu1 %v1848_v0  ;;  %v1876_v21 = vpack.c.bf16 %v1285_v10, %v1283_v9  ;;  %v1293_v0 = vld [vmem:[%s2663_s21 + $0x90] sm:$0xff]  ;;  %v1306_v47 = vld [vmem:[%s2663_s21 + $0xf8] sm:$0xff]  ;;  %v1303_v49 = vld [vmem:[%s2663_s21 + $0xe0] sm:$0xff] }
 0x16e   : > { %1851 = vmatprep.subr.bf16.mxu1 %v1850_v1  ;;  %v1296_v1 = vld [vmem:[%s2663_s21 + $0xa8] sm:$0xff]  ;;  %v776_v18 = vld [vmem:[#allocation2 + $0x78] sm:$0xff]  ;;  %v1305_v20 = vld [vmem:[%s2663_s21 + $0xf0] sm:$0xff] }
 0x16f   : > { %1793 = vmatpush1.bf16.msra.mxu0 %v1792_v25  ;;  %v1289_v25 = vld [vmem:[%s2663_s21 + $0x70] sm:$0xff]  ;;  %v1886_v39 = vpack.c.bf16 %v1298_v2, %v1296_v1  ;;  %v1896_v51 = vpack.c.bf16 %v1305_v20, %v1303_v49  ;;  %v1308_v28 = vld [vmem:[%s2663_s21 + $0x108] sm:$0xff]  ;;  %v1307_v31 = vld [vmem:[%s2663_s21 + $0x100] sm:$0xff] }
 0x170   : > { %1795 = vmatprep.subr.bf16.mxu0 %v1794_v32  ;;  %v767_v32 = vld [vmem:[#allocation2 + $0x30] sm:$0xff]  ;;  %v1880_v33 = vpack.c.bf16 %v1289_v25, %v1287_v24  ;;  %v1314_v55 = vld [vmem:[%s2663_s21 + $0x138] sm:$0xff]  ;;  %v1328_v26 = vld [vmem:[%s2663_s21 + $0x1a8] sm:$0xff] }
 0x171   : > { %1853 = vmatpush1.bf16.msra.mxu1 %v1852_v7  ;;  %v1302_v7 = vld [vmem:[%s2663_s21 + $0xd8] sm:$0xff]  ;;  %v1313_v58 = vld [vmem:[%s2663_s21 + $0x130] sm:$0xff]  ;;  %v1331_v2 = vld [vmem:[%s2663_s21 + $0x1c0] sm:$0xff] }
 0x172   : > { %1855 = vmatprep.subr.bf16.mxu1 %v1854_v43  ;;  %v774_v43 = vld [vmem:[#allocation2 + $0x68] sm:$0xff]  ;;  %v1890_v13 = vpack.c.bf16 %v1302_v7, %v1300_v42  ;;  %v1318_v61 = vld [vmem:[%s2663_s21 + $0x158] sm:$0xff]  ;;  %v1321_v15 = vld [vmem:[%s2663_s21 + $0x170] sm:$0xff] }
 0x173   : > { %1797 = vmatpush1.bf16.msra.mxu0 %v1796_v37  ;;  %v1884_v37 = vpack.c.bf16 %v1293_v0, %v1291_v36  ;;  %v1322_v9 = vld [vmem:[%s2663_s21 + $0x178] sm:$0xff]  ;;  %v1325_v24 = vld [vmem:[%s2663_s21 + $0x190] sm:$0xff]  ;;  %v1332_v36 = vld [vmem:[%s2663_s21 + $0x1c8] sm:$0xff] }
 0x174   : > { %1799 = vmatprep.subr.bf16.mxu0 %v1798_v40  ;;  %v1295_v40 = vld [vmem:[%s2663_s21 + $0xa0] sm:$0xff]  ;;  %v1330_v27 = vld [vmem:[%s2663_s21 + $0x1b8] sm:$0xff]  ;;  %v1337_v42 = vld [vmem:[%s2663_s21 + $0x1f0] sm:$0xff] }
 0x175   : > { %1857 = vmatpush1.bf16.msra.mxu1 %v1856_v19  ;;  %v1888_v12 = vpack.c.bf16 %v1297_v41, %v1295_v40  ;;  %v1894_v19 = vpack.c.bf16 %v1306_v47, %v1304_v46  ;;  %v1334_v0 = vld [vmem:[%s2663_s21 + $0x1d8] sm:$0xff]  ;;  %v1335_v41 = vld [vmem:[%s2663_s21 + $0x1e0] sm:$0xff] }
 0x176   : > { %1859 = vmatprep.subr.bf16.mxu1 %v1858_v50  ;;  %v775_v50 = vld [vmem:[#allocation2 + $0x70] sm:$0xff]  ;;  %v1922_v1 = vpack.c.bf16 %v1334_v0, %v1332_v36  ;;  %v1928_v7 = vpack.c.bf16 %v1337_v42, %v1335_v41 }
 0x177   : > { %1801 = vmatpush1.bf16.msra.mxu0 %v1800_v45  ;;  %v1301_v45 = vld [vmem:[%s2663_s21 + $0xd0] sm:$0xff] }
 0x178   : > { %1867 = vmatprep.subr.bf16.mxu0 %v1866_v48  ;;  %v1892_v14 = vpack.c.bf16 %v1301_v45, %v1299_v44 }
 0x179   : > { %1861 = vmatpush1.bf16.msra.mxu1 %v1860_v57  ;;  %v1311_v57 = vld [vmem:[%s2663_s21 + $0x120] sm:$0xff] }
 0x17a   : > { %906 = vmatmul.mubr.f32.vlgmr.msra.gmra.mrb[0].mxu0 %v761_v29  ;;  %1863 = vmatprep.subr.bf16.mxu1 %v1862_v60  ;;  %v1904_v59 = vpack.c.bf16 %v1313_v58, %v1311_v57  ;;  %v1316_v60 = vld [vmem:[%s2663_s21 + $0x148] sm:$0xff] }
 0x17b   : > { %911 = vmatprep.mubr.f32.mxu0 %v764_v53  ;;  %1869 = vmatpush1.bf16.msra.mxu0 %v1868_v52  ;;  %v1906_v62 = vpack.c.bf16 %v1318_v61, %v1316_v60 }
 0x17c   : > { %1871 = vmatprep.subr.bf16.mxu0 %v1870_v54 }
 0x17d   : > { %1865 = vmatpush1.bf16.msra.mxu1 %v1864_v11  ;;  %v1319_v11 = vld [vmem:[%s2663_s21 + $0x160] sm:$0xff] }
 0x17e   : > { %912 = vmatmul.mubr.f32.gmra.mrb[2].mxu0 %v763_v63  ;;  %1930 = vmatprep.subr.bf16.mxu1 %v1866_v48  ;;  %v773_v48 = vld [vmem:[#allocation2 + $0x60] sm:$0xff]  ;;  %v1912_v16 = vpack.c.bf16 %v1321_v15, %v1319_v11 }
 0x17f   : > { %917 = vmatprep.mubr.f32.mxu0 %v766_v4  ;;  %1873 = vmatpush1.bf16.msra.mxu0 %v1872_v3 }
 0x180   : > { %1875 = vmatprep.subr.bf16.mxu0 %v1874_v6  ;;  %1083 = vmatmul.mubr.f32.vlgmr.msra.gmra.mrb[0].mxu1 %v761_v29  ;;  %v1310_v29 = vld [vmem:[%s2663_s21 + $0x118] sm:$0xff] }
 0x181   : > { %1088 = vmatprep.mubr.f32.mxu1 %v764_v53  ;;  %1946 = vmatpush1.bf16.msra.mxu1 %v1868_v52  ;;  %v1898_v30 = vpack.c.bf16 %v1310_v29, %v1308_v28  ;;  %v1309_v52 = vld [vmem:[%s2663_s21 + $0x110] sm:$0xff] }
 0x182   : > { %918 = vmatmul.mubr.f32.gmra.mrb[4].mxu0 %v765_v17  ;;  %1931 = vmatprep.subr.bf16.mxu1 %v1870_v54  ;;  %v1900_v53 = vpack.c.bf16 %v1309_v52, %v1307_v31  ;;  %v1312_v54 = vld [vmem:[%s2663_s21 + $0x128] sm:$0xff] }
 0x183   : > { %923 = vmatprep.mubr.f32.mxu0 %v768_v22  ;;  %1877 = vmatpush1.bf16.msra.mxu0 %v1876_v21  ;;  %v1902_v56 = vpack.c.bf16 %v1314_v55, %v1312_v54 }
 0x184   : > { %1879 = vmatprep.subr.bf16.mxu0 %v1878_v23  ;;  %1089 = vmatmul.mubr.f32.gmra.mrb[2].mxu1 %v763_v63  ;;  %v1315_v63 = vld [vmem:[%s2663_s21 + $0x140] sm:$0xff] }
 0x185   : > { %1094 = vmatprep.mubr.f32.mxu1 %v766_v4  ;;  %1947 = vmatpush1.bf16.msra.mxu1 %v1872_v3  ;;  %v1317_v3 = vld [vmem:[%s2663_s21 + $0x150] sm:$0xff] }
 0x186   : > { %924 = vmatmul.mubr.f32.gmra.mrb[6].mxu0 %v767_v32  ;;  %1932 = vmatprep.subr.bf16.mxu1 %v1874_v6  ;;  %v1908_v4 = vpack.c.bf16 %v1317_v3, %v1315_v63  ;;  %v1320_v6 = vld [vmem:[%s2663_s21 + $0x168] sm:$0xff] }
 0x187   : > { %929 = vmatprep.mubr.f32.mxu0 %v770_v34  ;;  %1881 = vmatpush1.bf16.msra.mxu0 %v1880_v33  ;;  %v1910_v10 = vpack.c.bf16 %v1322_v9, %v1320_v6 }
 0x188   : > { %1883 = vmatprep.subr.bf16.mxu0 %v1882_v35  ;;  %1095 = vmatmul.mubr.f32.gmra.mrb[4].mxu1 %v765_v17  ;;  %v1324_v17 = vld [vmem:[%s2663_s21 + $0x188] sm:$0xff] }
 0x189   : > { %1100 = vmatprep.mubr.f32.mxu1 %v768_v22  ;;  %1948 = vmatpush1.bf16.msra.mxu1 %v1876_v21  ;;  %v1326_v21 = vld [vmem:[%s2663_s21 + $0x198] sm:$0xff] }
 0x18a   : > { %930 = vmatmul.mubr.f32.gmra.mrb[8].mxu0 %v769_v5  ;;  %1933 = vmatprep.subr.bf16.mxu1 %v1878_v23  ;;  %v1914_v22 = vpack.c.bf16 %v1326_v21, %v1324_v17  ;;  %v1323_v23 = vld [vmem:[%s2663_s21 + $0x180] sm:$0xff] }
 0x18b   : > { %935 = vmatprep.mubr.f32.mxu0 %v772_v38  ;;  %1885 = vmatpush1.bf16.msra.mxu0 %v1884_v37  ;;  %v1916_v25 = vpack.c.bf16 %v1325_v24, %v1323_v23 }
 0x18c   : > { %1887 = vmatprep.subr.bf16.mxu0 %v1886_v39  ;;  %1101 = vmatmul.mubr.f32.gmra.mrb[6].mxu1 %v767_v32  ;;  %v1918_v32 = vpack.c.bf16 %v1330_v27, %v1328_v26 }
 0x18d   : > { %1106 = vmatprep.mubr.f32.mxu1 %v770_v34  ;;  %1949 = vmatpush1.bf16.msra.mxu1 %v1880_v33  ;;  %v1327_v33 = vld [vmem:[%s2663_s21 + $0x1a0] sm:$0xff]  ;;  %v1329_v34 = vld [vmem:[%s2663_s21 + $0x1b0] sm:$0xff] }
 0x18e   : > { %936 = vmatmul.mubr.f32.gmra.mrb[10].mxu0 %v771_v8  ;;  %1934 = vmatprep.subr.bf16.mxu1 %v1882_v35  ;;  %v1920_v35 = vpack.c.bf16 %v1329_v34, %v1327_v33 }
 0x18f   : > { %941 = vmatprep.mubr.f32.mxu0 %v774_v43  ;;  %1889 = vmatpush1.bf16.msra.mxu0 %v1888_v12 }
 0x190   : > { %1891 = vmatprep.subr.bf16.mxu0 %v1890_v13  ;;  %1107 = vmatmul.mubr.f32.gmra.mrb[8].mxu1 %v769_v5  ;;  %v1333_v5 = vld [vmem:[%s2663_s21 + $0x1d0] sm:$0xff] }
 0x191   : > { %1112 = vmatprep.mubr.f32.mxu1 %v772_v38  ;;  %1950 = vmatpush1.bf16.msra.mxu1 %v1884_v37  ;;  %v1924_v37 = vpack.c.bf16 %v1333_v5, %v1331_v2  ;;  %v1336_v38 = vld [vmem:[%s2663_s21 + $0x1e8] sm:$0xff] }
 0x192   : > { %942 = vmatmul.mubr.f32.gmra.mrb[12].mxu0 %v773_v48  ;;  %1935 = vmatprep.subr.bf16.mxu1 %v1886_v39  ;;  %v1338_v39 = vld [vmem:[%s2663_s21 + $0x1f8] sm:$0xff] }
 0x193   : > { %947 = vmatprep.mubr.f32.mxu0 %v776_v18  ;;  %1893 = vmatpush1.bf16.msra.mxu0 %v1892_v14  ;;  %v1926_v40 = vpack.c.bf16 %v1338_v39, %v1336_v38 }
 0x194   : > { %1895 = vmatprep.subr.bf16.mxu0 %v1894_v19  ;;  %1113 = vmatmul.mubr.f32.gmra.mrb[10].mxu1 %v771_v8 }
 0x195   : > { %1118 = vmatprep.mubr.f32.mxu1 %v774_v43  ;;  %1951 = vmatpush1.bf16.msra.mxu1 %v1888_v12 }
 0x196   : > { %948 = vmatmul.mubr.f32.gmra.mrb[14].mxu0 %v775_v50  ;;  %1936 = vmatprep.subr.bf16.mxu1 %v1890_v13 }
 0x197   : > { %1897 = vmatpush1.bf16.msra.mxu0 %v1896_v51 }
 0x198   : > { %1119 = vmatmul.mubr.f32.gmra.mrb[12].mxu1 %v773_v48  ;;  %1899 = vmatprep.subr.bf16.mxu0 %v1898_v30 }
 0x199   : > { %1124 = vmatprep.mubr.f32.mxu1 %v776_v18  ;;  %1952 = vmatpush1.bf16.msra.mxu1 %v1892_v14 }
 0x19a   : > { %1937 = vmatprep.subr.bf16.mxu1 %v1894_v19 }
 0x19b   : > { %1901 = vmatpush1.bf16.msra.mxu0 %v1900_v53 }
 0x19c   : > { %1125 = vmatmul.mubr.f32.gmra.mrb[14].mxu1 %v775_v50  ;;  %1903 = vmatprep.subr.bf16.mxu0 %v1902_v56 }
 0x19d   : > { %1953 = vmatpush1.bf16.msra.mxu1 %v1896_v51 }
 0x19e   : > { %1938 = vmatprep.subr.bf16.mxu1 %v1898_v30 }
 0x19f   : > { %1905 = vmatpush1.bf16.msra.mxu0 %v1904_v59 }
 0x1a0   : > { %1907 = vmatprep.subr.bf16.mxu0 %v1906_v62 }
 0x1a1   : > { %1954 = vmatpush1.bf16.msra.mxu1 %v1900_v53 }
 0x1a2   : > { %1939 = vmatprep.subr.bf16.mxu1 %v1902_v56 }
 0x1a3   : > { %1909 = vmatpush1.bf16.msra.mxu0 %v1908_v4 }
 0x1a4   : > { %1911 = vmatprep.subr.bf16.mxu0 %v1910_v10 }
 0x1a5   : > { %1955 = vmatpush1.bf16.msra.mxu1 %v1904_v59 }
 0x1a6   : > { %1940 = vmatprep.subr.bf16.mxu1 %v1906_v62 }
 0x1a7   : > { %1913 = vmatpush1.bf16.msra.mxu0 %v1912_v16 }
 0x1a8   : > { %1915 = vmatprep.subr.bf16.mxu0 %v1914_v22 }
 0x1a9   : > { %1956 = vmatpush1.bf16.msra.mxu1 %v1908_v4 }
 0x1aa   : > { %1941 = vmatprep.subr.bf16.mxu1 %v1910_v10 }
 0x1ab   : > { %1917 = vmatpush1.bf16.msra.mxu0 %v1916_v25 }
 0x1ac   : > { %1919 = vmatprep.subr.bf16.mxu0 %v1918_v32 }
 0x1ad   : > { %1957 = vmatpush1.bf16.msra.mxu1 %v1912_v16 }
 0x1ae   : > { %1942 = vmatprep.subr.bf16.mxu1 %v1914_v22 }
 0x1af   : > { %1921 = vmatpush1.bf16.msra.mxu0 %v1920_v35 }
 0x1b0   : > { %1923 = vmatprep.subr.bf16.mxu0 %v1922_v1 }
 0x1b1   : > { %1958 = vmatpush1.bf16.msra.mxu1 %v1916_v25 }
 0x1b2   : > { %1943 = vmatprep.subr.bf16.mxu1 %v1918_v32 }
 0x1b3   : > { %1925 = vmatpush1.bf16.msra.mxu0 %v1924_v37 }
 0x1b4   : > { %1927 = vmatprep.subr.bf16.mxu0 %v1926_v40 }
 0x1b5   : > { %1959 = vmatpush1.bf16.msra.mxu1 %v1920_v35 }
 0x1b6   : > { %1944 = vmatprep.subr.bf16.mxu1 %v1922_v1 }
 0x1b7   : > { %1929 = vmatpush1.bf16.msra.mxu0 %v1928_v7 }
 0x1b9   : > { %1960 = vmatpush1.bf16.msra.mxu1 %v1924_v37 }
 0x1ba   : > { %1945 = vmatprep.subr.bf16.mxu1 %v1926_v40 }
 0x1bd   : > { %1961 = vmatpush1.bf16.msra.mxu1 %v1928_v7 }
 0x24d   : > { %v2963_v8 = vpop.f32.mrb[0].mxu0 }
 0x24e   : > { %v1709_v12 = vmul.f32 -1.442695, %v2963_v8  ;;  %v2966_v43 = vpop.f32.mrb[1].mxu0 }
 0x24f   : > { %v1710_v13 = vmul.f32 -1.442695, %v2966_v43 }
 0x250   : > { %2068 = vpow2.f32 %v1709_v12 }
 0x251   : > { %2070 = vpow2.f32 %v1710_v13  ;;  %v2969_v44 = vpop.f32.mrb[2].mxu0 }
 0x252   : > { %v1711_v45 = vmul.f32 -1.442695, %v2969_v44  ;;  %v2972_v46 = vpop.f32.mrb[3].mxu0 }
 0x253   : > { %v1712_v47 = vmul.f32 -1.442695, %v2972_v46  ;;  %v2981_v49 = vpop.f32.mrb[0].mxu1 }
 0x254   : > { %2072 = vpow2.f32 %v1711_v45  ;;  %v2983_v20 = vpop.f32.mrb[1].mxu1 }
 0x255   : > { %2074 = vpow2.f32 %v1712_v47  ;;  %v2975_v48 = vpop.f32.mrb[4].mxu0 }
 0x256   : > { %v1713_v14 = vmul.f32 -1.442695, %v2975_v48  ;;  %v2978_v18 = vpop.f32.mrb[5].mxu0 }
 0x257   : > { %v1714_v19 = vmul.f32 -1.442695, %v2978_v18  ;;  %v2991_v53 = vpop.f32.mrb[2].mxu1 }
 0x258   : > { %2076 = vpow2.f32 %v1713_v14  ;;  %v2993_v55 = vpop.f32.mrb[3].mxu1 }
 0x259   : > { %2078 = vpow2.f32 %v1714_v19  ;;  %v2985_v50 = vpop.f32.mrb[6].mxu0 }
 0x25a   : > { %v2069_v51 = vpop.eup %2068  ;;  %v1715_v28 = vmul.f32 -1.442695, %v2985_v50  ;;  %v2988_v29 = vpop.f32.mrb[7].mxu0 }
 0x25b   : > { %v2071_v30 = vpop.eup %2070  ;;  %v1179_v31 = vadd.f32 1.0, %v2069_v51  ;;  %v1716_v52 = vmul.f32 -1.442695, %v2988_v29  ;;  %v3001_v63 = vpop.f32.mrb[4].mxu1 }
 0x25c   : > { %v1180_v54 = vadd.f32 1.0, %v2071_v30  ;;  %2080 = vpow2.f32 %v1715_v28  ;;  %v3003_v4 = vpop.f32.mrb[5].mxu1 }
 0x25d   : > { %2082 = vrcp.f32 %v1179_v31  ;;  %v2995_v56 = vpop.f32.mrb[8].mxu0 }
 0x25e   : > { %v2073_v57 = vpop.eup %2072  ;;  %2084 = vrcp.f32 %v1180_v54  ;;  %v1717_v58 = vmul.f32 -1.442695, %v2995_v56  ;;  %v2998_v59 = vpop.f32.mrb[9].mxu0 }
 0x25f   : > { %v2075_v60 = vpop.eup %2074  ;;  %v1181_v61 = vadd.f32 1.0, %v2073_v57  ;;  %2086 = vpow2.f32 %v1716_v52  ;;  %v1718_v62 = vmul.f32 -1.442695, %v2998_v59  ;;  %v3011_v21 = vpop.f32.mrb[6].mxu1 }
 0x260   : > { %v1182_v3 = vadd.f32 1.0, %v2075_v60  ;;  %2088 = vpow2.f32 %v1717_v58  ;;  %v3013_v23 = vpop.f32.mrb[7].mxu1 }
 0x261   : > { %2090 = vrcp.f32 %v1181_v61  ;;  %v3005_v6 = vpop.f32.mrb[10].mxu0 }
 0x262   : > { %v2077_v9 = vpop.eup %2076  ;;  %2092 = vrcp.f32 %v1182_v3  ;;  %v1719_v10 = vmul.f32 -1.442695, %v3005_v6  ;;  %v3008_v11 = vpop.f32.mrb[11].mxu0 }
 0x263   : > { %v2079_v15 = vpop.eup %2078  ;;  %v1183_v16 = vadd.f32 1.0, %v2077_v9  ;;  %2094 = vpow2.f32 %v1718_v62  ;;  %v1720_v17 = vmul.f32 -1.442695, %v3008_v11  ;;  %v3021_v35 = vpop.f32.mrb[8].mxu1 }
 0x264   : > { %v1184_v22 = vadd.f32 1.0, %v2079_v15  ;;  %2096 = vpow2.f32 %v1719_v10  ;;  %v3024_v1 = vpop.f32.mrb[9].mxu1 }
 0x265   : > { %2098 = vrcp.f32 %v1183_v16  ;;  %v3015_v24 = vpop.f32.mrb[12].mxu0 }
 0x266   : > { %v2081_v25 = vpop.eup %2080  ;;  %2100 = vrcp.f32 %v1184_v22  ;;  %v1721_v26 = vmul.f32 -1.442695, %v3015_v24  ;;  %v3018_v27 = vpop.f32.mrb[13].mxu0 }
 0x267   : > { %v2083_v32 = vpop.eup %2082  ;;  %v1185_v33 = vadd.f32 1.0, %v2081_v25  ;;  %2102 = vpow2.f32 %v1720_v17  ;;  %v1722_v34 = vmul.f32 -1.442695, %v3018_v27  ;;  %v3035_v45 = vpop.f32.mrb[10].mxu1 }
 0x268   : > { %v2085_v36 = vpop.eup %2084  ;;  %v1227_v0 = vmul.f32 %v2083_v32, %v2963_v8  ;;  %2104 = vpow2.f32 %v1721_v26  ;;  %v3038_v14 = vpop.f32.mrb[11].mxu1 }
 0x269   : > { %v2087_v2 = vpop.eup %2086  ;;  %v1228_v5 = vmul.f32 %v2085_v36, %v2966_v43  ;;  %2106 = vrcp.f32 %v1185_v33  ;;  %v3027_v37 = vpop.f32.mrb[14].mxu0 }
 0x26a   : > { %v2089_v38 = vpop.eup %2088  ;;  %v1186_v39 = vadd.f32 1.0, %v2087_v2  ;;  %2108 = vpow2.f32 %v1722_v34  ;;  %v1243_v40 = vmul.f32 %v1227_v0, %v2981_v49  ;;  %v1723_v41 = vmul.f32 -1.442695, %v3027_v37  ;;  %v3031_v42 = vpop.f32.mrb[15].mxu0 }
 0x26b   : > { %v2091_v7 = vpop.eup %2090  ;;  %v1187_v8 = vadd.f32 1.0, %v2089_v38  ;;  %v1244_v12 = vmul.f32 %v1228_v5, %v2983_v20  ;;  %v1724_v13 = vmul.f32 -1.442695, %v3031_v42 }
 0x26c   : > { %v2093_v43 = vpop.eup %2092  ;;  %v1229_v47 = vmul.f32 %v2091_v7, %v2969_v44  ;;  %2110 = vrcp.f32 %v1186_v39  ;;  %v1120_v44 = vpop.f32.mrb[12].mxu1 }
 0x26d   : > { %v2095_v19 = vpop.eup %2094  ;;  %v1230_v49 = vmul.f32 %v2093_v43, %v2972_v46  ;;  %2112 = vrcp.f32 %v1187_v8  ;;  %1403 = vmatprep.mubr.f32.mxu0 %v1244_v12  ;;  %v1122_v58 = vpop.f32.mrb[13].mxu1  ;;  %v1260_v43 = vld [vmem:[#allocation3 + $0x8] sm:$0xff] }
 0x26e   : > { %v2097_v51 = vpop.eup %2096  ;;  %v1188_v28 = vadd.f32 1.0, %v2095_v19  ;;  %2114 = vpow2.f32 %v1723_v41  ;;  %v1245_v20 = vmul.f32 %v1229_v47, %v2991_v53  ;;  %1404 = vmatmul.mubr.f32.vlgmr.msra.gmra.mrb[16].mxu0 %v1243_v40 }
 0x26f   : > { %v2099_v30 = vpop.eup %2098  ;;  %v1189_v31 = vadd.f32 1.0, %v2097_v51  ;;  %2116 = vpow2.f32 %v1724_v13  ;;  %v1246_v52 = vmul.f32 %v1230_v49, %v2993_v55  ;;  %v1126_v10 = vpop.f32.mrb[14].mxu1  ;;  %v1261_v49 = vld [vmem:[#allocation3 + $0x10] sm:$0xff]  ;;  %v1262_v51 = vld [vmem:[#allocation3 + $0x18] sm:$0xff] }
 0x270   : > { %v2101_v54 = vpop.eup %2100  ;;  %v1231_v57 = vmul.f32 %v2099_v30, %v2975_v48  ;;  %2118 = vrcp.f32 %v1188_v28  ;;  %v1128_v16 = vpop.f32.mrb[15].mxu1 }
 0x271   : > { %v2103_v46 = vpop.eup %2102  ;;  %v1232_v60 = vmul.f32 %v2101_v54, %v2978_v18  ;;  %2120 = vrcp.f32 %v1189_v31  ;;  %1409 = vmatprep.mubr.f32.mxu0 %v1246_v52  ;;  %v1264_v31 = vld [vmem:[#allocation3 + $0x28] sm:$0xff] }
 0x272   : > { %v2105_v61 = vpop.eup %2104  ;;  %v1190_v62 = vadd.f32 1.0, %v2103_v46  ;;  %v1247_v53 = vmul.f32 %v1231_v57, %v3001_v63  ;;  %1410 = vmatmul.mubr.f32.gmra.mrb[18].mxu0 %v1245_v20  ;;  %v1266_v46 = vld [vmem:[#allocation3 + $0x38] sm:$0xff] }
 0x273   : > { %v2107_v3 = vpop.eup %2106  ;;  %v1191_v9 = vadd.f32 1.0, %v2105_v61  ;;  %v1248_v55 = vmul.f32 %v1232_v60, %v3003_v4 }
 0x274   : > { %v2109_v15 = vpop.eup %2108  ;;  %v1233_v48 = vmul.f32 %v2107_v3, %v2985_v50  ;;  %2122 = vrcp.f32 %v1190_v62  ;;  %v1267_v3 = vld [vmem:[#allocation3 + $0x40] sm:$0xff] }
 0x275   : > { %2124 = vrcp.f32 %v1191_v9  ;;  %v1192_v17 = vadd.f32 1.0, %v2109_v15  ;;  %1415 = vmatprep.mubr.f32.mxu0 %v1248_v55  ;;  %v1268_v9 = vld [vmem:[#allocation3 + $0x48] sm:$0xff] }
 0x276   : > { %v2111_v18 = vpop.eup %2110  ;;  %v1249_v22 = vmul.f32 %v1233_v48, %v3011_v21  ;;  %1416 = vmatmul.mubr.f32.gmra.mrb[20].mxu0 %v1247_v53 }
 0x277   : > { %v2113_v25 = vpop.eup %2112  ;;  %v1234_v63 = vmul.f32 %v2111_v18, %v2988_v29  ;;  %2126 = vrcp.f32 %v1192_v17  ;;  %v1270_v17 = vld [vmem:[#allocation3 + $0x58] sm:$0xff] }
 0x278   : > { %v2115_v26 = vpop.eup %2114  ;;  %v1235_v4 = vmul.f32 %v2113_v25, %v2995_v56 }
 0x279   : > { %v2117_v32 = vpop.eup %2116  ;;  %v1193_v33 = vadd.f32 1.0, %v2115_v26  ;;  %v1250_v50 = vmul.f32 %v1234_v63, %v3013_v23  ;;  %v1271_v26 = vld [vmem:[#allocation3 + $0x60] sm:$0xff] }
 0x27a   : > { %v2119_v34 = vpop.eup %2118  ;;  %v1194_v36 = vadd.f32 1.0, %v2117_v32  ;;  %v1251_v0 = vmul.f32 %v1235_v4, %v3021_v35  ;;  %v1272_v4 = vld [vmem:[#allocation3 + $0x68] sm:$0xff] }
 0x27b   : > { %v2121_v2 = vpop.eup %2120  ;;  %v1236_v5 = vmul.f32 %v2119_v34, %v2998_v59  ;;  %2128 = vrcp.f32 %v1193_v33  ;;  %1421 = vmatprep.mubr.f32.mxu0 %v1250_v50 }
 0x27c   : > { %v1237_v21 = vmul.f32 %v2121_v2, %v3005_v6  ;;  %2130 = vrcp.f32 %v1194_v36  ;;  %1422 = vmatmul.mubr.f32.gmra.mrb[22].mxu0 %v1249_v22  ;;  %v1273_v36 = vld [vmem:[#allocation3 + $0x70] sm:$0xff] }
 0x27d   : > { %v1252_v29 = vmul.f32 %v1236_v5, %v3024_v1 }
 0x27e   : > { %v2123_v56 = vpop.eup %2122  ;;  %v1253_v38 = vmul.f32 %v1237_v21, %v3035_v45  ;;  %v1259_v45 = vld [vmem:[#allocation3] sm:$0xff] }
 0x27f   : > { %v2125_v39 = vpop.eup %2124  ;;  %v1238_v23 = vmul.f32 %v2123_v56, %v3008_v11  ;;  %1427 = vmatprep.mubr.f32.mxu1 %v1252_v29 }
 0x280   : > { %v1239_v35 = vmul.f32 %v2125_v39, %v3015_v24  ;;  %1428 = vmatmul.mubr.f32.vlgmr.msra.gmra.mrb[16].mxu1 %v1251_v0  ;;  %v1274_v0 = vld [vmem:[#allocation3 + $0x78] sm:$0xff] }
 0x281   : > { %v2127_v40 = vpop.eup %2126  ;;  %v1254_v59 = vmul.f32 %v1238_v23, %v3038_v14 }
 0x282   : > { %v1240_v41 = vmul.f32 %v2127_v40, %v3018_v27  ;;  %v1255_v6 = vmul.f32 %v1239_v35, %v1120_v44  ;;  %v1505_v35 = vld [vmem:[%s2658_s2 + $0x8] sm:$0xff] (!%p1725_p6) }
 0x283   : > { %1433 = vmatprep.mubr.f32.mxu1 %v1254_v59  ;;  %v1506_v59 = vld [vmem:[%s2658_s2 + $0x10] sm:$0xff] (!%p1725_p6) }
 0x284   : > { %v1256_v7 = vmul.f32 %v1240_v41, %v1122_v58  ;;  %1434 = vmatmul.mubr.f32.gmra.mrb[18].mxu1 %v1253_v38  ;;  %v1265_v58 = vld [vmem:[#allocation3 + $0x30] sm:$0xff]  ;;  %v1504_v38 = vld [vmem:[%s2658_s2] sm:$0xff] (!%p1725_p6) }
 0x285   : > { %v2129_v1 = vpop.eup %2128 }
 0x286   : > { %v2131_v8 = vpop.eup %2130  ;;  %v1241_v12 = vmul.f32 %v2129_v1, %v3027_v37  ;;  %1439 = vmatprep.mubr.f32.mxu1 %v1256_v7  ;;  %v1507_v1 = vld [vmem:[%s2658_s2 + $0x18] sm:$0xff] (!%p1725_p6) }
 0x287   : > { %v1242_v11 = vmul.f32 %v2131_v8, %v3031_v42  ;;  %v1263_v42 = vld [vmem:[#allocation3 + $0x20] sm:$0xff] }
 0x288   : > { %v1257_v13 = vmul.f32 %v1241_v12, %v1126_v10  ;;  %1440 = vmatmul.mubr.f32.gmra.mrb[20].mxu1 %v1255_v6 }
 0x289   : > { %v1258_v24 = vmul.f32 %v1242_v11, %v1128_v16  ;;  %v1269_v16 = vld [vmem:[#allocation3 + $0x50] sm:$0xff]  ;;  %v1508_v11 = vld [vmem:[%s2658_s2 + $0x20] sm:$0xff] (!%p1725_p6) }
 0x28b   : > { %1445 = vmatprep.mubr.f32.mxu1 %v1258_v24  ;;  %v1509_v24 = vld [vmem:[%s2658_s2 + $0x28] sm:$0xff] (!%p1725_p6) }
 0x28c   : > { %1446 = vmatmul.mubr.f32.gmra.mrb[22].mxu1 %v1257_v13 }
 0x341   : > { %v1405_v47 = vpop.f32.mrb[16].mxu0 }
 0x342   : > { %v1452_v27 = vadd.f32 %v1405_v47, %v1259_v45  ;;  %v1407_v14 = vpop.f32.mrb[17].mxu0 }
 0x343   : > { %v1453_v19 = vadd.f32 %v1407_v14, %v1260_v43 }
 0x344   : > { %1468 = vst [vmem:[#allocation3] sm:$0xff] %v1452_v27  ;;  %v1510_v27 = vld [vmem:[%s2658_s2 + $0x30] sm:$0xff] (!%p1725_p6) }
 0x345   : > { %1469 = vst [vmem:[#allocation3 + $0x8] sm:$0xff] %v1453_v19  ;;  %v1411_v28 = vpop.f32.mrb[18].mxu0 }
 0x346   : > { %v1454_v37 = vadd.f32 %v1411_v28, %v1261_v49  ;;  %v1413_v20 = vpop.f32.mrb[19].mxu0  ;;  %v1511_v49 = vld [vmem:[%s2658_s2 + $0x38] sm:$0xff] (!%p1725_p6)  ;;  %v1512_v28 = vld [vmem:[%s2658_s2 + $0x40] sm:$0xff] (!%p1725_p6) }
 0x347   : > { %v1455_v30 = vadd.f32 %v1413_v20, %v1262_v51 }
 0x348   : > { %1470 = vst [vmem:[#allocation3 + $0x10] sm:$0xff] %v1454_v37 }
 0x349   : > { %1471 = vst [vmem:[#allocation3 + $0x18] sm:$0xff] %v1455_v30  ;;  %v1417_v52 = vpop.f32.mrb[20].mxu0 }
 0x34a   : > { %v1456_v44 = vadd.f32 %v1417_v52, %v1263_v42  ;;  %v1419_v54 = vpop.f32.mrb[21].mxu0  ;;  %v1513_v42 = vld [vmem:[%s2658_s2 + $0x48] sm:$0xff] (!%p1725_p6) }
 0x34b   : > { %v1457_v57 = vadd.f32 %v1419_v54, %v1264_v31  ;;  %v1488_v56 = vld [vmem:[#allocation3] sm:$0xff] (!%p1725_p6) }
 0x34c   : > { %1472 = vst [vmem:[#allocation3 + $0x20] sm:$0xff] %v1456_v44  ;;  %v1489_v39 = vld [vmem:[#allocation3 + $0x8] sm:$0xff] (!%p1725_p6)  ;;  %v1520_v23 = vadd.f32 (!%p1725_p6), %v1504_v38, %v1488_v56  ;;  %v1514_v44 = vld [vmem:[%s2658_s2 + $0x50] sm:$0xff] (!%p1725_p6) }
 0x34d   : > { %1473 = vst [vmem:[#allocation3 + $0x28] sm:$0xff] %v1457_v57  ;;  %v1521_v41 = vadd.f32 (!%p1725_p6), %v1505_v35, %v1489_v39  ;;  %v1515_v57 = vld [vmem:[%s2658_s2 + $0x58] sm:$0xff] (!%p1725_p6) }
 0x34e   : > { %1536 = vst [vmem:[%s2669_s26] sm:$0xff] (!%p1725_p6), %v1520_v23 }
 0x34f   : > { %v1423_v60 = vpop.f32.mrb[22].mxu0  ;;  %v1490_v40 = vld [vmem:[#allocation3 + $0x10] sm:$0xff] (!%p1725_p6)  ;;  %1537 = vst [vmem:[%s2669_s26 + $0x8] sm:$0xff] (!%p1725_p6), %v1521_v41 }
 0x350   : > { %v1458_v61 = vadd.f32 %v1423_v60, %v1265_v58  ;;  %v1425_v62 = vpop.f32.mrb[23].mxu0  ;;  %v1522_v6 = vadd.f32 (!%p1725_p6), %v1506_v59, %v1490_v40  ;;  %v1491_v7 = vld [vmem:[#allocation3 + $0x18] sm:$0xff] (!%p1725_p6) }
 0x351   : > { %v1459_v53 = vadd.f32 %v1425_v62, %v1266_v46  ;;  %v1523_v12 = vadd.f32 (!%p1725_p6), %v1507_v1, %v1491_v7 }
 0x352   : > { %1474 = vst [vmem:[#allocation3 + $0x30] sm:$0xff] %v1458_v61  ;;  %1538 = vst [vmem:[%s2669_s26 + $0x10] sm:$0xff] (!%p1725_p6), %v1522_v6  ;;  %v1516_v61 = vld [vmem:[%s2658_s2 + $0x60] sm:$0xff] (!%p1725_p6) }
 0x353   : > { %1475 = vst [vmem:[#allocation3 + $0x38] sm:$0xff] %v1459_v53  ;;  %v1429_v55 = vpop.f32.mrb[16].mxu1  ;;  %v1492_v8 = vld [vmem:[#allocation3 + $0x20] sm:$0xff] (!%p1725_p6)  ;;  %1539 = vst [vmem:[%s2669_s26 + $0x18] sm:$0xff] (!%p1725_p6), %v1523_v12 }
 0x354   : > { %v1460_v10 = vadd.f32 %v1429_v55, %v1267_v3  ;;  %v1431_v15 = vpop.f32.mrb[17].mxu1  ;;  %v1493_v13 = vld [vmem:[#allocation3 + $0x28] sm:$0xff] (!%p1725_p6)  ;;  %v1524_v45 = vadd.f32 (!%p1725_p6), %v1508_v11, %v1492_v8  ;;  %v1518_v55 = vld [vmem:[%s2658_s2 + $0x70] sm:$0xff] (!%p1725_p6) }
 0x355   : > { %v1461_v48 = vadd.f32 %v1431_v15, %v1268_v9  ;;  %v1525_v43 = vadd.f32 (!%p1725_p6), %v1509_v24, %v1493_v13  ;;  %v1517_v3 = vld [vmem:[%s2658_s2 + $0x68] sm:$0xff] (!%p1725_p6) }
 0x356   : > { %1476 = vst [vmem:[#allocation3 + $0x40] sm:$0xff] %v1460_v10  ;;  %1540 = vst [vmem:[%s2669_s26 + $0x20] sm:$0xff] (!%p1725_p6), %v1524_v45 }
 0x357   : > { %1477 = vst [vmem:[#allocation3 + $0x48] sm:$0xff] %v1461_v48  ;;  %v1435_v18 = vpop.f32.mrb[18].mxu1  ;;  %1541 = vst [vmem:[%s2669_s26 + $0x28] sm:$0xff] (!%p1725_p6), %v1525_v43 }
 0x358   : > { %v1462_v22 = vadd.f32 %v1435_v18, %v1269_v16  ;;  %v1437_v25 = vpop.f32.mrb[19].mxu1  ;;  %v1519_v16 = vld [vmem:[%s2658_s2 + $0x78] sm:$0xff] (!%p1725_p6) }
 0x359   : > { %v1463_v63 = vadd.f32 %v1437_v25, %v1270_v17  ;;  %v1494_v47 = vld [vmem:[#allocation3 + $0x30] sm:$0xff] (!%p1725_p6) }
 0x35a   : > { %1478 = vst [vmem:[#allocation3 + $0x50] sm:$0xff] %v1462_v22  ;;  %v1495_v14 = vld [vmem:[#allocation3 + $0x38] sm:$0xff] (!%p1725_p6)  ;;  %v1526_v19 = vadd.f32 (!%p1725_p6), %v1510_v27, %v1494_v47 }
 0x35b   : > { %1479 = vst [vmem:[#allocation3 + $0x58] sm:$0xff] %v1463_v63  ;;  %v1441_v32 = vpop.f32.mrb[20].mxu1  ;;  %v1527_v37 = vadd.f32 (!%p1725_p6), %v1511_v49, %v1495_v14 }
 0x35c   : > { %v1464_v33 = vadd.f32 %v1441_v32, %v1271_v26  ;;  %v1443_v50 = vpop.f32.mrb[21].mxu1  ;;  %1542 = vst [vmem:[%s2669_s26 + $0x30] sm:$0xff] (!%p1725_p6), %v1526_v19 }
 0x35d   : > { %v1465_v34 = vadd.f32 %v1443_v50, %v1272_v4  ;;  %1487 = sbr.rel (%p1725_p6) target bundleno = 878 (0x36e), region = 94  ;;  %v1496_v51 = vld [vmem:[#allocation3 + $0x40] sm:$0xff] (!%p1725_p6)  ;;  %1543 = vst [vmem:[%s2669_s26 + $0x38] sm:$0xff] (!%p1725_p6), %v1527_v37 }
 0x35e   : > { %1480 = vst [vmem:[#allocation3 + $0x60] sm:$0xff] %v1464_v33  ;;  %v1528_v20 = vadd.f32 (!%p1725_p6), %v1512_v28, %v1496_v51  ;;  %v1497_v30 = vld [vmem:[#allocation3 + $0x48] sm:$0xff] (!%p1725_p6) }
 0x35f   : > { %1481 = vst [vmem:[#allocation3 + $0x68] sm:$0xff] %v1465_v34  ;;  %v1447_v2 = vpop.f32.mrb[22].mxu1  ;;  %v1529_v52 = vadd.f32 (!%p1725_p6), %v1513_v42, %v1497_v30 }
 0x360   : > { %v1466_v5 = vadd.f32 %v1447_v2, %v1273_v36  ;;  %v1449_v21 = vpop.f32.mrb[23].mxu1  ;;  %1544 = vst [vmem:[%s2669_s26 + $0x40] sm:$0xff] (!%p1725_p6), %v1528_v20 }
 0x361   : > { %v1467_v29 = vadd.f32 %v1449_v21, %v1274_v0  ;;  %v1498_v31 = vld [vmem:[#allocation3 + $0x50] sm:$0xff] (!%p1725_p6)  ;;  %1545 = vst [vmem:[%s2669_s26 + $0x48] sm:$0xff] (!%p1725_p6), %v1529_v52 }
 0x362   : > { %1482 = vst [vmem:[#allocation3 + $0x70] sm:$0xff] %v1466_v5  ;;  %v1499_v54 = vld [vmem:[#allocation3 + $0x58] sm:$0xff] (!%p1725_p6)  ;;  %v1530_v58 = vadd.f32 (!%p1725_p6), %v1514_v44, %v1498_v31 }
 0x363   : > { %1483 = vst [vmem:[#allocation3 + $0x78] sm:$0xff] %v1467_v29  ;;  %v1531_v46 = vadd.f32 (!%p1725_p6), %v1515_v57, %v1499_v54 }
 0x364   : > { %1546 = vst [vmem:[%s2669_s26 + $0x50] sm:$0xff] %v1530_v58 }
 0x365   : > { %v1500_v60 = vld [vmem:[#allocation3 + $0x60] sm:$0xff]  ;;  %1547 = vst [vmem:[%s2669_s26 + $0x58] sm:$0xff] %v1531_v46 }
 0x366   : > { %v1501_v62 = vld [vmem:[#allocation3 + $0x68] sm:$0xff]  ;;  %v1532_v53 = vadd.f32 %v1516_v61, %v1500_v60 }
 0x367   : > { %v1533_v10 = vadd.f32 %v1517_v3, %v1501_v62 }
 0x368   : > { %1548 = vst [vmem:[%s2669_s26 + $0x60] sm:$0xff] %v1532_v53 }
 0x369   : > { %v1502_v9 = vld [vmem:[#allocation3 + $0x70] sm:$0xff]  ;;  %1549 = vst [vmem:[%s2669_s26 + $0x68] sm:$0xff] %v1533_v10 }
 0x36a   : > { %v1534_v15 = vadd.f32 %v1518_v55, %v1502_v9  ;;  %v1503_v48 = vld [vmem:[#allocation3 + $0x78] sm:$0xff] }
 0x36b   : > { %v1535_v17 = vadd.f32 %v1519_v16, %v1503_v48 }
 0x36c   : > { %1550 = vst [vmem:[%s2669_s26 + $0x70] sm:$0xff] %v1534_v15 }
 0x36d   : > { %1551 = vst [vmem:[%s2669_s26 + $0x78] sm:$0xff] %v1535_v17 }
 0x36e PF: > { %s1737_s23 = sshll.u32 %s2230_s24, 11  ;;  %s1567_s16 = sshll.u32 %s2669_s26, 4  ;;  %s3103_s16 = int_to_ptr.vmem [resolvable:$true] %s1567_s16 }
 0x36f   : > { %s3100_s12 = scalar_lea.hbm %s3170_s5, %s1737_s23  ;;  %s3185_s2 = sand.u32 1, %s2210_s19  }
 0x370   : > { %s3107_s17 = scalar_lea.sflag [#allocation7], %s3185_s2  ;;  %s2132_s28 = scalar_lea.vmem %s3103_s16, 2048 }
 0x371   : > { %p2133_p7 = scmp.ne.s32.totalorder %s3103_s16, %s2132_s28  ;;  %s2245_s24 = smov [#allocation6]  }
 0x372   : > { %s2136_s7 = sshll.u32 %s2245_s24, 4  ;;  %s2137_s7 = int_to_ptr.vmem [resolvable:$false] %s2136_s7 }
 0x373   : > { %p2134_p8 = pnand %p2133_p7, %p2357_p10  ;;  %s2138_s8 = scalar_lea.vmem %s2137_s7, 4096 }
 0x374   : > { %p2139_p11 = scmp.lt.s32.totalorder %s3103_s16, %s2137_s7  ;;  %p2140_p13 = scmp.lt.s32.totalorder %s2138_s8, %s2132_s28 }
 0x375   : > { %p2135_p9 = pneg %p2134_p8 }
 0x376   : > { %p2141_p0 = por %p2140_p13, %p2139_p11 }
 0x378   : > { %p2142_p1 = pnand %p2141_p0, %p2135_p9 }
 0x37a   : > { %2145 = shalt.err (!%p2142_p1)
}
 0x37b   : > { %s2146_s26 = scalar_lea.hbm %s3100_s12, 2048  ;;  %s2150_s29 = scalar_lea.hbm %s3170_s5, 4096 }
 0x37c   : > { %p2147_p2 = scmp.ne.s32.totalorder %s3100_s12, %s2146_s26  ;;  %p2151_p5 = scmp.lt.u32.totalorder %s3100_s12, %s3170_s5 }
 0x37d   : > { %p2152_p6 = scmp.lt.u32.totalorder %s2150_s29, %s2146_s26  ;;  %p2154_p8 = scmp.lt.u32.totalorder %s2146_s26, %s3100_s12 }
 0x37e   : > { %p2148_p3 = pnand %p2147_p2, %p2357_p10 }
 0x37f   : > { %p2153_p7 = por %p2152_p6, %p2151_p5 }
 0x380   : > { %p2149_p4 = pneg %p2148_p3 }
 0x381   : > { %p2155_p9 = por %p2154_p8, %p2153_p7 }
 0x383   : > { %p2156_p11 = pnand %p2155_p9, %p2149_p4 }
 0x385   : > { %2159 = shalt.err (!%p2156_p11)
}
 0x386   : > { %s2246_s23 = smov 256   ;;  %s2247_s6 = smov 16  }
 0x387   : > { %1962 = dma.vmem_to_hbm [thread:$0]  (%p2357_p10), %s3103_s16, 2048, %s3100_s12, %s3107_s17, %s2246_s23, %s2246_s23, %s2247_s6  }
 0x388 PF: > { %p1968_p13 = scmp.ge.s32.totalorder %s2242_s27, 2  ;;  %s1582_s10 = sand.u32 1, %s2206_s18  }
 0x389   : > { %s1583_s2 = scalar_lea.sflag [#allocation7], %s1582_s10 }
 0x38a   : > { %p1965_p0 = pnand %p1968_p13, %p2364_p12 }
 0x38c   : > { %2201 = dma.done.wait (!%p1965_p0), %s1583_s2, 2048  }
 0x38d   : > { %2203 = vsyncadd (!%p1965_p0), %s1583_s2, 4294965248  ;;  %s18_s27 = sadd.s32 1, %s2242_s27   ;;  %s3186_s24 = sld [smem:[#allocation9_spill]] }
 0x38e   : > { %p15_p1 = scmp.ge.s32.totalorder %s18_s27, 6   ;;  %s3187_s13 = sld [smem:[#allocation10_spill]] }
 0x38f   : > { %s3188_s26 = sld [smem:[#allocation11_spill]]  ;;  %s3189_s18 = smov %s2210_s19 }
 0x390   : > { %s3190_s19 = smov %s2214_s20  ;;  %s3191_s20 = smov %s2362_s14 }
 0x391   : > { %s3192_s21 = smov %s2222_s22  ;;  %s3193_s22 = smov %s2351_s11 }
 0x392   : > { %s3194_s23 = smov %s2234_s25  ;;  %17 = sbr.rel (!%p15_p1) target bundleno = 9 (0x9), region = 148 }
 0x394   : > { %s3195_s25 = smov %s3187_s13 }
 0x399   :  { %1588 = vsyncpa [#allocation7], 1 }
 0x39a   :  { %1590 = vsyncpa [#allocation7 + $0x1], 1 }

</bundles_post_ra>
